<compile_context>
chip_gen: v6e
topology: v6e:2x2x1
jax: 0.10.0
libtpu: 0.0.40
codegen_flags: <defaults>
</compile_context>

<pallas_src>
import functools

import jax
import jax.numpy as jnp
from jax import lax
from jax.experimental import pallas as pl
from jax.experimental.pallas import tpu as pltpu


def _round_up(v, m):
    return ((v + m - 1) // m) * m


def _mamba_layer_kernel(x_ref, w_nin_ref, bn_shift_ref, w_in_x_ref, w_in_z_ref,
                        w_conv_ref, b_conv_ref, w_delta_ref, b_dt_ref,
                        a_flat_ref, q_ref, qt_ref, w_bc_ref, d_par_ref, w_out_ref,
                        o_ref,
                        xext_ref, dapre_ref, dbu_ref, hall_ref, hcarry_ref,
                        *, T, d_inner, d_state, K, mm_dtype):
    f32 = jnp.float32
    F = d_state * d_inner
    c = pl.program_id(1)

    # --- reset the cross-chunk carries at the start of every batch element ---
    @pl.when(c == 0)
    def _():
        hcarry_ref[...] = jnp.zeros_like(hcarry_ref)
        xext_ref[pl.ds(0, 8), :] = jnp.zeros((8, d_inner), f32)     # conv halo rows

    x = x_ref[0]                                                     # (T, C) f32

    # --- 1x1x1 conv (no bias) + BatchNorm3d(eval) + ReLU, BN folded into weights ---
    h1 = jnp.dot(x.astype(mm_dtype), w_nin_ref[...],
                 preferred_element_type=f32) + bn_shift_ref[...]
    h1 = jnp.maximum(h1, 0.0)                                        # (T, C)
    h1m = h1.astype(mm_dtype)

    # --- Mamba in_proj ---
    xm = jnp.dot(h1m, w_in_x_ref[...], preferred_element_type=f32)   # (T, d_inner)
    z = jnp.dot(h1m, w_in_z_ref[...], preferred_element_type=f32)    # (T, d_inner)

    # --- causal depthwise conv1d (kernel K) with K-1 halo rows carried per chunk ---
    # xext layout: rows [8-(K-1), 8) hold the previous chunk's tail, rows [8, 8+T)
    # hold the current chunk (aligned store); tap k reads rows [8-(K-1)+k, ..+T).
    xext_ref[pl.ds(8, T), :] = xm
    acc = jnp.zeros((T, d_inner), f32)
    for k in range(K):
        tap = w_conv_ref[k:k + 1, :]                                 # (1, d_inner)
        acc = acc + tap * xext_ref[pl.ds(8 - (K - 1) + k, T), :]
    xext_ref[pl.ds(8 - (K - 1), K - 1), :] = xm[T - (K - 1):, :]     # halo for next chunk
    xc = acc + b_conv_ref[...]
    xs = xc * (1.0 / (1.0 + jnp.exp(-xc)))                           # SiLU, (T, d_inner)
    xsm = xs.astype(mm_dtype)

    # --- delta = softplus(xs @ (dt_proj ∘ x_proj_dt) + b_dt)  (f32 math) ---
    dpre = jnp.dot(xsm, w_delta_ref[...], preferred_element_type=f32) + b_dt_ref[...]
    delta = jnp.maximum(dpre, 0.0) + jnp.log(1.0 + jnp.exp(-jnp.abs(dpre)))

    # --- fused B/C projections, replicated onto the flattened (state*inner) lanes ---
    bc = jnp.dot(xsm, w_bc_ref[...], preferred_element_type=f32)     # (T, 2F)
    brep = bc[:, :F]
    crep = bc[:, F:]

    # --- fused [delta ; delta*u] tiling across states via the 0/1 Q matrix (MXU) ---
    stacked = jnp.concatenate([delta, delta * xs], axis=0).astype(mm_dtype)  # (2T, d_inner)
    dd = jnp.dot(stacked, q_ref[...], preferred_element_type=f32)    # (2T, F)
    dapre_ref[...] = dd[:T, :] * a_flat_ref[...]                     # delta * A (pre-exp)
    dbu_ref[...] = dd[T:, :] * brep                                  # delta * B * u

    # --- selective scan: (8, F) slab loads/stores, 8 unrolled steps, f32 carry ---
    def scan_group(g, h):
        base = pl.multiple_of(g * 8, 8)
        da_g = jnp.exp(dapre_ref[pl.ds(base, 8), :])                 # EUP work under the scan
        dbu_g = dbu_ref[pl.ds(base, 8), :]
        rows = []
        for j in range(8):                                           # static unroll
            h = da_g[j:j + 1, :] * h + dbu_g[j:j + 1, :]
            rows.append(h)
        hall_ref[pl.ds(base, 8), :] = jnp.concatenate(rows, axis=0)
        return h

    h_last = lax.fori_loop(0, T // 8, scan_group, hcarry_ref[...])
    hcarry_ref[...] = h_last                                         # carry to next chunk

    # --- y[t, i] = sum_s h[t, (s,i)] * C[t, s]  (+ D*u), gated by SiLU(z) ---
    hc = hall_ref[...] * crep                                        # (T, F) f32
    y = jnp.dot(hc.astype(mm_dtype), qt_ref[...],
                preferred_element_type=f32)                          # (T, d_inner)
    y = y + xs * d_par_ref[...]
    y = y * (z * (1.0 / (1.0 + jnp.exp(-z))))

    # --- out_proj, stored transposed (C, T): lane-dense store, free NCDHW reshape ---
    o_ref[0] = lax.dot_general(w_out_ref[...], y, (((1,), (1,)), ((), ())),
                               preferred_element_type=f32)           # (C, T)


def mamba_layer_forward(x, params, *, d_state=16, d_conv=4, expand=2, eps=1e-5,
                        chunk=512, matmul_dtype=jnp.bfloat16,
                        vmem_limit_bytes=32 * 1024 * 1024):
    (w_nin, gamma, beta, rmean, rvar,
     w_in_proj, w_conv1d, b_conv1d, w_x_proj, w_dt_proj, b_dt_proj,
     a_log, d_param, w_out_proj) = params

    N, C, Dd, Hh, Ww = x.shape
    L = Dd * Hh * Ww
    d_inner = expand * C
    dt_rank = -(-C // 16)
    K = d_conv
    F = d_state * d_inner
    f32 = jnp.float32
    mm = matmul_dtype

    # Token-chunk size: multiple of 128 so the (C, T) output block is lane-dense.
    T = _round_up(min(chunk, L), 128)
    L_pad = _round_up(L, T)
    n_chunks = L_pad // T

    # tokens: (B, C, D, H, W) -> (B, L, C), zero-pad token axis to L_pad (causal-safe).
    x_tok = jnp.transpose(x.reshape(N, C, L), (0, 2, 1)).astype(f32)
    if L_pad != L:
        x_tok = jnp.pad(x_tok, ((0, 0), (0, L_pad - L), (0, 0)))

    # fold 1x1 conv (no bias) + BN(eval) into a single weight + shift
    scale = gamma / jnp.sqrt(rvar + eps)
    w_nin_f = (w_nin * scale[:, None]).T.astype(mm)                  # (C, C)
    bn_shift = (beta - rmean * scale).reshape(1, C).astype(f32)

    w_in_x = w_in_proj[:d_inner, :].T.astype(mm)                     # (C, d_inner)
    w_in_z = w_in_proj[d_inner:, :].T.astype(mm)                     # (C, d_inner)

    w_conv = jnp.transpose(w_conv1d).astype(f32)                     # (K, d_inner)
    b_conv = b_conv1d.reshape(1, d_inner).astype(f32)

    w_xdt = w_x_proj[:dt_rank, :]                                    # (dt_rank, d_inner)
    w_xb = w_x_proj[dt_rank:dt_rank + d_state, :]                    # (d_state, d_inner)
    w_xc = w_x_proj[dt_rank + d_state:, :]                           # (d_state, d_inner)

    # fuse x_proj "dt" slice with dt_proj (exact fold at highest precision)
    w_delta = jnp.matmul(w_dt_proj, w_xdt,
                         precision=lax.Precision.HIGHEST).T.astype(mm)   # (d_inner, d_inner)
    b_dt = b_dt_proj.reshape(1, d_inner).astype(f32)

    a_mat = -jnp.exp(a_log.astype(f32))                              # (d_inner, d_state)
    a_flat = a_mat.T.reshape(1, F).astype(f32)                       # [s*d_inner + i] = A[i, s]

    lane = jnp.arange(F)
    q_f32 = (lane[None, :] % d_inner == jnp.arange(d_inner)[:, None]).astype(f32)  # (d_inner, F)
    q_mm = q_f32.astype(mm)                                          # replicate across states
    qt_mm = q_f32.T.astype(mm)                                       # (F, d_inner) reduce states

    # B/C projections replicated onto the flattened lanes (exact, no wrapper matmul),
    # concatenated so the kernel does one (T, d_inner) @ (d_inner, 2F) matmul.
    w_brep = jnp.repeat(w_xb.T, d_inner, axis=1)                     # (d_inner, F)
    w_crep = jnp.repeat(w_xc.T, d_inner, axis=1)                     # (d_inner, F)
    w_bc = jnp.concatenate([w_brep, w_crep], axis=1).astype(mm)      # (d_inner, 2F)

    d_par = d_param.reshape(1, d_inner).astype(f32)
    w_out = w_out_proj.astype(f32)                                   # (C, d_inner), f32 dot

    kern = functools.partial(_mamba_layer_kernel, T=T, d_inner=d_inner,
                             d_state=d_state, K=K, mm_dtype=mm)

    def _w(shape):
        zeros = (0,) * len(shape)
        return pl.BlockSpec(shape, lambda b, c, _z=zeros: _z)

    out = pl.pallas_call(
        kern,
        out_shape=jax.ShapeDtypeStruct((N, C, L_pad), f32),
        grid_spec=pltpu.PrefetchScalarGridSpec(
            num_scalar_prefetch=0,
            grid=(N, n_chunks),
            in_specs=[
                pl.BlockSpec((1, T, C), lambda b, c: (b, c, 0)),
                _w((C, C)), _w((1, C)),
                _w((C, d_inner)), _w((C, d_inner)),
                _w((K, d_inner)), _w((1, d_inner)),
                _w((d_inner, d_inner)), _w((1, d_inner)),
                _w((1, F)), _w((d_inner, F)), _w((F, d_inner)), _w((d_inner, 2 * F)),
                _w((1, d_inner)), _w((C, d_inner)),
            ],
            out_specs=pl.BlockSpec((1, C, T), lambda b, c: (b, 0, c)),
            scratch_shapes=[
                pltpu.VMEM((T + 8, d_inner), f32),   # conv input + K-1 halo rows (persistent)
                pltpu.VMEM((T, F), f32),             # delta * A   (pre-exp)
                pltpu.VMEM((T, F), f32),             # delta * B * u
                pltpu.VMEM((T, F), f32),             # scan states h_t
                pltpu.VMEM((1, F), f32),             # h carry across chunks (persistent)
            ],
        ),
        compiler_params=pltpu.CompilerParams(
            dimension_semantics=("parallel", "arbitrary"),
            vmem_limit_bytes=vmem_limit_bytes),
    )(x_tok, w_nin_f, bn_shift, w_in_x, w_in_z, w_conv, b_conv,
      w_delta, b_dt, a_flat, q_mm, qt_mm, w_bc, d_par, w_out)

    if L_pad != L:
        out = out[:, :, :L]
    return out.reshape(N, C, Dd, Hh, Ww)


def _reference(x, params, *, d_state=16, d_conv=4, expand=2, eps=1e-5):
    (w_nin, gamma, beta, rmean, rvar,
     w_in_proj, w_conv1d, b_conv1d, w_x_proj, w_dt_proj, b_dt_proj,
     a_log, d_param, w_out_proj) = params
    N, C, Dd, Hh, Ww = x.shape
    L = Dd * Hh * Ww
    d_inner = expand * C
    dt_rank = -(-C // 16)
    K = d_conv

    xt = jnp.transpose(x.reshape(N, C, L), (0, 2, 1)).astype(jnp.float32)   # (B, L, C)
    h = xt @ w_nin.T
    scale = gamma / jnp.sqrt(rvar + eps)
    h = (h - rmean) * scale + beta
    h = jnp.maximum(h, 0.0)

    def mamba_one(x1):                                               # (L, C)
        xz = x1 @ w_in_proj.T
        xm, z = xz[:, :d_inner], xz[:, d_inner:]
        xpad = jnp.pad(xm, ((K - 1, 0), (0, 0)))
        xc = jnp.zeros_like(xm)
        for k in range(K):
            xc = xc + xpad[k:k + L, :] * w_conv1d[:, k][None, :]
        xc = xc + b_conv1d[None, :]
        xs = xc * jax.nn.sigmoid(xc)
        x_dbl = xs @ w_x_proj.T
        dt = x_dbl[:, :dt_rank]
        bm = x_dbl[:, dt_rank:dt_rank + d_state]
        cm = x_dbl[:, dt_rank + d_state:]
        delta = jax.nn.softplus(dt @ w_dt_proj.T + b_dt_proj[None, :])
        a_mat = -jnp.exp(a_log)
        da = jnp.exp(delta[:, :, None] * a_mat[None, :, :])          # (L, d_inner, d_state)
        dbu = (delta * xs)[:, :, None] * bm[:, None, :]

        def step(hst, inp):
            da_t, dbu_t, c_t = inp
            hst = da_t * hst + dbu_t
            return hst, jnp.sum(hst * c_t[None, :], axis=-1)

        _, ys = lax.scan(step, jnp.zeros((d_inner, d_state), jnp.float32), (da, dbu, cm))
        y = ys + xs * d_param[None, :]
        y = y * (z * jax.nn.sigmoid(z))
        return y @ w_out_proj.T                                      # (L, C)

    y = jax.vmap(mamba_one)(h)                                       # (B, L, C)
    return jnp.transpose(y, (0, 2, 1)).reshape(N, C, Dd, Hh, Ww)


if __name__ == "__main__":
    dim, d_state, d_conv, expand = 16, 16, 4, 2
    B, Dd, Hh, Ww = 2, 4, 6, 8     # L = 192 tokens -> 2 chunks of 128 (64 padded tokens)
    d_inner = expand * dim
    dt_rank = -(-dim // 16)

    key = jax.random.PRNGKey(0)
    ks = jax.random.split(key, 13)

    def u(k, shape, s):
        return jax.random.uniform(k, shape, jnp.float32, minval=-s, maxval=s)

    x = jax.random.normal(ks[0], (B, dim, Dd, Hh, Ww), dtype=jnp.float32)

    w_nin = u(ks[1], (dim, dim), 0.4)                                # 1x1x1 conv (no bias)
    gamma = 1.0 + 0.1 * jax.random.normal(ks[2], (dim,), jnp.float32)
    beta = 0.1 * jax.random.normal(ks[3], (dim,), jnp.float32)
    rmean = 0.1 * jax.random.normal(ks[4], (dim,), jnp.float32)
    rvar = jax.random.uniform(ks[5], (dim,), jnp.float32, minval=0.5, maxval=1.5)

    w_in_proj = u(ks[6], (2 * d_inner, dim), 0.4)                    # Mamba in_proj (no bias)
    w_conv1d = u(ks[7], (d_inner, d_conv), 0.5)                      # depthwise conv1d
    b_conv1d = u(ks[8], (d_inner,), 0.5)
    w_x_proj = u(ks[9], (dt_rank + 2 * d_state, d_inner), 0.4)       # x_proj (no bias)
    w_dt_proj = u(ks[10], (d_inner, dt_rank), 0.8)                   # dt_proj (+bias)
    b_dt_proj = u(ks[11], (d_inner,), 0.5)
    a_log = jnp.log(jnp.broadcast_to(
        jnp.arange(1, d_state + 1, dtype=jnp.float32), (d_inner, d_state)))
    d_param = jnp.ones((d_inner,), jnp.float32)
    w_out_proj = u(ks[12], (dim, d_inner), 0.4)                      # out_proj (no bias)

    params = (w_nin, gamma, beta, rmean, rvar,
              w_in_proj, w_conv1d, b_conv1d, w_x_proj, w_dt_proj, b_dt_proj,
              a_log, d_param, w_out_proj)

    with jax.default_matmul_precision("highest"):
        ref = jax.block_until_ready(
            _reference(x, params, d_state=d_state, d_conv=d_conv, expand=expand))

    # Exact-math variant (f32 matmuls): validates chunking, carry, halo and padding.
    out_f32 = jax.block_until_ready(
        mamba_layer_forward(x, params, d_state=d_state, d_conv=d_conv, expand=expand,
                            chunk=128, matmul_dtype=jnp.float32))
    assert out_f32.shape == (B, dim, Dd, Hh, Ww)
    assert jnp.allclose(out_f32, ref, rtol=2e-3, atol=2e-3), "f32 kernel mismatch vs reference"

    # Fast variant (bf16 matmul operands, f32 accumulation, f32 scan): looser tolerance.
    out_bf16 = jax.block_until_ready(
        mamba_layer_forward(x, params, d_state=d_state, d_conv=d_conv, expand=expand,
                            chunk=128, matmul_dtype=jnp.bfloat16))
    assert out_bf16.shape == (B, dim, Dd, Hh, Ww)
    assert jnp.allclose(out_bf16, ref, rtol=5e-2, atol=5e-2), "bf16 kernel mismatch vs reference"

    print("KERNEL_OK")
</pallas_src>

<mosaic_0001>
module attributes {stable_mosaic.version = 11 : i64} {
  func.func @_mamba_layer_kernel(%arg0: i32, %arg1: i32, %arg2: memref<1x128x16xf32, #tpu.memory_space<vmem>>, %arg3: memref<16x16xf32, #tpu.memory_space<vmem>>, %arg4: memref<1x16xf32, #tpu.memory_space<vmem>>, %arg5: memref<16x32xf32, #tpu.memory_space<vmem>>, %arg6: memref<16x32xf32, #tpu.memory_space<vmem>>, %arg7: memref<4x32xf32, #tpu.memory_space<vmem>>, %arg8: memref<1x32xf32, #tpu.memory_space<vmem>>, %arg9: memref<32x32xf32, #tpu.memory_space<vmem>>, %arg10: memref<1x32xf32, #tpu.memory_space<vmem>>, %arg11: memref<1x512xf32, #tpu.memory_space<vmem>>, %arg12: memref<32x512xf32, #tpu.memory_space<vmem>>, %arg13: memref<512x32xf32, #tpu.memory_space<vmem>>, %arg14: memref<32x1024xf32, #tpu.memory_space<vmem>>, %arg15: memref<1x32xf32, #tpu.memory_space<vmem>>, %arg16: memref<16x32xf32, #tpu.memory_space<vmem>>, %arg17: memref<1x16x128xf32, #tpu.memory_space<vmem>>, %arg18: memref<136x32xf32, #tpu.memory_space<vmem>>, %arg19: memref<128x512xf32, #tpu.memory_space<vmem>>, %arg20: memref<128x512xf32, #tpu.memory_space<vmem>>, %arg21: memref<128x512xf32, #tpu.memory_space<vmem>>, %arg22: memref<1x512xf32, #tpu.memory_space<vmem>>) attributes {dimension_semantics = [#tpu.dimension_semantics<parallel>, #tpu.dimension_semantics<arbitrary>], iteration_bounds = array<i64: 2, 2>, scalar_prefetch = 0 : i64, scratch_operands = 5 : i64, tpu.core_type = #tpu.core_type<tc>, window_params = [{transform_indices = @transform_0, window_bounds = array<i64: 1, 128, 16>}, {pipeline_mode = #tpu.pipeline_mode<synchronous>, transform_indices = @transform_1, window_bounds = array<i64: 16, 16>}, {pipeline_mode = #tpu.pipeline_mode<synchronous>, transform_indices = @transform_2, window_bounds = array<i64: 1, 16>}, {pipeline_mode = #tpu.pipeline_mode<synchronous>, transform_indices = @transform_3, window_bounds = array<i64: 16, 32>}, {pipeline_mode = #tpu.pipeline_mode<synchronous>, transform_indices = @transform_4, window_bounds = array<i64: 16, 32>}, {pipeline_mode = #tpu.pipeline_mode<synchronous>, transform_indices = @transform_5, window_bounds = array<i64: 4, 32>}, {pipeline_mode = #tpu.pipeline_mode<synchronous>, transform_indices = @transform_6, window_bounds = array<i64: 1, 32>}, {pipeline_mode = #tpu.pipeline_mode<synchronous>, transform_indices = @transform_7, window_bounds = array<i64: 32, 32>}, {pipeline_mode = #tpu.pipeline_mode<synchronous>, transform_indices = @transform_8, window_bounds = array<i64: 1, 32>}, {pipeline_mode = #tpu.pipeline_mode<synchronous>, transform_indices = @transform_9, window_bounds = array<i64: 1, 512>}, {pipeline_mode = #tpu.pipeline_mode<synchronous>, transform_indices = @transform_10, window_bounds = array<i64: 32, 512>}, {pipeline_mode = #tpu.pipeline_mode<synchronous>, transform_indices = @transform_11, window_bounds = array<i64: 512, 32>}, {pipeline_mode = #tpu.pipeline_mode<synchronous>, transform_indices = @transform_12, window_bounds = array<i64: 32, 1024>}, {pipeline_mode = #tpu.pipeline_mode<synchronous>, transform_indices = @transform_13, window_bounds = array<i64: 1, 32>}, {pipeline_mode = #tpu.pipeline_mode<synchronous>, transform_indices = @transform_14, window_bounds = array<i64: 16, 32>}, {transform_indices = @transform_15, window_bounds = array<i64: 1, 16, 128>}]} {
    %c0_i32 = arith.constant 0 : i32
    %0 = arith.cmpi eq, %arg1, %c0_i32 : i32
    %1 = arith.extui %0 : i1 to i32
    %c0_i32_0 = arith.constant 0 : i32
    %2 = arith.cmpi ne, %1, %c0_i32_0 : i32
    scf.if %2 {
      %cst_75 = arith.constant 0.000000e+00 : f32
      %108 = vector.broadcast %cst_75 : f32 to vector<1x512xf32>
      %c0_76 = arith.constant 0 : index
      %c0_77 = arith.constant 0 : index
      %109 = vector.load %arg22[%c0_76, %c0_77] : memref<1x512xf32, #tpu.memory_space<vmem>>, vector<1x512xf32>
      tpu.vector_store %arg22[%c0_76, %c0_77], %108 {strides = array<i32>} : memref<1x512xf32, #tpu.memory_space<vmem>>, vector<1x512xf32>,
      %cst_78 = arith.constant 0.000000e+00 : f32
      %110 = vector.broadcast %cst_78 : f32 to vector<8x32xf32>
      %c0_79 = arith.constant 0 : index
      %c0_80 = arith.constant 0 : index
      %111 = vector.load %arg18[%c0_79, %c0_80] : memref<136x32xf32, #tpu.memory_space<vmem>>, vector<8x32xf32>
      tpu.vector_store %arg18[%c0_79, %c0_80], %110 {strides = array<i32>} : memref<136x32xf32, #tpu.memory_space<vmem>>, vector<8x32xf32>,
    } else {
    }
    %c0 = arith.constant 0 : index
    %c0_1 = arith.constant 0 : index
    %c0_2 = arith.constant 0 : index
    %3 = vector.load %arg2[%c0, %c0_1, %c0_2] : memref<1x128x16xf32, #tpu.memory_space<vmem>>, vector<1x128x16xf32>
    %4 = vector.shape_cast %3 : vector<1x128x16xf32> to vector<128x16xf32>
    %c0_3 = arith.constant 0 : index
    %c0_4 = arith.constant 0 : index
    %5 = vector.load %arg3[%c0_3, %c0_4] : memref<16x16xf32, #tpu.memory_space<vmem>>, vector<16x16xf32>
    %cst = arith.constant dense<0.000000e+00> : vector<128x16xf32>
    %6 = tpu.matmul %4, %5, %cst {dimension_numbers = #tpu.dot_dimension_numbers<[1], [0], [0], [1], [0, 0, 1, 1], [], []>} : vector<128x16xf32>, vector<16x16xf32>, vector<128x16xf32> -> vector<128x16xf32>
    %c0_5 = arith.constant 0 : index
    %c0_6 = arith.constant 0 : index
    %7 = vector.load %arg4[%c0_5, %c0_6] : memref<1x16xf32, #tpu.memory_space<vmem>>, vector<1x16xf32>
    %8 = vector.broadcast %7 : vector<1x16xf32> to vector<128x16xf32>
    %9 = arith.addf %6, %8 : vector<128x16xf32>
    %cst_7 = arith.constant 0.000000e+00 : f32
    %10 = vector.broadcast %cst_7 : f32 to vector<128x16xf32>
    %11 = arith.maximumf %9, %10 : vector<128x16xf32>
    %c0_8 = arith.constant 0 : index
    %c0_9 = arith.constant 0 : index
    %12 = vector.load %arg5[%c0_8, %c0_9] : memref<16x32xf32, #tpu.memory_space<vmem>>, vector<16x32xf32>
    %cst_10 = arith.constant dense<0.000000e+00> : vector<128x32xf32>
    %13 = tpu.matmul %11, %12, %cst_10 {dimension_numbers = #tpu.dot_dimension_numbers<[1], [0], [0], [1], [0, 0, 1, 1], [], []>} : vector<128x16xf32>, vector<16x32xf32>, vector<128x32xf32> -> vector<128x32xf32>
    %c0_11 = arith.constant 0 : index
    %c0_12 = arith.constant 0 : index
    %14 = vector.load %arg6[%c0_11, %c0_12] : memref<16x32xf32, #tpu.memory_space<vmem>>, vector<16x32xf32>
    %cst_13 = arith.constant dense<0.000000e+00> : vector<128x32xf32>
    %15 = tpu.matmul %11, %14, %cst_13 {dimension_numbers = #tpu.dot_dimension_numbers<[1], [0], [0], [1], [0, 0, 1, 1], [], []>} : vector<128x16xf32>, vector<16x32xf32>, vector<128x32xf32> -> vector<128x32xf32>
    %c8 = arith.constant 8 : index
    %c0_14 = arith.constant 0 : index
    %16 = vector.load %arg18[%c8, %c0_14] : memref<136x32xf32, #tpu.memory_space<vmem>>, vector<128x32xf32>
    tpu.vector_store %arg18[%c8, %c0_14], %13 {strides = array<i32>} : memref<136x32xf32, #tpu.memory_space<vmem>>, vector<128x32xf32>,
    %cst_15 = arith.constant 0.000000e+00 : f32
    %17 = vector.broadcast %cst_15 : f32 to vector<128x32xf32>
    %c0_16 = arith.constant 0 : index
    %c0_17 = arith.constant 0 : index
    %18 = vector.load %arg7[%c0_16, %c0_17] : memref<4x32xf32, #tpu.memory_space<vmem>>, vector<1x32xf32>
    %c5 = arith.constant 5 : index
    %c0_18 = arith.constant 0 : index
    %19 = vector.load %arg18[%c5, %c0_18] : memref<136x32xf32, #tpu.memory_space<vmem>>, vector<128x32xf32>
    %20 = vector.broadcast %18 : vector<1x32xf32> to vector<128x32xf32>
    %21 = arith.mulf %20, %19 : vector<128x32xf32>
    %22 = arith.addf %17, %21 : vector<128x32xf32>
    %c1 = arith.constant 1 : index
    %c0_19 = arith.constant 0 : index
    %23 = vector.load %arg7[%c1, %c0_19] : memref<4x32xf32, #tpu.memory_space<vmem>>, vector<1x32xf32>
    %c6 = arith.constant 6 : index
    %c0_20 = arith.constant 0 : index
    %24 = vector.load %arg18[%c6, %c0_20] : memref<136x32xf32, #tpu.memory_space<vmem>>, vector<128x32xf32>
    %25 = vector.broadcast %23 : vector<1x32xf32> to vector<128x32xf32>
    %26 = arith.mulf %25, %24 : vector<128x32xf32>
    %27 = arith.addf %22, %26 : vector<128x32xf32>
    %c2 = arith.constant 2 : index
    %c0_21 = arith.constant 0 : index
    %28 = vector.load %arg7[%c2, %c0_21] : memref<4x32xf32, #tpu.memory_space<vmem>>, vector<1x32xf32>
    %c7 = arith.constant 7 : index
    %c0_22 = arith.constant 0 : index
    %29 = vector.load %arg18[%c7, %c0_22] : memref<136x32xf32, #tpu.memory_space<vmem>>, vector<128x32xf32>
    %30 = vector.broadcast %28 : vector<1x32xf32> to vector<128x32xf32>
    %31 = arith.mulf %30, %29 : vector<128x32xf32>
    %32 = arith.addf %27, %31 : vector<128x32xf32>
    %c3 = arith.constant 3 : index
    %c0_23 = arith.constant 0 : index
    %33 = vector.load %arg7[%c3, %c0_23] : memref<4x32xf32, #tpu.memory_space<vmem>>, vector<1x32xf32>
    %c8_24 = arith.constant 8 : index
    %c0_25 = arith.constant 0 : index
    %34 = vector.load %arg18[%c8_24, %c0_25] : memref<136x32xf32, #tpu.memory_space<vmem>>, vector<128x32xf32>
    %35 = vector.broadcast %33 : vector<1x32xf32> to vector<128x32xf32>
    %36 = arith.mulf %35, %34 : vector<128x32xf32>
    %37 = arith.addf %32, %36 : vector<128x32xf32>
    %38 = vector.extract_strided_slice %13 {offsets = [125, 0], sizes = [3, 32], strides = [1, 1]} : vector<128x32xf32> to vector<3x32xf32>
    %c5_26 = arith.constant 5 : index
    %c0_27 = arith.constant 0 : index
    %39 = vector.load %arg18[%c5_26, %c0_27] : memref<136x32xf32, #tpu.memory_space<vmem>>, vector<3x32xf32>
    tpu.vector_store %arg18[%c5_26, %c0_27], %38 {strides = array<i32>} : memref<136x32xf32, #tpu.memory_space<vmem>>, vector<3x32xf32>,
    %c0_28 = arith.constant 0 : index
    %c0_29 = arith.constant 0 : index
    %40 = vector.load %arg8[%c0_28, %c0_29] : memref<1x32xf32, #tpu.memory_space<vmem>>, vector<1x32xf32>
    %41 = vector.broadcast %40 : vector<1x32xf32> to vector<128x32xf32>
    %42 = arith.addf %37, %41 : vector<128x32xf32>
    %cst_30 = arith.constant 0.000000e+00 : f32
    %43 = vector.broadcast %cst_30 : f32 to vector<128x32xf32>
    %44 = arith.subf %43, %42 : vector<128x32xf32>
    %45 = math.exp %44 : vector<128x32xf32>
    %cst_31 = arith.constant 1.000000e+00 : f32
    %46 = vector.broadcast %cst_31 : f32 to vector<128x32xf32>
    %47 = arith.addf %46, %45 : vector<128x32xf32>
    %cst_32 = arith.constant 1.000000e+00 : f32
    %48 = vector.broadcast %cst_32 : f32 to vector<128x32xf32>
    %49 = arith.divf %48, %47 : vector<128x32xf32>
    %50 = arith.mulf %42, %49 : vector<128x32xf32>
    %c0_33 = arith.constant 0 : index
    %c0_34 = arith.constant 0 : index
    %51 = vector.load %arg9[%c0_33, %c0_34] : memref<32x32xf32, #tpu.memory_space<vmem>>, vector<32x32xf32>
    %cst_35 = arith.constant dense<0.000000e+00> : vector<128x32xf32>
    %52 = tpu.matmul %50, %51, %cst_35 {dimension_numbers = #tpu.dot_dimension_numbers<[1], [0], [0], [1], [0, 0, 1, 1], [], []>} : vector<128x32xf32>, vector<32x32xf32>, vector<128x32xf32> -> vector<128x32xf32>
    %c0_36 = arith.constant 0 : index
    %c0_37 = arith.constant 0 : index
    %53 = vector.load %arg10[%c0_36, %c0_37] : memref<1x32xf32, #tpu.memory_space<vmem>>, vector<1x32xf32>
    %54 = vector.broadcast %53 : vector<1x32xf32> to vector<128x32xf32>
    %55 = arith.addf %52, %54 : vector<128x32xf32>
    %cst_38 = arith.constant 0.000000e+00 : f32
    %56 = vector.broadcast %cst_38 : f32 to vector<128x32xf32>
    %57 = arith.maximumf %55, %56 : vector<128x32xf32>
    %58 = math.absf %55 : vector<128x32xf32>
    %cst_39 = arith.constant 0.000000e+00 : f32
    %59 = vector.broadcast %cst_39 : f32 to vector<128x32xf32>
    %60 = arith.subf %59, %58 : vector<128x32xf32>
    %61 = math.exp %60 : vector<128x32xf32>
    %cst_40 = arith.constant 1.000000e+00 : f32
    %62 = vector.broadcast %cst_40 : f32 to vector<128x32xf32>
    %63 = arith.addf %62, %61 : vector<128x32xf32>
    %64 = math.log %63 : vector<128x32xf32>
    %65 = arith.addf %57, %64 : vector<128x32xf32>
    %c0_41 = arith.constant 0 : index
    %c0_42 = arith.constant 0 : index
    %66 = vector.load %arg14[%c0_41, %c0_42] : memref<32x1024xf32, #tpu.memory_space<vmem>>, vector<32x1024xf32>
    %cst_43 = arith.constant dense<0.000000e+00> : vector<128x1024xf32>
    %67 = tpu.matmul %50, %66, %cst_43 {dimension_numbers = #tpu.dot_dimension_numbers<[1], [0], [0], [1], [0, 0, 1, 1], [], []>} : vector<128x32xf32>, vector<32x1024xf32>, vector<128x1024xf32> -> vector<128x1024xf32>
    %68 = vector.extract_strided_slice %67 {offsets = [0, 0], sizes = [128, 512], strides = [1, 1]} : vector<128x1024xf32> to vector<128x512xf32>
    %69 = vector.extract_strided_slice %67 {offsets = [0, 512], sizes = [128, 512], strides = [1, 1]} : vector<128x1024xf32> to vector<128x512xf32>
    %70 = arith.mulf %65, %50 : vector<128x32xf32>
    %71 = tpu.concatenate %65, %70 in 0 : vector<128x32xf32>, vector<128x32xf32> -> vector<256x32xf32>
    %c0_44 = arith.constant 0 : index
    %c0_45 = arith.constant 0 : index
    %72 = vector.load %arg12[%c0_44, %c0_45] : memref<32x512xf32, #tpu.memory_space<vmem>>, vector<32x512xf32>
    %cst_46 = arith.constant dense<0.000000e+00> : vector<256x512xf32>
    %73 = tpu.matmul %71, %72, %cst_46 {dimension_numbers = #tpu.dot_dimension_numbers<[1], [0], [0], [1], [0, 0, 1, 1], [], []>} : vector<256x32xf32>, vector<32x512xf32>, vector<256x512xf32> -> vector<256x512xf32>
    %74 = vector.extract_strided_slice %73 {offsets = [0, 0], sizes = [128, 512], strides = [1, 1]} : vector<256x512xf32> to vector<128x512xf32>
    %c0_47 = arith.constant 0 : index
    %c0_48 = arith.constant 0 : index
    %75 = vector.load %arg11[%c0_47, %c0_48] : memref<1x512xf32, #tpu.memory_space<vmem>>, vector<1x512xf32>
    %76 = vector.broadcast %75 : vector<1x512xf32> to vector<128x512xf32>
    %77 = arith.mulf %74, %76 : vector<128x512xf32>
    %c0_49 = arith.constant 0 : index
    %c0_50 = arith.constant 0 : index
    %78 = vector.load %arg19[%c0_49, %c0_50] : memref<128x512xf32, #tpu.memory_space<vmem>>, vector<128x512xf32>
    tpu.vector_store %arg19[%c0_49, %c0_50], %77 {strides = array<i32>} : memref<128x512xf32, #tpu.memory_space<vmem>>, vector<128x512xf32>,
    %79 = vector.extract_strided_slice %73 {offsets = [128, 0], sizes = [128, 512], strides = [1, 1]} : vector<256x512xf32> to vector<128x512xf32>
    %80 = arith.mulf %79, %68 : vector<128x512xf32>
    %c0_51 = arith.constant 0 : index
    %c0_52 = arith.constant 0 : index
    %81 = vector.load %arg20[%c0_51, %c0_52] : memref<128x512xf32, #tpu.memory_space<vmem>>, vector<128x512xf32>
    tpu.vector_store %arg20[%c0_51, %c0_52], %80 {strides = array<i32>} : memref<128x512xf32, #tpu.memory_space<vmem>>, vector<128x512xf32>,
    %c0_53 = arith.constant 0 : index
    %c0_54 = arith.constant 0 : index
    %82 = vector.load %arg22[%c0_53, %c0_54] : memref<1x512xf32, #tpu.memory_space<vmem>>, vector<1x512xf32>
    %c0_i32_55 = arith.constant 0 : i32
    %c16_i32 = arith.constant 16 : i32
    %83 = arith.addi %c0_i32_55, %c16_i32 : i32
    %c1_i32 = arith.constant 1 : i32
    %84 = scf.for %arg23 = %c0_i32_55 to %83 step %c1_i32 iter_args(%arg24 = %82) -> (vector<1x512xf32>)  : i32 {
      %c8_i32 = arith.constant 8 : i32
      %108 = arith.muli %arg23, %c8_i32 : i32
      %109 = tpu.assume_multiple %108, 8 : i32
      %110 = arith.index_cast %109 : i32 to index
      %c0_75 = arith.constant 0 : index
      %111 = vector.load %arg19[%110, %c0_75] : memref<128x512xf32, #tpu.memory_space<vmem>>, vector<8x512xf32>
      %112 = math.exp %111 : vector<8x512xf32>
      %113 = arith.index_cast %109 : i32 to index
      %c0_76 = arith.constant 0 : index
      %114 = vector.load %arg20[%113, %c0_76] : memref<128x512xf32, #tpu.memory_space<vmem>>, vector<8x512xf32>
      %115 = vector.extract_strided_slice %112 {offsets = [0, 0], sizes = [1, 512], strides = [1, 1]} : vector<8x512xf32> to vector<1x512xf32>
      %116 = arith.mulf %115, %arg24 : vector<1x512xf32>
      %117 = vector.extract_strided_slice %114 {offsets = [0, 0], sizes = [1, 512], strides = [1, 1]} : vector<8x512xf32> to vector<1x512xf32>
      %118 = arith.addf %116, %117 : vector<1x512xf32>
      %119 = vector.extract_strided_slice %112 {offsets = [1, 0], sizes = [1, 512], strides = [1, 1]} : vector<8x512xf32> to vector<1x512xf32>
      %120 = arith.mulf %119, %118 : vector<1x512xf32>
      %121 = vector.extract_strided_slice %114 {offsets = [1, 0], sizes = [1, 512], strides = [1, 1]} : vector<8x512xf32> to vector<1x512xf32>
      %122 = arith.addf %120, %121 : vector<1x512xf32>
      %123 = vector.extract_strided_slice %112 {offsets = [2, 0], sizes = [1, 512], strides = [1, 1]} : vector<8x512xf32> to vector<1x512xf32>
      %124 = arith.mulf %123, %122 : vector<1x512xf32>
      %125 = vector.extract_strided_slice %114 {offsets = [2, 0], sizes = [1, 512], strides = [1, 1]} : vector<8x512xf32> to vector<1x512xf32>
      %126 = arith.addf %124, %125 : vector<1x512xf32>
      %127 = vector.extract_strided_slice %112 {offsets = [3, 0], sizes = [1, 512], strides = [1, 1]} : vector<8x512xf32> to vector<1x512xf32>
      %128 = arith.mulf %127, %126 : vector<1x512xf32>
      %129 = vector.extract_strided_slice %114 {offsets = [3, 0], sizes = [1, 512], strides = [1, 1]} : vector<8x512xf32> to vector<1x512xf32>
      %130 = arith.addf %128, %129 : vector<1x512xf32>
      %131 = vector.extract_strided_slice %112 {offsets = [4, 0], sizes = [1, 512], strides = [1, 1]} : vector<8x512xf32> to vector<1x512xf32>
      %132 = arith.mulf %131, %130 : vector<1x512xf32>
      %133 = vector.extract_strided_slice %114 {offsets = [4, 0], sizes = [1, 512], strides = [1, 1]} : vector<8x512xf32> to vector<1x512xf32>
      %134 = arith.addf %132, %133 : vector<1x512xf32>
      %135 = vector.extract_strided_slice %112 {offsets = [5, 0], sizes = [1, 512], strides = [1, 1]} : vector<8x512xf32> to vector<1x512xf32>
      %136 = arith.mulf %135, %134 : vector<1x512xf32>
      %137 = vector.extract_strided_slice %114 {offsets = [5, 0], sizes = [1, 512], strides = [1, 1]} : vector<8x512xf32> to vector<1x512xf32>
      %138 = arith.addf %136, %137 : vector<1x512xf32>
      %139 = vector.extract_strided_slice %112 {offsets = [6, 0], sizes = [1, 512], strides = [1, 1]} : vector<8x512xf32> to vector<1x512xf32>
      %140 = arith.mulf %139, %138 : vector<1x512xf32>
      %141 = vector.extract_strided_slice %114 {offsets = [6, 0], sizes = [1, 512], strides = [1, 1]} : vector<8x512xf32> to vector<1x512xf32>
      %142 = arith.addf %140, %141 : vector<1x512xf32>
      %143 = vector.extract_strided_slice %112 {offsets = [7, 0], sizes = [1, 512], strides = [1, 1]} : vector<8x512xf32> to vector<1x512xf32>
      %144 = arith.mulf %143, %142 : vector<1x512xf32>
      %145 = vector.extract_strided_slice %114 {offsets = [7, 0], sizes = [1, 512], strides = [1, 1]} : vector<8x512xf32> to vector<1x512xf32>
      %146 = arith.addf %144, %145 : vector<1x512xf32>
      %147 = tpu.concatenate %118, %122, %126, %130, %134, %138, %142, %146 in 0 : vector<1x512xf32>, vector<1x512xf32>, vector<1x512xf32>, vector<1x512xf32>, vector<1x512xf32>, vector<1x512xf32>, vector<1x512xf32>, vector<1x512xf32> -> vector<8x512xf32>
      %148 = arith.index_cast %109 : i32 to index
      %c0_77 = arith.constant 0 : index
      %149 = vector.load %arg21[%148, %c0_77] : memref<128x512xf32, #tpu.memory_space<vmem>>, vector<8x512xf32>
      tpu.vector_store %arg21[%148, %c0_77], %147 {strides = array<i32>} : memref<128x512xf32, #tpu.memory_space<vmem>>, vector<8x512xf32>,
      scf.yield %146 : vector<1x512xf32>
    }
    %c16_i32_56 = arith.constant 16 : i32
    %c0_57 = arith.constant 0 : index
    %c0_58 = arith.constant 0 : index
    %85 = vector.load %arg22[%c0_57, %c0_58] : memref<1x512xf32, #tpu.memory_space<vmem>>, vector<1x512xf32>
    tpu.vector_store %arg22[%c0_57, %c0_58], %84 {strides = array<i32>} : memref<1x512xf32, #tpu.memory_space<vmem>>, vector<1x512xf32>,
    %c0_59 = arith.constant 0 : index
    %c0_60 = arith.constant 0 : index
    %86 = vector.load %arg21[%c0_59, %c0_60] : memref<128x512xf32, #tpu.memory_space<vmem>>, vector<128x512xf32>
    %87 = arith.mulf %86, %69 : vector<128x512xf32>
    %c0_61 = arith.constant 0 : index
    %c0_62 = arith.constant 0 : index
    %88 = vector.load %arg13[%c0_61, %c0_62] : memref<512x32xf32, #tpu.memory_space<vmem>>, vector<512x32xf32>
    %cst_63 = arith.constant dense<0.000000e+00> : vector<128x32xf32>
    %89 = tpu.matmul %87, %88, %cst_63 {dimension_numbers = #tpu.dot_dimension_numbers<[1], [0], [0], [1], [0, 0, 1, 1], [], []>} : vector<128x512xf32>, vector<512x32xf32>, vector<128x32xf32> -> vector<128x32xf32>
    %c0_64 = arith.constant 0 : index
    %c0_65 = arith.constant 0 : index
    %90 = vector.load %arg15[%c0_64, %c0_65] : memref<1x32xf32, #tpu.memory_space<vmem>>, vector<1x32xf32>
    %91 = vector.broadcast %90 : vector<1x32xf32> to vector<128x32xf32>
    %92 = arith.mulf %50, %91 : vector<128x32xf32>
    %93 = arith.addf %89, %92 : vector<128x32xf32>
    %cst_66 = arith.constant 0.000000e+00 : f32
    %94 = vector.broadcast %cst_66 : f32 to vector<128x32xf32>
    %95 = arith.subf %94, %15 : vector<128x32xf32>
    %96 = math.exp %95 : vector<128x32xf32>
    %cst_67 = arith.constant 1.000000e+00 : f32
    %97 = vector.broadcast %cst_67 : f32 to vector<128x32xf32>
    %98 = arith.addf %97, %96 : vector<128x32xf32>
    %cst_68 = arith.constant 1.000000e+00 : f32
    %99 = vector.broadcast %cst_68 : f32 to vector<128x32xf32>
    %100 = arith.divf %99, %98 : vector<128x32xf32>
    %101 = arith.mulf %15, %100 : vector<128x32xf32>
    %102 = arith.mulf %93, %101 : vector<128x32xf32>
    %c0_69 = arith.constant 0 : index
    %c0_70 = arith.constant 0 : index
    %103 = vector.load %arg16[%c0_69, %c0_70] : memref<16x32xf32, #tpu.memory_space<vmem>>, vector<16x32xf32>
    %cst_71 = arith.constant dense<0.000000e+00> : vector<16x128xf32>
    %104 = tpu.matmul %103, %102, %cst_71 {dimension_numbers = #tpu.dot_dimension_numbers<[1], [1], [0], [0], [0, 0, 1, 0], [], []>} : vector<16x32xf32>, vector<128x32xf32>, vector<16x128xf32> -> vector<16x128xf32>
    %c0_72 = arith.constant 0 : index
    %c0_73 = arith.constant 0 : index
    %c0_74 = arith.constant 0 : index
    %105 = vector.load %arg17[%c0_72, %c0_73, %c0_74] : memref<1x16x128xf32, #tpu.memory_space<vmem>>, vector<1x16x128xf32>
    %106 = vector.shape_cast %105 : vector<1x16x128xf32> to vector<16x128xf32>
    %107 = vector.shape_cast %104 : vector<16x128xf32> to vector<1x16x128xf32>
    tpu.vector_store %arg17[%c0_72, %c0_73, %c0_74], %107 {strides = array<i32>} : memref<1x16x128xf32, #tpu.memory_space<vmem>>, vector<1x16x128xf32>,
    return
  }
  func.func @transform_0(%arg0: i32, %arg1: i32) -> (i32, i32, i32) {
    %c0_i32 = arith.constant 0 : i32
    %c0_i32_0 = arith.constant 0 : i32
    return %arg0, %arg1, %c0_i32 : i32, i32, i32
  }
  func.func @transform_1(%arg0: i32, %arg1: i32) -> (i32, i32) {
    %c0_i32 = arith.constant 0 : i32
    %c0_i32_0 = arith.constant 0 : i32
    %c0_i32_1 = arith.constant 0 : i32
    return %c0_i32, %c0_i32_0 : i32, i32
  }
  func.func @transform_2(%arg0: i32, %arg1: i32) -> (i32, i32) {
    %c0_i32 = arith.constant 0 : i32
    %c0_i32_0 = arith.constant 0 : i32
    %c0_i32_1 = arith.constant 0 : i32
    return %c0_i32, %c0_i32_0 : i32, i32
  }
  func.func @transform_3(%arg0: i32, %arg1: i32) -> (i32, i32) {
    %c0_i32 = arith.constant 0 : i32
    %c0_i32_0 = arith.constant 0 : i32
    %c0_i32_1 = arith.constant 0 : i32
    return %c0_i32, %c0_i32_0 : i32, i32
  }
  func.func @transform_4(%arg0: i32, %arg1: i32) -> (i32, i32) {
    %c0_i32 = arith.constant 0 : i32
    %c0_i32_0 = arith.constant 0 : i32
    %c0_i32_1 = arith.constant 0 : i32
    return %c0_i32, %c0_i32_0 : i32, i32
  }
  func.func @transform_5(%arg0: i32, %arg1: i32) -> (i32, i32) {
    %c0_i32 = arith.constant 0 : i32
    %c0_i32_0 = arith.constant 0 : i32
    %c0_i32_1 = arith.constant 0 : i32
    return %c0_i32, %c0_i32_0 : i32, i32
  }
  func.func @transform_6(%arg0: i32, %arg1: i32) -> (i32, i32) {
    %c0_i32 = arith.constant 0 : i32
    %c0_i32_0 = arith.constant 0 : i32
    %c0_i32_1 = arith.constant 0 : i32
    return %c0_i32, %c0_i32_0 : i32, i32
  }
  func.func @transform_7(%arg0: i32, %arg1: i32) -> (i32, i32) {
    %c0_i32 = arith.constant 0 : i32
    %c0_i32_0 = arith.constant 0 : i32
    %c0_i32_1 = arith.constant 0 : i32
    return %c0_i32, %c0_i32_0 : i32, i32
  }
  func.func @transform_8(%arg0: i32, %arg1: i32) -> (i32, i32) {
    %c0_i32 = arith.constant 0 : i32
    %c0_i32_0 = arith.constant 0 : i32
    %c0_i32_1 = arith.constant 0 : i32
    return %c0_i32, %c0_i32_0 : i32, i32
  }
  func.func @transform_9(%arg0: i32, %arg1: i32) -> (i32, i32) {
    %c0_i32 = arith.constant 0 : i32
    %c0_i32_0 = arith.constant 0 : i32
    %c0_i32_1 = arith.constant 0 : i32
    return %c0_i32, %c0_i32_0 : i32, i32
  }
  func.func @transform_10(%arg0: i32, %arg1: i32) -> (i32, i32) {
    %c0_i32 = arith.constant 0 : i32
    %c0_i32_0 = arith.constant 0 : i32
    %c0_i32_1 = arith.constant 0 : i32
    return %c0_i32, %c0_i32_0 : i32, i32
  }
  func.func @transform_11(%arg0: i32, %arg1: i32) -> (i32, i32) {
    %c0_i32 = arith.constant 0 : i32
    %c0_i32_0 = arith.constant 0 : i32
    %c0_i32_1 = arith.constant 0 : i32
    return %c0_i32, %c0_i32_0 : i32, i32
  }
  func.func @transform_12(%arg0: i32, %arg1: i32) -> (i32, i32) {
    %c0_i32 = arith.constant 0 : i32
    %c0_i32_0 = arith.constant 0 : i32
    %c0_i32_1 = arith.constant 0 : i32
    return %c0_i32, %c0_i32_0 : i32, i32
  }
  func.func @transform_13(%arg0: i32, %arg1: i32) -> (i32, i32) {
    %c0_i32 = arith.constant 0 : i32
    %c0_i32_0 = arith.constant 0 : i32
    %c0_i32_1 = arith.constant 0 : i32
    return %c0_i32, %c0_i32_0 : i32, i32
  }
  func.func @transform_14(%arg0: i32, %arg1: i32) -> (i32, i32) {
    %c0_i32 = arith.constant 0 : i32
    %c0_i32_0 = arith.constant 0 : i32
    %c0_i32_1 = arith.constant 0 : i32
    return %c0_i32, %c0_i32_0 : i32, i32
  }
  func.func @transform_15(%arg0: i32, %arg1: i32) -> (i32, i32, i32) {
    %c0_i32 = arith.constant 0 : i32
    %c0_i32_0 = arith.constant 0 : i32
    return %arg0, %c0_i32, %arg1 : i32, i32, i32
  }
}

</mosaic_0001>

<bundles_post_ra>
// kernel: tpu_custom_call.1
= control target key start
LH: loop header
LB: loop body
LE: loop exit
PB: predicated region body
PF: predicated region fallthrough
CT: control target
= control target key end

     0   :  { %s7994_s0 = inlined_call_operand.vmem [shape: f32[2,256,16], index: 0, kind: input, shape index: {}]   ;;  %s7995_s1 = inlined_call_operand.vmem [shape: f32[16,16], index: 1, kind: input, shape index: {}]   ;;  %s7996_s2 = inlined_call_operand.vmem [shape: f32[1,16], index: 2, kind: input, shape index: {}]   ;;  %s7997_s3 = inlined_call_operand.vmem [shape: f32[16,32], index: 3, kind: input, shape index: {}]   ;;  %s7998_s4 = inlined_call_operand.vmem [shape: f32[16,32], index: 4, kind: input, shape index: {}]   ;;  %s7999_s5 = inlined_call_operand.vmem [shape: f32[4,32], index: 5, kind: input, shape index: {}]   ;;  %s8000_s6 = inlined_call_operand.vmem [shape: f32[1,32], index: 6, kind: input, shape index: {}]   ;;  %s8001_s7 = inlined_call_operand.vmem [shape: f32[32,32], index: 7, kind: input, shape index: {}]   ;;  %s8002_s8 = inlined_call_operand.vmem [shape: f32[1,32], index: 8, kind: input, shape index: {}]   ;;  %s8003_s9 = inlined_call_operand.vmem [shape: f32[1,512], index: 9, kind: input, shape index: {}]   ;;  %s8004_s10 = inlined_call_operand.vmem [shape: f32[32,512], index: 10, kind: input, shape index: {}]   ;;  %s8005_s11 = inlined_call_operand.vmem [shape: f32[512,32], index: 11, kind: input, shape index: {}]   ;;  %s8006_s12 = inlined_call_operand.vmem [shape: f32[32,1024], index: 12, kind: input, shape index: {}]   ;;  %s8007_s13 = inlined_call_operand.vmem [shape: f32[1,32], index: 13, kind: input, shape index: {}]   ;;  %s8008_s14 = inlined_call_operand.vmem [shape: f32[16,32], index: 14, kind: input, shape index: {}]   ;;  %s8009_s15 = inlined_call_operand.hbm [shape: f32[2,16,256], index: 15, kind: output, shape index: {}]  }
   0x1   :  { %8058 = sst [smem:[#allocation135_spill]] %s7994_s0 }
   0x2   :  { %8059 = sst [smem:[#allocation136_spill]] %s7995_s1 }
   0x3   :  { %8060 = sst [smem:[#allocation137_spill]] %s8008_s14 }
   0x4   :  { %8061 = sst [smem:[#allocation138_spill]] %s8009_s15 }
   0x5   :  { %20 = vsyncpa [#allocation8], 0 }
   0x6   :  { %22 = vsyncpa [#allocation8 + $0x1], 0  ;;  %s5779_s18 = smov 0   ;;  %s5781_s19 = smov 0  }
   0x7   :  { %s5783_s20 = smov 0   ;;  %s5785_s21 = smov 0  }
   0x8   :  { %s5787_s22 = smov 0   ;;  %s5789_s23 = smov 0  }
   0x9   :  { %s5791_s24 = smov 0   ;;  %s5793_s25 = smov 0  }
   0xa LB: > { %8062 = sst [smem:[#allocation10_spill]] %s5642_s18  ;;  %s4597_s26 = sadd.s32 4294967295, %s5670_s25   ;;  %s5670_s25 = sphi %s5793_s25, %s28_s25   ;;  %s5666_s24 = sphi %s5791_s24, %s8350_s24   ;;  %s5662_s23 = sphi %s5789_s23, %s8349_s23   ;;  %s5658_s22 = sphi %s5787_s22, %s8348_s22   ;;  %s5654_s21 = sphi %s5785_s21, %s8347_s21   ;;  %s5650_s20 = sphi %s5783_s20, %s8353_s20   ;;  %s5646_s19 = sphi %s5781_s19, %s8352_s19   ;;  %s5642_s18 = sphi %s5779_s18, %s8351_s18  }
   0xb   : > { %8063 = sst [smem:[#allocation11_spill]] %s5662_s23  ;;  %s4598_s27 = sadd.s32 4294967294, %s5670_s25  }
   0xc   : > { %8064 = sst [smem:[#allocation12_spill]] %s5666_s24  ;;  %s37_s28 = sadd.s32 1, %s5662_s23 }
   0xd   : > { %p38_p0 = scmp.ge.s32.totalorder %s37_s28, 2  ;;  %s40_s29 = sadd.s32 1, %s5666_s24 }
   0xe   : > { %p381_p1 = scmp.ne.s32.totalorder %s5650_s20, %s5646_s19  ;;  %p382_p2 = scmp.eq.s32.totalorder %s4597_s26, 3 }
   0xf   : > { %s8355_s28 = smov (%p38_p0, %s37_s28), 0  ;;  %s8357_s29 = smov (!%p38_p0, %s40_s29), %s5666_s24 }
  0x10   : > { %8065 = sst [smem:[#allocation13_spill]] %s8355_s28  ;;  %s367_s30 = ssub.s32 %s5662_s23, %s8355_s28 }
  0x11   : > { %p5830_p3 = por %p382_p2, %p381_p1  ;;  %p42_p4 = scmp.ge.s32.totalorder %s8357_s29, 2 }
  0x12   : > { %p387_p5 = scmp.ne.s32.totalorder %s5646_s19, %s5642_s18  ;;  %p388_p6 = scmp.eq.s32.totalorder %s4598_s27, 3 }
  0x13   : > { %p4601_p7 = scmp.ge.s32.totalorder %s5670_s25, 1  ;;  %s8359_s29 = smov (%p42_p4, %s8357_s29), 0 }
  0x14   : > { %8067 = sst [smem:[#allocation14_spill]] %s8359_s29  ;;  %p5839_p8 = por %p388_p6, %p387_p5 }
  0x15   : > { %p461_p9 = scmp.lt.s32.totalorder %s5670_s25, 5  ;;  %s366_s26 = ssub.s32 %s5666_s24, %s8359_s29 }
  0x16   : > { %s8068_s17 = scalar_select %p5839_p8, 1, 0 }
  0x17   : > { %s371_s15 = sadd.s32 1, %s5650_s20  ;;  %s368_s14 = sor.u32 %s367_s30, %s366_s26 }
  0x18   : > { %8069 = sst [smem:[#allocation15_spill]] %s8068_s17  ;;  %p462_p10 = pnand %p4601_p7, %p461_p9 }
  0x19   : > { %p369_p11 = scmp.eq.s32.totalorder %s368_s14, 0 }
  0x1a   : > { %465 = sbr.rel (%p462_p10) target bundleno = 1706 (0x6aa), region = 80 }
  0x1b   : > { %s5848_s28 = scalar_select %p369_p11, %s5650_s20, %s371_s15  }
  0x1d   : > { %8070 = sst [smem:[#allocation16_spill]] %s5848_s28 }
  0x1f   : > { %s8018_s27 = sand.u32 1, %s5646_s19   ;;  %s4603_s23 = sshll.u32 %s5654_s21, 4 }
  0x20   : > { %s4602_s18 = sshll.u32 %s8018_s27, 4  ;;  %p514_p12 = scmp.lt.s32.totalorder %s5658_s22, 1 }
  0x21   : > { %p516_p13 = scmp.lt.s32.totalorder %s4603_s23, 31  ;;  %s8071_s0 = sld [smem:[#allocation135_spill]] }
  0x22   : > { %s515_s17 = scalar_select %p514_p12, %s5658_s22, 1 }
  0x23   : > { %s8361_s23 = smov (!%p516_p13, %s4603_s23), 31  ;;  %s5861_s28 = scalar_lea.vmem [#allocation7], %s4602_s18 }
  0x24   : > { %s4604_s29 = sshll.u32 %s515_s17, 5  ;;  %p4606_p0 = scmp.ne.s32.totalorder %s5654_s21, 0 }
  0x25   : > { %s519_s30 = sadd.s32 %s4604_s29, %s8361_s23 }
  0x26   : > { %s4605_s26 = sshll.u32 %s519_s30, 3  ;;  %526 = sbr.rel (%p4606_p0) target bundleno = 47 (0x2f), region = 84 }
  0x27   : > { %s5859_s24 = scalar_lea.vmem %s8071_s0, %s4605_s26 }
  0x2b   : > { %v527_v0 = vlaneseq  ;;  %vm532_vm0 = vcmask 261120   ;;  %v5692_v1 = vmov 0.0  }
  0x2c   : > { %533 = vst.msk [vmem:[#allocation2] sm:$0xff] %vm532_vm0, %v5692_v1 }
  0x2d   : > { %vm529_vm1 = vcmp.lt.s32.totalorder %v527_v0, 512 }
  0x2e   : > { %531 = vst.msk [vmem:[#allocation6] sm:$0xf] %vm529_vm1, %v5692_v1 }
  0x2f PF: > { %s8072_s1 = sld [smem:[#allocation136_spill]]  ;;  %v534_v4 = vld [vmem:[%s5859_s24] sm:$0xff]  ;;  %vm559_vm2 = vcmask 130048   ;;  %v535_v5 = vld [vmem:[%s5859_s24 + $0x8] sm:$0xff]  ;;  %v536_v6 = vld [vmem:[%s5859_s24 + $0x10] sm:$0xff]  ;;  %vm1111_vm3 = vcmask 261120  }
  0x30   : > { %5094 = vmatprep.mubr.msk.f32.mxu0 %vm559_vm2, %v534_v4  ;;  %v537_v7 = vld [vmem:[%s5859_s24 + $0x18] sm:$0xff]  ;;  %v538_v8 = vld [vmem:[%s5859_s24 + $0x20] sm:$0xff]  ;;  %v539_v9 = vld [vmem:[%s5859_s24 + $0x28] sm:$0xff]  ;;  %vm1340_vm4 = vcmask 261125   ;;  %s7347_s29 = smov 0  }
  0x31   : > { %v540_v10 = vld [vmem:[%s5859_s24 + $0x30] sm:$0xff]  ;;  %v541_v11 = vld [vmem:[%s5859_s24 + $0x38] sm:$0xff]  ;;  %v542_v12 = vld [vmem:[%s5859_s24 + $0x40] sm:$0xff] }
  0x32   : > { %v543_v13 = vld [vmem:[%s5859_s24 + $0x48] sm:$0xff]  ;;  %v544_v14 = vld [vmem:[%s5859_s24 + $0x50] sm:$0xff]  ;;  %v545_v15 = vld [vmem:[%s5859_s24 + $0x58] sm:$0xff] }
  0x33   : > { %v546_v16 = vld [vmem:[%s5859_s24 + $0x60] sm:$0xff]  ;;  %v547_v17 = vld [vmem:[%s5859_s24 + $0x68] sm:$0xff]  ;;  %v548_v18 = vld [vmem:[%s5859_s24 + $0x70] sm:$0xff] }
  0x34   : > { %v549_v19 = vld [vmem:[%s5859_s24 + $0x78] sm:$0xff]  ;;  %v770_v20 = vld [vmem:[%s7997_s3 + $0x8] sm:$0xff]  ;;  %v769_v22 = vld [vmem:[%s7997_s3] sm:$0xff] }
  0x35   : > { %v551_v2 = vld [vmem:[%s8072_s1 + $0x8] sm:$0xff]  ;;  %v550_v3 = vld [vmem:[%s8072_s1] sm:$0xff]  ;;  %5118 = vmatprep.subr.mxu1 %v770_v20 }
  0x36   : > { %5090 = vmatprep.subr.mxu0 %v551_v2  ;;  %v965_v21 = vld [vmem:[%s7998_s4 + $0x8] sm:$0xff]  ;;  %5119 = vmatpush3.msra.mxu1 %v770_v20  ;;  %v964_v23 = vld [vmem:[%s7998_s4] sm:$0xff] }
  0x37   : > { %5091 = vmatpush3.msra.mxu0 %v551_v2  ;;  %5120 = vmatprep.subr.mxu1 %v769_v22  ;;  %v5917_v24 = vld [vmem:[%s7996_s2] ss:$0 sm:$0xff]  ;;  %v1826_v20 = vld [vmem:[%s8006_s12 + $0x8] sm:$0xff] }
  0x38   : > { %5092 = vmatprep.subr.mxu0 %v550_v3  ;;  %5121 = vmatpush3.msra.mxu1 %v769_v22  ;;  %v1852_v22 = vld [vmem:[%s8006_s12 + $0xd8] sm:$0xff] }
  0x39   : > { %5093 = vmatpush3.msra.mxu0 %v550_v3 }
  0x3a   : > { %5095 = vmatmul.mubr.msk.f32.vlgmr.msra.gmra.mxu0 %vm559_vm2, %v535_v5  ;;  %5146 = vmatprep.subr.mxu0 %v965_v21 }
  0x3b   : > { %5097 = vmatprep.mubr.msk.f32.mxu0 %vm559_vm2, %v536_v6  ;;  %5147 = vmatpush3.msra.mxu0 %v965_v21  ;;  %v1825_v21 = vld [vmem:[%s8006_s12] sm:$0xff] }
  0x3c   : > { %5148 = vmatprep.subr.mxu0 %v964_v23 }
  0x3d   : > { %5149 = vmatpush3.msra.mxu0 %v964_v23  ;;  %v1854_v23 = vld [vmem:[%s8006_s12 + $0xe8] sm:$0xff] }
  0x3e   : > { %5098 = vmatmul.mubr.msk.f32.gmra.mxu0 %vm559_vm2, %v537_v7 }
  0x3f   : > { %5100 = vmatprep.mubr.msk.f32.mxu0 %vm559_vm2, %v538_v8 }
  0x42   : > { %5101 = vmatmul.mubr.msk.f32.gmra.mxu0 %vm559_vm2, %v539_v9  ;;  %v1480_v9 = vld [vmem:[%s8001_s7 + $0x18] sm:$0xff] }
  0x43   : > { %5103 = vmatprep.mubr.msk.f32.mxu0 %vm559_vm2, %v540_v10  ;;  %5174 = vmatprep.subr.mxu1 %v1480_v9  ;;  %v1479_v10 = vld [vmem:[%s8001_s7 + $0x10] sm:$0xff] }
  0x46   : > { %5104 = vmatmul.mubr.msk.f32.gmra.mxu0 %vm559_vm2, %v541_v11  ;;  %v1478_v11 = vld [vmem:[%s8001_s7 + $0x8] sm:$0xff] }
  0x47   : > { %5106 = vmatprep.mubr.msk.f32.mxu0 %vm559_vm2, %v542_v12  ;;  %v1850_v12 = vld [vmem:[%s8006_s12 + $0xc8] sm:$0xff] }
  0x48   : > { %1881 = vmatprep.subr.mxu0 %v1850_v12 }
  0x4a   : > { %5107 = vmatmul.mubr.msk.f32.gmra.mxu0 %vm559_vm2, %v543_v13  ;;  %v1849_v13 = vld [vmem:[%s8006_s12 + $0xc0] sm:$0xff] }
  0x4b   : > { %5109 = vmatprep.mubr.msk.f32.mxu0 %vm559_vm2, %v544_v14  ;;  %v1842_v14 = vld [vmem:[%s8006_s12 + $0x88] sm:$0xff] }
  0x4e   : > { %5110 = vmatmul.mubr.msk.f32.gmra.mxu0 %vm559_vm2, %v545_v15  ;;  %v8019_v15 = vmov 0.0  }
  0x4f   : > { %5112 = vmatprep.mubr.msk.f32.mxu0 %vm559_vm2, %v546_v16  ;;  %v1477_v16 = vld [vmem:[%s8001_s7] sm:$0xff] }
  0x52   : > { %5113 = vmatmul.mubr.msk.f32.gmra.mxu0 %vm559_vm2, %v547_v17  ;;  %v1841_v17 = vld [vmem:[%s8006_s12 + $0x80] sm:$0xff] }
  0x53   : > { %5115 = vmatprep.mubr.msk.f32.mxu0 %vm559_vm2, %v548_v18  ;;  %v1834_v18 = vld [vmem:[%s8006_s12 + $0x48] sm:$0xff] }
  0x56   : > { %5116 = vmatmul.mubr.msk.f32.gmra.mxu0 %vm559_vm2, %v549_v19  ;;  %v1833_v19 = vld [vmem:[%s8006_s12 + $0x40] sm:$0xff] }
  0xfa   : > { %v5096_v25 = vpop.f32.mrf.mxu0 }
  0xfb   : > { %v680_v26 = vadd.f32 %v5096_v25, %v5917_v24 }
  0xfc   : > { %v674_v27 = vpop.f32.mrf.mxu0 }
  0xfd   : > { %v675_v28 = vadd.f32 %v5917_v24, %v674_v27  ;;  %v754_v32 = vmax.f32 %v680_v26, 0.0 }
  0xfe   : > { %v5099_v29 = vpop.f32.mrf.mxu0 }
  0xff   : > { %v690_v30 = vadd.f32 %v5099_v29, %v5917_v24  ;;  %v753_v31 = vmax.f32 %v675_v28, 0.0 }
 0x100   : > { %v684_v33 = vpop.f32.mrf.mxu0 }
 0x101   : > { %v685_v34 = vadd.f32 %v5917_v24, %v684_v33  ;;  %5122 = vmatprep.mubr.msk.f32.mxu1 %vm559_vm2, %v753_v31  ;;  %5150 = vmatprep.mubr.msk.f32.mxu0 %vm559_vm2, %v753_v31  ;;  %v756_v35 = vmax.f32 %v690_v30, 0.0 }
 0x102   : > { %v5102_v36 = vpop.f32.mrf.mxu0  ;;  %5123 = vmatmul.mubr.msk.f32.vlgmr.msra.gmra.mxu1 %vm559_vm2, %v754_v32  ;;  %5151 = vmatmul.mubr.msk.f32.vlgmr.msra.gmra.mxu0 %vm559_vm2, %v754_v32 }
 0x103   : > { %v755_v37 = vmax.f32 %v685_v34, 0.0  ;;  %v700_v38 = vadd.f32 %v5102_v36, %v5917_v24  ;;  %5175 = vmatpush3.msra.mxu1 %v1480_v9  ;;  %1882 = vmatpush1.msra.mxu0 %v1849_v13  ;;  %v6027_v34 = vld [vmem:[%s7999_s5] ss:$0 sm:$0xff]  ;;  %v6038_v36 = vld [vmem:[%s7999_s5 + $0x2] ss:$0 sm:$0xff] }
 0x104   : > { %v694_v39 = vpop.f32.mrf.mxu0  ;;  %5176 = vmatprep.subr.mxu1 %v1479_v10  ;;  %1883 = vmatprep.subr.mxu0 %v1842_v14 }
 0x105   : > { %v695_v40 = vadd.f32 %v5917_v24, %v694_v39  ;;  %5125 = vmatprep.mubr.msk.f32.mxu1 %vm559_vm2, %v755_v37  ;;  %5153 = vmatprep.mubr.msk.f32.mxu0 %vm559_vm2, %v755_v37  ;;  %v758_v41 = vmax.f32 %v700_v38, 0.0  ;;  %v6043_v37 = vld [vmem:[%s7999_s5 + $0x3] ss:$0 sm:$0xff] }
 0x106   : > { %v5105_v42 = vpop.f32.mrf.mxu0  ;;  %5126 = vmatmul.mubr.msk.f32.gmra.mxu1 %vm559_vm2, %v756_v35  ;;  %5154 = vmatmul.mubr.msk.f32.gmra.mxu0 %vm559_vm2, %v756_v35  ;;  %v6032_v35 = vld [vmem:[%s7999_s5 + $0x1] ss:$0 sm:$0xff] }
 0x107   : > { %v757_v43 = vmax.f32 %v695_v40, 0.0  ;;  %v710_v44 = vadd.f32 %v5105_v42, %v5917_v24  ;;  %5177 = vmatpush3.msra.mxu1 %v1479_v10  ;;  %1884 = vmatpush1.msra.mxu0 %v1841_v17  ;;  %v6069_v10 = vld [vmem:[%s8000_s6] ss:$0 sm:$0xff] }
 0x108   : > { %v704_v45 = vpop.f32.mrf.mxu0  ;;  %5178 = vmatprep.subr.mxu1 %v1478_v11  ;;  %1885 = vmatprep.subr.mxu0 %v1834_v18 }
 0x109   : > { %v705_v46 = vadd.f32 %v5917_v24, %v704_v45  ;;  %5128 = vmatprep.mubr.msk.f32.mxu1 %vm559_vm2, %v757_v43  ;;  %5156 = vmatprep.mubr.msk.f32.mxu0 %vm559_vm2, %v757_v43  ;;  %v760_v47 = vmax.f32 %v710_v44, 0.0 }
 0x10a   : > { %v5108_v48 = vpop.f32.mrf.mxu0  ;;  %5129 = vmatmul.mubr.msk.f32.gmra.mxu1 %vm559_vm2, %v758_v41  ;;  %5157 = vmatmul.mubr.msk.f32.gmra.mxu0 %vm559_vm2, %v758_v41 }
 0x10b   : > { %v759_v49 = vmax.f32 %v705_v46, 0.0  ;;  %v720_v50 = vadd.f32 %v5108_v48, %v5917_v24  ;;  %5179 = vmatpush3.msra.mxu1 %v1478_v11  ;;  %1886 = vmatpush1.msra.mxu0 %v1833_v19 }
 0x10c   : > { %v714_v51 = vpop.f32.mrf.mxu0  ;;  %5180 = vmatprep.subr.mxu1 %v1477_v16  ;;  %1887 = vmatprep.subr.mxu0 %v1826_v20 }
 0x10d   : > { %v715_v52 = vadd.f32 %v5917_v24, %v714_v51  ;;  %5131 = vmatprep.mubr.msk.f32.mxu1 %vm559_vm2, %v759_v49  ;;  %5159 = vmatprep.mubr.msk.f32.mxu0 %vm559_vm2, %v759_v49  ;;  %v762_v53 = vmax.f32 %v720_v50, 0.0 }
 0x10e   : > { %v5111_v54 = vpop.f32.mrf.mxu0  ;;  %5132 = vmatmul.mubr.msk.f32.gmra.mxu1 %vm559_vm2, %v760_v47  ;;  %5160 = vmatmul.mubr.msk.f32.gmra.mxu0 %vm559_vm2, %v760_v47 }
 0x10f   : > { %v761_v55 = vmax.f32 %v715_v52, 0.0  ;;  %v730_v56 = vadd.f32 %v5111_v54, %v5917_v24  ;;  %5181 = vmatpush3.msra.mxu1 %v1477_v16  ;;  %1888 = vmatpush1.msra.mxu0 %v1825_v21 }
 0x110   : > { %v724_v57 = vpop.f32.mrf.mxu0  ;;  %2042 = vmatprep.subr.mxu1 %v1852_v22  ;;  %2203 = vmatprep.subr.mxu0 %v1854_v23 }
 0x111   : > { %v725_v58 = vadd.f32 %v5917_v24, %v724_v57  ;;  %5134 = vmatprep.mubr.msk.f32.mxu1 %vm559_vm2, %v761_v55  ;;  %5162 = vmatprep.mubr.msk.f32.mxu0 %vm559_vm2, %v761_v55  ;;  %v764_v59 = vmax.f32 %v730_v56, 0.0 }
 0x112   : > { %v5114_v60 = vpop.f32.mrf.mxu0  ;;  %5135 = vmatmul.mubr.msk.f32.gmra.mxu1 %vm559_vm2, %v762_v53  ;;  %5163 = vmatmul.mubr.msk.f32.gmra.mxu0 %vm559_vm2, %v762_v53 }
 0x113   : > { %v763_v61 = vmax.f32 %v725_v58, 0.0  ;;  %v740_v62 = vadd.f32 %v5114_v60, %v5917_v24 }
 0x114   : > { %v734_v63 = vpop.f32.mrf.mxu0 }
 0x115   : > { %v735_v0 = vadd.f32 %v5917_v24, %v734_v63  ;;  %5137 = vmatprep.mubr.msk.f32.mxu1 %vm559_vm2, %v763_v61  ;;  %5165 = vmatprep.mubr.msk.f32.mxu0 %vm559_vm2, %v763_v61  ;;  %v766_v1 = vmax.f32 %v740_v62, 0.0 }
 0x116   : > { %v5117_v2 = vpop.f32.mrf.mxu0  ;;  %5138 = vmatmul.mubr.msk.f32.gmra.mxu1 %vm559_vm2, %v764_v59  ;;  %5166 = vmatmul.mubr.msk.f32.gmra.mxu0 %vm559_vm2, %v764_v59 }
 0x117   : > { %v765_v3 = vmax.f32 %v735_v0, 0.0  ;;  %v750_v4 = vadd.f32 %v5117_v2, %v5917_v24 }
 0x118   : > { %v744_v5 = vpop.f32.mrf.mxu0 }
 0x119   : > { %v745_v6 = vadd.f32 %v5917_v24, %v744_v5  ;;  %5140 = vmatprep.mubr.msk.f32.mxu1 %vm559_vm2, %v765_v3  ;;  %5168 = vmatprep.mubr.msk.f32.mxu0 %vm559_vm2, %v765_v3  ;;  %v768_v7 = vmax.f32 %v750_v4, 0.0 }
 0x11a   : > { %5141 = vmatmul.mubr.msk.f32.gmra.mxu1 %vm559_vm2, %v766_v1  ;;  %5169 = vmatmul.mubr.msk.f32.gmra.mxu0 %vm559_vm2, %v766_v1 }
 0x11b   : > { %v767_v8 = vmax.f32 %v745_v6, 0.0 }
 0x11d   : > { %5143 = vmatprep.mubr.msk.f32.mxu1 %vm559_vm2, %v767_v8  ;;  %5171 = vmatprep.mubr.msk.f32.mxu0 %vm559_vm2, %v767_v8 }
 0x11e   : > { %5144 = vmatmul.mubr.msk.f32.gmra.mxu1 %vm559_vm2, %v768_v7  ;;  %5172 = vmatmul.mubr.msk.f32.gmra.mxu0 %vm559_vm2, %v768_v7 }
 0x11f   : > { %1921 = vmatprep.mubr.f32.mxu0 %v8019_v15 }
 0x1c2   : > { %v5124_v24 = vpop.f32.mrf.mxu1  ;;  %v6010_v25 = vpop.f32.mrf.mxu0 }
 0x1c3   : > { %8073 = vst [vmem:[#allocation17_spill] sm:$0xff] %v6010_v25  ;;  %1113 = vst.msk [vmem:[#allocation2 + $0x10] sm:$0xff] %vm1111_vm3, %v5124_v24 }
 0x1c4   : > { %v885_v26 = vpop.f32.mrf.mxu1  ;;  %v6013_v27 = vpop.f32.mrf.mxu0 }
 0x1c5   : > { %8074 = vst [vmem:[#allocation18_spill] sm:$0xff] %v6013_v27  ;;  %1112 = vst.msk [vmem:[#allocation2 + $0x8] sm:$0xff] %vm1111_vm3, %v885_v26 }
 0x1c6   : > { %v5127_v28 = vpop.f32.mrf.mxu1  ;;  %v6016_v29 = vpop.f32.mrf.mxu0 }
 0x1c7   : > { %8075 = vst [vmem:[#allocation19_spill] sm:$0xff] %v6016_v29  ;;  %1115 = vst.msk [vmem:[#allocation2 + $0x20] sm:$0xff] %vm1111_vm3, %v5127_v28 }
 0x1c8   : > { %v895_v30 = vpop.f32.mrf.mxu1  ;;  %v6019_v31 = vpop.f32.mrf.mxu0 }
 0x1c9   : > { %8076 = vst [vmem:[#allocation20_spill] sm:$0xff] %v6019_v31  ;;  %1114 = vst.msk [vmem:[#allocation2 + $0x18] sm:$0xff] %vm1111_vm3, %v895_v30 }
 0x1ca   : > { %v5130_v32 = vpop.f32.mrf.mxu1  ;;  %v6022_v33 = vpop.f32.mrf.mxu0  ;;  %v1289_v47 = vld [vmem:[#allocation2 + $0x10] sm:$0xff] }
 0x1cb   : > { %8077 = vst [vmem:[#allocation21_spill] sm:$0xff] %v6022_v33  ;;  %1117 = vst.msk [vmem:[#allocation2 + $0x30] sm:$0xff] %vm1111_vm3, %v5130_v32  ;;  %v1309_v61 = vmul.f32 %v6043_v37, %v1289_v47 }
 0x1cc   : > { %v905_v38 = vpop.f32.mrf.mxu1  ;;  %v6045_v39 = vpop.f32.mrf.mxu0  ;;  %v1129_v40 = vld [vmem:[#allocation2 + $0x5] sm:$0xff]  ;;  %v1130_v45 = vld [vmem:[#allocation2 + $0xd] sm:$0xff] }
 0x1cd   : > { %8078 = vst [vmem:[#allocation22_spill] sm:$0xff] %v6045_v39  ;;  %v1182_v41 = vld [vmem:[#allocation2 + $0x6] sm:$0xff]  ;;  %1116 = vst.msk [vmem:[#allocation2 + $0x28] sm:$0xff] %vm1111_vm3, %v905_v38  ;;  %v1149_v43 = vmul.f32 %v6027_v34, %v1129_v40  ;;  %v1183_v46 = vld [vmem:[#allocation2 + $0xe] sm:$0xff]  ;;  %v1150_v51 = vmul.f32 %v6027_v34, %v1130_v45 }
 0x1ce   : > { %v1235_v42 = vld [vmem:[#allocation2 + $0x7] sm:$0xff]  ;;  %v1202_v44 = vmul.f32 %v6032_v35, %v1182_v41  ;;  %v5133_v48 = vpop.f32.mrf.mxu1  ;;  %v6050_v49 = vpop.f32.mrf.mxu0  ;;  %v1203_v52 = vmul.f32 %v6032_v35, %v1183_v46  ;;  %v1236_v53 = vld [vmem:[#allocation2 + $0xf] sm:$0xff] }
 0x1cf   : > { %8079 = vst [vmem:[#allocation23_spill] sm:$0xff] %v6050_v49  ;;  %v1288_v50 = vld [vmem:[#allocation2 + $0x8] sm:$0xff]  ;;  %1119 = vst.msk [vmem:[#allocation2 + $0x40] sm:$0xff] %vm1111_vm3, %v5133_v48  ;;  %v1255_v55 = vmul.f32 %v6038_v36, %v1235_v42  ;;  %v1291_v56 = vld [vmem:[#allocation2 + $0x20] sm:$0xff]  ;;  %v1256_v60 = vmul.f32 %v6038_v36, %v1236_v53 }
 0x1d0   : > { %v1218_v54 = vadd.f32 %v1202_v44, %v1149_v43  ;;  %v915_v57 = vpop.f32.mrf.mxu1  ;;  %v6056_v58 = vpop.f32.mrf.mxu0  ;;  %v1219_v59 = vadd.f32 %v1203_v52, %v1150_v51  ;;  %v1131_v62 = vld [vmem:[#allocation2 + $0x15] sm:$0xff]  ;;  %v1308_v2 = vmul.f32 %v6043_v37, %v1288_v50  ;;  %v1132_v6 = vld [vmem:[#allocation2 + $0x1d] sm:$0xff]  ;;  %v1311_v16 = vmul.f32 %v6043_v37, %v1291_v56 }
 0x1d1   : > { %8080 = vst [vmem:[#allocation24_spill] sm:$0xff] %v6056_v58  ;;  %v1184_v63 = vld [vmem:[#allocation2 + $0x16] sm:$0xff]  ;;  %1118 = vst.msk [vmem:[#allocation2 + $0x38] sm:$0xff] %vm1111_vm3, %v915_v57  ;;  %v1151_v3 = vmul.f32 %v6027_v34, %v1131_v62  ;;  %v1185_v7 = vld [vmem:[#allocation2 + $0x1e] sm:$0xff]  ;;  %v1152_v12 = vmul.f32 %v6027_v34, %v1132_v6 }
 0x1d2   : > { %v1237_v0 = vld [vmem:[#allocation2 + $0x17] sm:$0xff]  ;;  %v1271_v1 = vadd.f32 %v1255_v55, %v1218_v54  ;;  %v1204_v4 = vmul.f32 %v6032_v35, %v1184_v63  ;;  %v5136_v8 = vpop.f32.mrf.mxu1  ;;  %v6064_v9 = vpop.f32.mrf.mxu0  ;;  %v1272_v11 = vadd.f32 %v1256_v60, %v1219_v59  ;;  %v1205_v13 = vmul.f32 %v6032_v35, %v1185_v7  ;;  %v1238_v14 = vld [vmem:[#allocation2 + $0x1f] sm:$0xff] }
 0x1d3   : > { %v1290_v5 = vld [vmem:[#allocation2 + $0x18] sm:$0xff]  ;;  %8081 = vst [vmem:[#allocation25_spill] sm:$0xff] %v6064_v9  ;;  %v1293_v17 = vld [vmem:[#allocation2 + $0x30] sm:$0xff]  ;;  %1121 = vst.msk [vmem:[#allocation2 + $0x50] sm:$0xff] %vm1111_vm3, %v5136_v8  ;;  %v1257_v20 = vmul.f32 %v6038_v36, %v1237_v0  ;;  %v1258_v28 = vmul.f32 %v6038_v36, %v1238_v14 }
 0x1d4   : > { %v1324_v18 = vadd.f32 %v1308_v2, %v1271_v1  ;;  %v1220_v19 = vadd.f32 %v1204_v4, %v1151_v3  ;;  %v1310_v21 = vmul.f32 %v6043_v37, %v1290_v5  ;;  %v925_v22 = vpop.f32.mrf.mxu1  ;;  %v6077_v23 = vpop.f32.mrf.mxu0  ;;  %v1325_v24 = vadd.f32 %v1309_v61, %v1272_v11  ;;  %v1133_v30 = vld [vmem:[#allocation2 + $0x25] sm:$0xff]  ;;  %v1134_v46 = vld [vmem:[#allocation2 + $0x2d] sm:$0xff] }
 0x1d5   : > { %8082 = vst [vmem:[#allocation26_spill] sm:$0xff] %v6077_v23  ;;  %v1221_v26 = vadd.f32 %v1205_v13, %v1152_v12  ;;  %v1186_v32 = vld [vmem:[#allocation2 + $0x26] sm:$0xff]  ;;  %v6081_v40 = vmul.f32 %v6043_v37, %v1293_v17  ;;  %1120 = vst.msk [vmem:[#allocation2 + $0x48] sm:$0xff] %vm1111_vm3, %v925_v22  ;;  %v1153_v43 = vmul.f32 %v6027_v34, %v1133_v30  ;;  %v1187_v47 = vld [vmem:[#allocation2 + $0x2e] sm:$0xff] }
 0x1d6   : > { %v1239_v38 = vld [vmem:[#allocation2 + $0x27] sm:$0xff]  ;;  %v6085_v41 = vadd.f32 %v6069_v10, %v1324_v18  ;;  %v1273_v42 = vadd.f32 %v1257_v20, %v1220_v19  ;;  %v1206_v44 = vmul.f32 %v6032_v35, %v1186_v32  ;;  %v5139_v48 = vpop.f32.mrf.mxu1  ;;  %v6089_v50 = vpop.f32.mrf.mxu0  ;;  %v6092_v51 = vadd.f32 %v6069_v10, %v1325_v24  ;;  %v1240_v55 = vld [vmem:[#allocation2 + $0x2f] sm:$0xff] }
 0x1d7   : > { %v1292_v45 = vld [vmem:[#allocation2 + $0x28] sm:$0xff]  ;;  %8083 = vst [vmem:[#allocation27_spill] sm:$0xff] %v6089_v50  ;;  %v1274_v52 = vadd.f32 %v1258_v28, %v1221_v26  ;;  %v1259_v53 = vmul.f32 %v6038_v36, %v1239_v38  ;;  %1123 = vst.msk [vmem:[#allocation2 + $0x60] sm:$0xff] %vm1111_vm3, %v5139_v48  ;;  %v1154_v60 = vmul.f32 %v6027_v34, %v1134_v46 }
 0x1d8   : > { %v1312_v54 = vmul.f32 %v6043_v37, %v1292_v45  ;;  %v1365_v56 = vsub.f32 0.0, %v6085_v41  ;;  %v1326_v57 = vadd.f32 %v1310_v21, %v1273_v42  ;;  %v1222_v59 = vadd.f32 %v1206_v44, %v1153_v43  ;;  %v935_v61 = vpop.f32.mrf.mxu1  ;;  %v6099_v62 = vpop.f32.mrf.mxu0  ;;  %v1135_v3 = vld [vmem:[#allocation2 + $0x35] sm:$0xff]  ;;  %v1136_v20 = vld [vmem:[#allocation2 + $0x3d] sm:$0xff] }
 0x1d9   : > { %8084 = vst [vmem:[#allocation28_spill] sm:$0xff] %v6099_v62  ;;  %v1366_v63 = vsub.f32 0.0, %v6092_v51  ;;  %v1327_v0 = vadd.f32 %v1311_v16, %v1274_v52  ;;  %v1207_v1 = vmul.f32 %v6032_v35, %v1187_v47  ;;  %v1260_v2 = vmul.f32 %v6038_v36, %v1240_v55  ;;  %v1188_v4 = vld [vmem:[#allocation2 + $0x36] sm:$0xff]  ;;  %1122 = vst.msk [vmem:[#allocation2 + $0x58] sm:$0xff] %vm1111_vm3, %v935_v61  ;;  %v1189_v26 = vld [vmem:[#allocation2 + $0x3e] sm:$0xff] }
 0x1da   : > { %v1241_v5 = vld [vmem:[#allocation2 + $0x37] sm:$0xff]  ;;  %v1381_v6 = vmul.f32 1.442695, %v1365_v56  ;;  %v6106_v7 = vadd.f32 %v6069_v10, %v1326_v57  ;;  %v1275_v8 = vadd.f32 %v1259_v53, %v1222_v59  ;;  %v1155_v11 = vmul.f32 %v6027_v34, %v1135_v3  ;;  %v5142_v12 = vpop.f32.mrf.mxu1  ;;  %v6109_v13 = vpop.f32.mrf.mxu0  ;;  %v1242_v43 = vld [vmem:[#allocation2 + $0x3f] sm:$0xff] }
 0x1db   : > { %8085 = vst [vmem:[#allocation29_spill] sm:$0xff] %v6109_v13  ;;  %v1383_v14 = vmul.f32 1.442695, %v1366_v63  ;;  %v6112_v16 = vadd.f32 %v6069_v10, %v1327_v0  ;;  %v1223_v17 = vadd.f32 %v1207_v1, %v1154_v60  ;;  %v1208_v18 = vmul.f32 %v6032_v35, %v1188_v4  ;;  %v1294_v19 = vld [vmem:[#allocation2 + $0x38] sm:$0xff]  ;;  %1125 = vst.msk [vmem:[#allocation2 + $0x70] sm:$0xff] %vm1111_vm3, %v5142_v12  ;;  %v1295_v44 = vld [vmem:[#allocation2 + $0x40] sm:$0xff] }
 0x1dc   : > { %5358 = vpow2.f32 %v1381_v6  ;;  %v1367_v21 = vsub.f32 0.0, %v6106_v7  ;;  %v1328_v22 = vadd.f32 %v1312_v54, %v1275_v8  ;;  %v1261_v24 = vmul.f32 %v6038_v36, %v1241_v5  ;;  %v945_v28 = vpop.f32.mrf.mxu1  ;;  %v6118_v30 = vpop.f32.mrf.mxu0  ;;  %v1137_v59 = vld [vmem:[#allocation2 + $0x45] sm:$0xff]  ;;  %v1138_v8 = vld [vmem:[#allocation2 + $0x4d] sm:$0xff] }
 0x1dd   : > { %8086 = vst [vmem:[#allocation30_spill] sm:$0xff] %v6118_v30  ;;  %5360 = vpow2.f32 %v1383_v14  ;;  %v1368_v32 = vsub.f32 0.0, %v6112_v16  ;;  %v1276_v38 = vadd.f32 %v1260_v2, %v1223_v17  ;;  %v1224_v42 = vadd.f32 %v1208_v18, %v1155_v11  ;;  %1124 = vst.msk [vmem:[#allocation2 + $0x68] sm:$0xff] %vm1111_vm3, %v945_v28  ;;  %v1190_v60 = vld [vmem:[#allocation2 + $0x46] sm:$0xff]  ;;  %v1191_v11 = vld [vmem:[#allocation2 + $0x4e] sm:$0xff] }
 0x1de   : > { %v1385_v45 = vmul.f32 1.442695, %v1367_v21  ;;  %v6123_v46 = vadd.f32 %v6069_v10, %v1328_v22  ;;  %v1314_v47 = vmul.f32 %v6043_v37, %v1294_v19  ;;  %v1156_v48 = vmul.f32 %v6027_v34, %v1136_v20  ;;  %v5145_v52 = vpop.f32.mrf.mxu1  ;;  %v6127_v53 = vpop.f32.mrf.mxu0  ;;  %v1243_v61 = vld [vmem:[#allocation2 + $0x47] sm:$0xff]  ;;  %v1244_v19 = vld [vmem:[#allocation2 + $0x4f] sm:$0xff] }
 0x1df   : > { %8087 = vst [vmem:[#allocation31_spill] sm:$0xff] %v6127_v53  ;;  %v1387_v54 = vmul.f32 1.442695, %v1368_v32  ;;  %v1329_v55 = vadd.f32 %v6081_v40, %v1276_v38  ;;  %v1277_v56 = vadd.f32 %v1261_v24, %v1224_v42  ;;  %v1209_v57 = vmul.f32 %v6032_v35, %v1189_v26  ;;  %1127 = vst.msk [vmem:[#allocation2 + $0x80] sm:$0xff] %vm1111_vm3, %v5145_v52  ;;  %v1296_v2 = vld [vmem:[#allocation2 + $0x48] sm:$0xff]  ;;  %v1297_v26 = vld [vmem:[#allocation2 + $0x50] sm:$0xff] }
 0x1e0   : > { %1341 = vst.msk [vmem:[#allocation2] sm:$0xe0] %vm1340_vm4, %v5145_v52  ;;  %5362 = vpow2.f32 %v1385_v45  ;;  %v1369_v63 = vsub.f32 0.0, %v6123_v46  ;;  %v1262_v0 = vmul.f32 %v6038_v36, %v1242_v43  ;;  %v1315_v1 = vmul.f32 %v6043_v37, %v1295_v44  ;;  %v955_v3 = vpop.f32.mrf.mxu1  ;;  %v6136_v40 = vpop.f32.mrf.mxu0  ;;  %v1139_v28 = vld [vmem:[#allocation2 + $0x55] sm:$0xff] }
 0x1e1   : > { %8088 = vst [vmem:[#allocation32_spill] sm:$0xff] %v6136_v40  ;;  %5364 = vpow2.f32 %v1387_v54  ;;  %v6139_v4 = vadd.f32 %v6069_v10, %v1329_v55  ;;  %v1330_v5 = vadd.f32 %v1314_v47, %v1277_v56  ;;  %v1225_v6 = vadd.f32 %v1209_v57, %v1156_v48  ;;  %1126 = vst.msk [vmem:[#allocation2 + $0x78] sm:$0xff] %vm1111_vm3, %v955_v3  ;;  %v1192_v43 = vld [vmem:[#allocation2 + $0x56] sm:$0xff] }
 0x1e2   : > { %v1389_v12 = vmul.f32 1.442695, %v1369_v63  ;;  %v1157_v14 = vmul.f32 %v6027_v34, %v1137_v59  ;;  %v1210_v17 = vmul.f32 %v6032_v35, %v1190_v60  ;;  %v1263_v18 = vmul.f32 %v6038_v36, %v1243_v61  ;;  %v1245_v52 = vld [vmem:[#allocation2 + $0x57] sm:$0xff] }
 0x1e3   : > { %v1370_v20 = vsub.f32 0.0, %v6139_v4  ;;  %v6147_v21 = vadd.f32 %v6069_v10, %v1330_v5  ;;  %v1278_v22 = vadd.f32 %v1262_v0, %v1225_v6  ;;  %v1316_v24 = vmul.f32 %v6043_v37, %v1296_v2  ;;  %v1298_v54 = vld [vmem:[#allocation2 + $0x58] sm:$0xff] }
 0x1e4   : > { %5366 = vpow2.f32 %v1389_v12  ;;  %v1226_v32 = vadd.f32 %v1210_v17, %v1157_v14  ;;  %v1158_v38 = vmul.f32 %v6027_v34, %v1138_v8  ;;  %v1211_v42 = vmul.f32 %v6032_v35, %v1191_v11  ;;  %v1140_v60 = vld [vmem:[#allocation2 + $0x5d] sm:$0xff] }
 0x1e5   : > { %v1391_v44 = vmul.f32 1.442695, %v1370_v20  ;;  %v1371_v45 = vsub.f32 0.0, %v6147_v21  ;;  %v1331_v47 = vadd.f32 %v1315_v1, %v1278_v22  ;;  %v1264_v48 = vmul.f32 %v6038_v36, %v1244_v19  ;;  %v1193_v2 = vld [vmem:[#allocation2 + $0x5e] sm:$0xff] }
 0x1e6   : > { %v1279_v55 = vadd.f32 %v1263_v18, %v1226_v32  ;;  %v1227_v56 = vadd.f32 %v1211_v42, %v1158_v38  ;;  %v1317_v57 = vmul.f32 %v6043_v37, %v1297_v26  ;;  %v1159_v59 = vmul.f32 %v6027_v34, %v1139_v28  ;;  %v1246_v8 = vld [vmem:[#allocation2 + $0x5f] sm:$0xff] }
 0x1e7   : > { %5368 = vpow2.f32 %v1391_v44  ;;  %v1393_v61 = vmul.f32 1.442695, %v1371_v45  ;;  %v6157_v63 = vadd.f32 %v6069_v10, %v1331_v47  ;;  %v1212_v0 = vmul.f32 %v6032_v35, %v1192_v43  ;;  %v1299_v26 = vld [vmem:[#allocation2 + $0x60] sm:$0xff] }
 0x1e8   : > { %v1332_v1 = vadd.f32 %v1316_v24, %v1279_v55  ;;  %v1280_v3 = vadd.f32 %v1264_v48, %v1227_v56  ;;  %v1265_v5 = vmul.f32 %v6038_v36, %v1245_v52  ;;  %v1318_v6 = vmul.f32 %v6043_v37, %v1298_v54  ;;  %v1141_v28 = vld [vmem:[#allocation2 + $0x65] sm:$0xff] }
 0x1e9   : > { %v5359_v11 = vpop.eup %5358  ;;  %5370 = vpow2.f32 %v1393_v61  ;;  %v1372_v12 = vsub.f32 0.0, %v6157_v63  ;;  %v1228_v14 = vadd.f32 %v1212_v0, %v1159_v59  ;;  %v1160_v17 = vmul.f32 %v6027_v34, %v1140_v60  ;;  %v1194_v48 = vld [vmem:[#allocation2 + $0x66] sm:$0xff] }
 0x1ea   : > { %v5361_v18 = vpop.eup %5360  ;;  %v1413_v19 = vadd.f32 1.0, %v5359_v11  ;;  %v6165_v20 = vadd.f32 %v6069_v10, %v1332_v1  ;;  %v1333_v22 = vadd.f32 %v1317_v57, %v1280_v3  ;;  %v1213_v24 = vmul.f32 %v6032_v35, %v1193_v2  ;;  %v1247_v57 = vld [vmem:[#allocation2 + $0x67] sm:$0xff] }
 0x1eb   : > { %v1414_v32 = vadd.f32 1.0, %v5361_v18  ;;  %v1395_v38 = vmul.f32 1.442695, %v1372_v12  ;;  %v1281_v42 = vadd.f32 %v1265_v5, %v1228_v14  ;;  %v1266_v43 = vmul.f32 %v6038_v36, %v1246_v8  ;;  %v1300_v59 = vld [vmem:[#allocation2 + $0x68] sm:$0xff] }
 0x1ec   : > { %5372 = vrcp.f32 %v1413_v19  ;;  %v1373_v44 = vsub.f32 0.0, %v6165_v20  ;;  %v6171_v45 = vadd.f32 %v6069_v10, %v1333_v22  ;;  %v1229_v47 = vadd.f32 %v1213_v24, %v1160_v17  ;;  %v1195_v11 = vld [vmem:[#allocation2 + $0x6e] sm:$0xff] }
 0x1ed   : > { %v5363_v52 = vpop.eup %5362  ;;  %5374 = vrcp.f32 %v1414_v32  ;;  %v1334_v54 = vadd.f32 %v1318_v6, %v1281_v42  ;;  %v1319_v55 = vmul.f32 %v6043_v37, %v1299_v26  ;;  %v1161_v56 = vmul.f32 %v6027_v34, %v1141_v28  ;;  %v1142_v6 = vld [vmem:[#allocation2 + $0x6d] sm:$0xff] }
 0x1ee   : > { %v5365_v60 = vpop.eup %5364  ;;  %v1415_v61 = vadd.f32 1.0, %v5363_v52  ;;  %5376 = vpow2.f32 %v1395_v38  ;;  %v1397_v0 = vmul.f32 1.442695, %v1373_v44  ;;  %v1374_v2 = vsub.f32 0.0, %v6171_v45  ;;  %v1248_v26 = vld [vmem:[#allocation2 + $0x6f] sm:$0xff] }
 0x1ef   : > { %v1416_v1 = vadd.f32 1.0, %v5365_v60  ;;  %v6177_v3 = vadd.f32 %v6069_v10, %v1334_v54  ;;  %v1282_v5 = vadd.f32 %v1266_v43, %v1229_v47  ;;  %v1214_v8 = vmul.f32 %v6032_v35, %v1194_v48  ;;  %v1301_v28 = vld [vmem:[#allocation2 + $0x70] sm:$0xff] }
 0x1f0   : > { %5378 = vrcp.f32 %v1415_v61  ;;  %v1399_v12 = vmul.f32 1.442695, %v1374_v2  ;;  %v1267_v14 = vmul.f32 %v6038_v36, %v1247_v57  ;;  %v1320_v17 = vmul.f32 %v6043_v37, %v1300_v59  ;;  %v1143_v48 = vld [vmem:[#allocation2 + $0x75] sm:$0xff] }
 0x1f1   : > { %v5367_v18 = vpop.eup %5366  ;;  %5380 = vrcp.f32 %v1416_v1  ;;  %v1375_v19 = vsub.f32 0.0, %v6177_v3  ;;  %v1335_v22 = vadd.f32 %v1319_v55, %v1282_v5  ;;  %v1230_v24 = vadd.f32 %v1214_v8, %v1161_v56  ;;  %v1196_v52 = vld [vmem:[#allocation2 + $0x76] sm:$0xff] }
 0x1f2   : > { %v1417_v32 = vadd.f32 1.0, %v5367_v18  ;;  %5382 = vpow2.f32 %v1397_v0  ;;  %v1162_v38 = vmul.f32 %v6027_v34, %v1142_v6  ;;  %v1215_v42 = vmul.f32 %v6032_v35, %v1195_v11  ;;  %v1249_v54 = vld [vmem:[#allocation2 + $0x77] sm:$0xff]  ;;  %v1250_v18 = vld [vmem:[#allocation2 + $0x7f] sm:$0xff] }
 0x1f3   : > { %5384 = vpow2.f32 %v1399_v12  ;;  %v1401_v43 = vmul.f32 1.442695, %v1375_v19  ;;  %v6186_v44 = vadd.f32 %v6069_v10, %v1335_v22  ;;  %v1283_v47 = vadd.f32 %v1267_v14, %v1230_v24  ;;  %v1302_v2 = vld [vmem:[#allocation2 + $0x78] sm:$0xff] }
 0x1f4   : > { %v5369_v57 = vpop.eup %5368  ;;  %5386 = vrcp.f32 %v1417_v32  ;;  %v1231_v55 = vadd.f32 %v1215_v42, %v1162_v38  ;;  %v1268_v56 = vmul.f32 %v6038_v36, %v1248_v26  ;;  %v1321_v59 = vmul.f32 %v6043_v37, %v1301_v28  ;;  %v1144_v1 = vld [vmem:[#allocation2 + $0x7d] sm:$0xff] }
 0x1f5   : > { %v1418_v60 = vadd.f32 1.0, %v5369_v57  ;;  %5388 = vpow2.f32 %v1401_v43  ;;  %v1376_v61 = vsub.f32 0.0, %v6186_v44  ;;  %v1336_v0 = vadd.f32 %v1320_v17, %v1283_v47  ;;  %v1197_v14 = vld [vmem:[#allocation2 + $0x7e] sm:$0xff] }
 0x1f6   : > { %v5371_v5 = vpop.eup %5370  ;;  %v1284_v8 = vadd.f32 %v1268_v56, %v1231_v55  ;;  %v1163_v6 = vmul.f32 %v6027_v34, %v1143_v48  ;;  %v1216_v11 = vmul.f32 %v6032_v35, %v1196_v52  ;;  %v1269_v12 = vmul.f32 %v6038_v36, %v1249_v54  ;;  %v1303_v38 = vld [vmem:[#allocation2 + $0x80] sm:$0xff] }
 0x1f7   : > { %5390 = vrcp.f32 %v1418_v60  ;;  %v1419_v19 = vadd.f32 1.0, %v5371_v5  ;;  %v1403_v22 = vmul.f32 1.442695, %v1376_v61  ;;  %v6195_v24 = vadd.f32 %v6069_v10, %v1336_v0  ;;  %v1844_v0 = vld [vmem:[%s8006_s12 + $0x98] sm:$0xff] }
 0x1f8   : > { %v1337_v26 = vadd.f32 %v1321_v59, %v1284_v8  ;;  %v1232_v17 = vadd.f32 %v1216_v11, %v1163_v6  ;;  %v1322_v28 = vmul.f32 %v6043_v37, %v1302_v2  ;;  %v1164_v32 = vmul.f32 %v6027_v34, %v1144_v1 }
 0x1f9   : > { %v5373_v42 = vpop.eup %5372  ;;  %5392 = vrcp.f32 %v1419_v19  ;;  %v1377_v43 = vsub.f32 0.0, %v6195_v24  ;;  %v1217_v47 = vmul.f32 %v6032_v35, %v1197_v14  ;;  %v1270_v48 = vmul.f32 %v6038_v36, %v1250_v18  ;;  %v1851_v35 = vld [vmem:[%s8006_s12 + $0xd0] sm:$0xff] }
 0x1fa   : > { %v5375_v52 = vpop.eup %5374  ;;  %v6203_v54 = vmul.f32 %v5373_v42, %v6085_v41  ;;  %5394 = vpow2.f32 %v1403_v22  ;;  %v6206_v57 = vadd.f32 %v6069_v10, %v1337_v26  ;;  %v1285_v55 = vadd.f32 %v1269_v12, %v1232_v17  ;;  %v1853_v41 = vld [vmem:[%s8006_s12 + $0xe0] sm:$0xff]  ;;  %v1843_v19 = vld [vmem:[%s8006_s12 + $0x90] sm:$0xff] }
 0x1fb   : > { %v5377_v56 = vpop.eup %5376  ;;  %v6209_v34 = vmul.f32 %v5375_v52, %v6092_v51  ;;  %v1405_v59 = vmul.f32 1.442695, %v1377_v43  ;;  %v1233_v60 = vadd.f32 %v1217_v47, %v1164_v32  ;;  %v1323_v36 = vmul.f32 %v6043_v37, %v1303_v38  ;;  %v1846_v37 = vld [vmem:[%s8006_s12 + $0xa8] sm:$0xff] }
 0x1fc   : > { %8089 = vst [vmem:[#allocation33_spill] sm:$0xff] %v6203_v54  ;;  %5182 = vmatprep.mubr.msk.f32.mxu1 %vm1111_vm3, %v6203_v54  ;;  %4678 = vmatmul.mubr.msk.f32.vlgmr.msra.gmra.mxu0 %vm1111_vm3, %v6203_v54  ;;  %v1420_v51 = vadd.f32 1.0, %v5377_v56  ;;  %v1378_v61 = vsub.f32 0.0, %v6206_v57  ;;  %v1338_v2 = vadd.f32 %v1322_v28, %v1285_v55  ;;  %v1836_v28 = vld [vmem:[%s8006_s12 + $0x58] sm:$0xff]  ;;  %v1838_v32 = vld [vmem:[%s8006_s12 + $0x68] sm:$0xff]  ;;  %v1835_v55 = vld [vmem:[%s8006_s12 + $0x50] sm:$0xff] }
 0x1fd   : > { %8090 = vst [vmem:[#allocation34_spill] sm:$0xff] %v6209_v34  ;;  %v5379_v1 = vpop.eup %5378  ;;  %5183 = vmatmul.mubr.msk.f32.vlgmr.msra.gmra.mxu1 %vm1111_vm3, %v6209_v34  ;;  %1927 = vmatprep.mubr.f32.mxu0 %v8019_v15  ;;  %5396 = vpow2.f32 %v1405_v59  ;;  %v1286_v5 = vadd.f32 %v1270_v48, %v1233_v60  ;;  %v1830_v60 = vld [vmem:[%s8006_s12 + $0x28] sm:$0xff] }
 0x1fe   : > { %v5381_v8 = vpop.eup %5380  ;;  %v6233_v6 = vmul.f32 %v5379_v1, %v6106_v7  ;;  %5398 = vrcp.f32 %v1420_v51  ;;  %v1407_v11 = vmul.f32 1.442695, %v1378_v61  ;;  %2043 = vmatpush1.msra.mxu1 %v1851_v35  ;;  %v6236_v12 = vadd.f32 %v6069_v10, %v1338_v2  ;;  %2204 = vmatpush1.msra.mxu0 %v1853_v41  ;;  %v1845_v7 = vld [vmem:[%s8006_s12 + $0xa0] sm:$0xff]  ;;  %v1827_v51 = vld [vmem:[%s8006_s12 + $0x10] sm:$0xff] }
 0x1ff   : > { %v5383_v14 = vpop.eup %5382  ;;  %v6239_v18 = vmul.f32 %v5381_v8, %v6112_v16  ;;  %2044 = vmatprep.subr.mxu1 %v1844_v0  ;;  %v1339_v22 = vadd.f32 %v1323_v36, %v1286_v5  ;;  %2205 = vmatprep.subr.mxu0 %v1846_v37  ;;  %v1856_v37 = vld [vmem:[%s8006_s12 + $0xf8] sm:$0xff] }
 0x200   : > { %8091 = vst [vmem:[#allocation35_spill] sm:$0xff] %v6233_v6  ;;  %v5385_v26 = vpop.eup %5384  ;;  %5185 = vmatprep.mubr.msk.f32.mxu1 %vm1111_vm3, %v6233_v6  ;;  %4679 = vmatmul.mubr.msk.f32.gmra.mxu0 %vm1111_vm3, %v6209_v34  ;;  %v1421_v16 = vadd.f32 1.0, %v5383_v14  ;;  %5400 = vpow2.f32 %v1407_v11  ;;  %v1379_v17 = vsub.f32 0.0, %v6236_v12 }
 0x201   : > { %8092 = vst [vmem:[#allocation36_spill] sm:$0xff] %v6239_v18  ;;  %v5387_v38 = vpop.eup %5386  ;;  %5186 = vmatmul.mubr.msk.f32.gmra.mxu1 %vm1111_vm3, %v6239_v18  ;;  %1933 = vmatprep.mubr.f32.mxu0 %v8019_v15  ;;  %v1422_v42 = vadd.f32 1.0, %v5385_v26  ;;  %v6262_v43 = vadd.f32 %v6069_v10, %v1339_v22  ;;  %v1828_v10 = vld [vmem:[%s8006_s12 + $0x18] sm:$0xff] }
 0x202   : > { %v5389_v47 = vpop.eup %5388  ;;  %v6265_v48 = vmul.f32 %v5387_v38, %v6123_v46  ;;  %5402 = vrcp.f32 %v1421_v16  ;;  %v1409_v52 = vmul.f32 1.442695, %v1379_v17  ;;  %2045 = vmatpush1.msra.mxu1 %v1843_v19  ;;  %2206 = vmatpush1.msra.mxu0 %v1845_v7  ;;  %v1837_v46 = vld [vmem:[%s8006_s12 + $0x60] sm:$0xff] }
 0x203   : > { %5404 = vrcp.f32 %v1422_v42  ;;  %v1423_v56 = vadd.f32 1.0, %v5389_v47  ;;  %v1380_v59 = vsub.f32 0.0, %v6262_v43  ;;  %2046 = vmatprep.subr.mxu1 %v1836_v28  ;;  %2207 = vmatprep.subr.mxu0 %v1838_v32 }
 0x204   : > { %8093 = vst [vmem:[#allocation37_spill] sm:$0xff] %v6265_v48  ;;  %v5391_v35 = vpop.eup %5390  ;;  %5188 = vmatprep.mubr.msk.f32.mxu1 %vm1111_vm3, %v6265_v48  ;;  %4680 = vmatmul.mubr.msk.f32.gmra.mxu0 %vm1111_vm3, %v6233_v6  ;;  %5406 = vpow2.f32 %v1409_v52 }
 0x205   : > { %v6285_v36 = vmul.f32 %v5391_v35, %v6139_v4  ;;  %1939 = vmatprep.mubr.f32.mxu0 %v8019_v15  ;;  %5408 = vrcp.f32 %v1423_v56  ;;  %v1411_v41 = vmul.f32 1.442695, %v1380_v59  ;;  %2047 = vmatpush1.msra.mxu1 %v1835_v55  ;;  %v1829_v4 = vld [vmem:[%s8006_s12 + $0x20] sm:$0xff]  ;;  %v1848_v59 = vld [vmem:[%s8006_s12 + $0xb8] sm:$0xff]  ;;  %v1839_v35 = vld [vmem:[%s8006_s12 + $0x70] sm:$0xff] }
 0x206   : > { %v5393_v61 = vpop.eup %5392  ;;  %2048 = vmatprep.subr.mxu1 %v1828_v10  ;;  %2208 = vmatpush1.msra.mxu0 %v1837_v46  ;;  %v1847_v10 = vld [vmem:[%s8006_s12 + $0xb0] sm:$0xff]  ;;  %v1840_v46 = vld [vmem:[%s8006_s12 + $0x78] sm:$0xff] }
 0x207   : > { %8094 = vst [vmem:[#allocation38_spill] sm:$0xff] %v6285_v36  ;;  %v5395_v0 = vpop.eup %5394  ;;  %5189 = vmatmul.mubr.msk.f32.gmra.mxu1 %vm1111_vm3, %v6285_v36  ;;  %v6294_v2 = vmul.f32 %v5393_v61, %v6147_v21  ;;  %5410 = vpow2.f32 %v1411_v41  ;;  %2209 = vmatprep.subr.mxu0 %v1830_v60  ;;  %v1832_v60 = vld [vmem:[%s8006_s12 + $0x38] sm:$0xff]  ;;  %v1831_v41 = vld [vmem:[%s8006_s12 + $0x30] sm:$0xff]  ;;  %v2529_v61 = vld [vmem:[%s8004_s10 + $0x60] sm:$0xff] }
 0x208   : > { %4681 = vmatmul.mubr.msk.f32.gmra.mxu0 %vm1111_vm3, %v6239_v18  ;;  %v1424_v1 = vadd.f32 1.0, %v5395_v0  ;;  %2049 = vmatpush1.msra.mxu1 %v1827_v51  ;;  %v2532_v51 = vld [vmem:[%s8004_s10 + $0x78] sm:$0xff]  ;;  %v2526_v0 = vld [vmem:[%s8004_s10 + $0x48] sm:$0xff] }
 0x209   : > { %8095 = vst [vmem:[#allocation39_spill] sm:$0xff] %v6294_v2  ;;  %5191 = vmatprep.mubr.msk.f32.mxu1 %vm1111_vm3, %v6294_v2  ;;  %1945 = vmatprep.mubr.f32.mxu0 %v8019_v15 }
 0x20a   : > { %v5397_v21 = vpop.eup %5396  ;;  %5412 = vrcp.f32 %v1424_v1  ;;  %2210 = vmatpush1.msra.mxu0 %v1829_v4  ;;  %2364 = vmatprep.subr.mxu1 %v1856_v37  ;;  %v2525_v4 = vld [vmem:[%s8004_s10 + $0x40] sm:$0xff]  ;;  %v2531_v37 = vld [vmem:[%s8004_s10 + $0x70] sm:$0xff]  ;;  %v2528_v1 = vld [vmem:[%s8004_s10 + $0x58] sm:$0xff] }
 0x20b   : > { %v5399_v5 = vpop.eup %5398  ;;  %v1425_v8 = vadd.f32 1.0, %v5397_v21  ;;  %v2527_v21 = vld [vmem:[%s8004_s10 + $0x50] sm:$0xff] }
 0x20c   : > { %v6308_v11 = vmul.f32 %v5399_v5, %v6157_v63  ;;  %4682 = vmatmul.mubr.msk.f32.gmra.mxu0 %vm1111_vm3, %v6265_v48  ;;  %v2522_v5 = vld [vmem:[%s8004_s10 + $0x28] sm:$0xff] }
 0x20d   : > { %v5401_v14 = vpop.eup %5400  ;;  %1951 = vmatprep.mubr.f32.mxu0 %v8019_v15  ;;  %5414 = vrcp.f32 %v1425_v8  ;;  %v2524_v8 = vld [vmem:[%s8004_s10 + $0x38] sm:$0xff] }
 0x20e   : > { %8096 = vst [vmem:[#allocation40_spill] sm:$0xff] %v6308_v11  ;;  %5192 = vmatmul.mubr.msk.f32.gmra.mxu1 %vm1111_vm3, %v6308_v11  ;;  %v1426_v19 = vadd.f32 1.0, %v5401_v14  ;;  %v2521_v14 = vld [vmem:[%s8004_s10 + $0x20] sm:$0xff] }
 0x20f   : > { %v5403_v22 = vpop.eup %5402 }
 0x210   : > { %v5405_v7 = vpop.eup %5404  ;;  %v6316_v26 = vmul.f32 %v5403_v22, %v6165_v20  ;;  %4683 = vmatmul.mubr.msk.f32.gmra.mxu0 %vm1111_vm3, %v6285_v36  ;;  %5416 = vrcp.f32 %v1426_v19  ;;  %v2523_v19 = vld [vmem:[%s8004_s10 + $0x30] sm:$0xff]  ;;  %v2518_v22 = vld [vmem:[%s8004_s10 + $0x8] sm:$0xff] }
 0x211   : > { %v5407_v63 = vpop.eup %5406  ;;  %v6321_v16 = vmul.f32 %v5405_v7, %v6171_v45  ;;  %1957 = vmatprep.mubr.f32.mxu0 %v8019_v15  ;;  %v2520_v7 = vld [vmem:[%s8004_s10 + $0x18] sm:$0xff] }
 0x212   : > { %8097 = vst [vmem:[#allocation41_spill] sm:$0xff] %v6316_v26  ;;  %v5409_v17 = vpop.eup %5408  ;;  %5194 = vmatprep.mubr.msk.f32.mxu1 %vm1111_vm3, %v6316_v26  ;;  %v1427_v28 = vadd.f32 1.0, %v5407_v63  ;;  %v2517_v63 = vld [vmem:[%s8004_s10] sm:$0xff] }
 0x213   : > { %8098 = vst [vmem:[#allocation42_spill] sm:$0xff] %v6321_v16  ;;  %5195 = vmatmul.mubr.msk.f32.gmra.mxu1 %vm1111_vm3, %v6321_v16  ;;  %v6329_v20 = vmul.f32 %v5409_v17, %v6177_v3  ;;  %v2519_v17 = vld [vmem:[%s8004_s10 + $0x10] sm:$0xff] }
 0x214   : > { %v5411_v32 = vpop.eup %5410  ;;  %4684 = vmatmul.mubr.msk.f32.gmra.mxu0 %vm1111_vm3, %v6294_v2  ;;  %5418 = vrcp.f32 %v1427_v28  ;;  %v6605_v28 = vld [vmem:[%s8002_s8] ss:$0 sm:$0xff] }
 0x215   : > { %8099 = vst [vmem:[#allocation43_spill] sm:$0xff] %v6329_v20  ;;  %5197 = vmatprep.mubr.msk.f32.mxu1 %vm1111_vm3, %v6329_v20  ;;  %1963 = vmatprep.mubr.f32.mxu0 %v8019_v15  ;;  %v1428_v45 = vadd.f32 1.0, %v5411_v32 }
 0x217   : > { %v5413_v38 = vpop.eup %5412  ;;  %5420 = vrcp.f32 %v1428_v45 }
 0x218   : > { %v6337_v42 = vmul.f32 %v5413_v38, %v6186_v44  ;;  %4685 = vmatmul.mubr.msk.f32.gmra.mxu0 %vm1111_vm3, %v6308_v11 }
 0x219   : > { %1969 = vmatprep.mubr.f32.mxu0 %v8019_v15 }
 0x21a   : > { %8100 = vst [vmem:[#allocation44_spill] sm:$0xff] %v6337_v42  ;;  %v5415_v3 = vpop.eup %5414  ;;  %5198 = vmatmul.mubr.msk.f32.gmra.mxu1 %vm1111_vm3, %v6337_v42 }
 0x21b   : > { %v6345_v47 = vmul.f32 %v5415_v3, %v6195_v24 }
 0x21c   : > { %4686 = vmatmul.mubr.msk.f32.gmra.mxu0 %vm1111_vm3, %v6316_v26 }
 0x21d   : > { %8101 = vst [vmem:[#allocation45_spill] sm:$0xff] %v6345_v47  ;;  %v5417_v52 = vpop.eup %5416  ;;  %5200 = vmatprep.mubr.msk.f32.mxu1 %vm1111_vm3, %v6345_v47  ;;  %1975 = vmatprep.mubr.f32.mxu0 %v8019_v15 }
 0x21e   : > { %v6353_v44 = vmul.f32 %v5417_v52, %v6206_v57 }
 0x220   : > { %8102 = vst [vmem:[#allocation46_spill] sm:$0xff] %v6353_v44  ;;  %5201 = vmatmul.mubr.msk.f32.gmra.mxu1 %vm1111_vm3, %v6353_v44  ;;  %4687 = vmatmul.mubr.msk.f32.gmra.mxu0 %vm1111_vm3, %v6321_v16 }
 0x221   : > { %v5419_v24 = vpop.eup %5418  ;;  %1981 = vmatprep.mubr.f32.mxu0 %v8019_v15 }
 0x222   : > { %v6361_v55 = vmul.f32 %v5419_v24, %v6236_v12  ;;  %v2530_v12 = vld [vmem:[%s8004_s10 + $0x68] sm:$0xff] }
 0x223   : > { %2653 = vmatprep.subr.mxu0 %v2530_v12 }
 0x224   : > { %8103 = vst [vmem:[#allocation47_spill] sm:$0xff] %v6361_v55  ;;  %v5421_v56 = vpop.eup %5420  ;;  %5203 = vmatprep.mubr.msk.f32.mxu1 %vm1111_vm3, %v6361_v55  ;;  %4688 = vmatmul.mubr.msk.f32.gmra.mxu0 %vm1111_vm3, %v6329_v20 }
 0x225   : > { %v6368_v57 = vmul.f32 %v5421_v56, %v6262_v43  ;;  %1987 = vmatprep.mubr.f32.mxu0 %v8019_v15  ;;  %v1855_v43 = vld [vmem:[%s8006_s12 + $0xf0] sm:$0xff] }
 0x227   : > { %8104 = vst [vmem:[#allocation48_spill] sm:$0xff] %v6368_v57  ;;  %5204 = vmatmul.mubr.msk.f32.gmra.mxu1 %vm1111_vm3, %v6368_v57 }
 0x228   : > { %2082 = vmatprep.mubr.f32.mxu1 %v8019_v15  ;;  %4689 = vmatmul.mubr.msk.f32.gmra.mxu0 %vm1111_vm3, %v6337_v42 }
 0x229   : > { %1993 = vmatprep.mubr.f32.mxu0 %v8019_v15 }
 0x22b   : > { %4694 = vmatmul.mubr.msk.f32.vlgmr.msra.gmra.mxu1 %vm1111_vm3, %v6203_v54 }
 0x22c   : > { %2088 = vmatprep.mubr.f32.mxu1 %v8019_v15  ;;  %4690 = vmatmul.mubr.msk.f32.gmra.mxu0 %vm1111_vm3, %v6345_v47 }
 0x22d   : > { %1999 = vmatprep.mubr.f32.mxu0 %v8019_v15  ;;  %2365 = vmatpush1.msra.mxu1 %v1855_v43 }
 0x22e   : > { %2366 = vmatprep.subr.mxu1 %v1848_v59 }
 0x22f   : > { %4695 = vmatmul.mubr.msk.f32.gmra.mxu1 %vm1111_vm3, %v6209_v34 }
 0x230   : > { %2094 = vmatprep.mubr.f32.mxu1 %v8019_v15  ;;  %4691 = vmatmul.mubr.msk.f32.gmra.mxu0 %vm1111_vm3, %v6353_v44 }
 0x231   : > { %2005 = vmatprep.mubr.f32.mxu0 %v8019_v15  ;;  %2367 = vmatpush1.msra.mxu1 %v1847_v10 }
 0x232   : > { %2368 = vmatprep.subr.mxu1 %v1840_v46 }
 0x233   : > { %4696 = vmatmul.mubr.msk.f32.gmra.mxu1 %vm1111_vm3, %v6233_v6 }
 0x234   : > { %2100 = vmatprep.mubr.f32.mxu1 %v8019_v15  ;;  %4692 = vmatmul.mubr.msk.f32.gmra.mxu0 %vm1111_vm3, %v6361_v55 }
 0x235   : > { %2011 = vmatprep.mubr.f32.mxu0 %v8019_v15  ;;  %2369 = vmatpush1.msra.mxu1 %v1839_v35 }
 0x236   : > { %2370 = vmatprep.subr.mxu1 %v1832_v60 }
 0x237   : > { %4697 = vmatmul.mubr.msk.f32.gmra.mxu1 %vm1111_vm3, %v6239_v18 }
 0x238   : > { %2106 = vmatprep.mubr.f32.mxu1 %v8019_v15  ;;  %4693 = vmatmul.mubr.msk.f32.gmra.mxu0 %vm1111_vm3, %v6368_v57 }
 0x239   : > { %2243 = vmatprep.mubr.f32.mxu0 %v8019_v15  ;;  %2371 = vmatpush1.msra.mxu1 %v1831_v41 }
 0x23a   : > { %2910 = vmatprep.subr.mxu1 %v2532_v51 }
 0x23b   : > { %4698 = vmatmul.mubr.msk.f32.gmra.mxu1 %vm1111_vm3, %v6265_v48 }
 0x23c   : > { %2112 = vmatprep.mubr.f32.mxu1 %v8019_v15  ;;  %4710 = vmatmul.mubr.msk.f32.vlgmr.msra.gmra.mxu0 %vm1111_vm3, %v6203_v54 }
 0x23d   : > { %2249 = vmatprep.mubr.f32.mxu0 %v8019_v15  ;;  %2654 = vmatpush1.msra.mxu0 %v2529_v61 }
 0x23e   : > { %2655 = vmatprep.subr.mxu0 %v2526_v0 }
 0x23f   : > { %4699 = vmatmul.mubr.msk.f32.gmra.mxu1 %vm1111_vm3, %v6285_v36  ;;  %2656 = vmatpush1.msra.mxu0 %v2525_v4 }
 0x240   : > { %2118 = vmatprep.mubr.f32.mxu1 %v8019_v15  ;;  %4711 = vmatmul.mubr.msk.f32.gmra.mxu0 %vm1111_vm3, %v6209_v34 }
 0x241   : > { %2255 = vmatprep.mubr.f32.mxu0 %v8019_v15  ;;  %2657 = vmatprep.subr.mxu0 %v2522_v5 }
 0x242   : > { %2658 = vmatpush1.msra.mxu0 %v2521_v14 }
 0x243   : > { %4700 = vmatmul.mubr.msk.f32.gmra.mxu1 %vm1111_vm3, %v6294_v2  ;;  %2659 = vmatprep.subr.mxu0 %v2518_v22 }
 0x244   : > { %2124 = vmatprep.mubr.f32.mxu1 %v8019_v15  ;;  %4712 = vmatmul.mubr.msk.f32.gmra.mxu0 %vm1111_vm3, %v6233_v6 }
 0x245   : > { %2261 = vmatprep.mubr.f32.mxu0 %v8019_v15  ;;  %2660 = vmatpush1.msra.mxu0 %v2517_v63 }
 0x247   : > { %4701 = vmatmul.mubr.msk.f32.gmra.mxu1 %vm1111_vm3, %v6308_v11 }
 0x248   : > { %2130 = vmatprep.mubr.f32.mxu1 %v8019_v15  ;;  %4713 = vmatmul.mubr.msk.f32.gmra.mxu0 %vm1111_vm3, %v6239_v18 }
 0x249   : > { %2267 = vmatprep.mubr.f32.mxu0 %v8019_v15 }
 0x24b   : > { %4702 = vmatmul.mubr.msk.f32.gmra.mxu1 %vm1111_vm3, %v6316_v26 }
 0x24c   : > { %2136 = vmatprep.mubr.f32.mxu1 %v8019_v15  ;;  %4714 = vmatmul.mubr.msk.f32.gmra.mxu0 %vm1111_vm3, %v6265_v48 }
 0x24d   : > { %2273 = vmatprep.mubr.f32.mxu0 %v8019_v15 }
 0x24f   : > { %4703 = vmatmul.mubr.msk.f32.gmra.mxu1 %vm1111_vm3, %v6321_v16 }
 0x250   : > { %2142 = vmatprep.mubr.f32.mxu1 %v8019_v15  ;;  %4715 = vmatmul.mubr.msk.f32.gmra.mxu0 %vm1111_vm3, %v6285_v36 }
 0x251   : > { %2279 = vmatprep.mubr.f32.mxu0 %v8019_v15 }
 0x253   : > { %4704 = vmatmul.mubr.msk.f32.gmra.mxu1 %vm1111_vm3, %v6329_v20 }
 0x254   : > { %2148 = vmatprep.mubr.f32.mxu1 %v8019_v15  ;;  %4716 = vmatmul.mubr.msk.f32.gmra.mxu0 %vm1111_vm3, %v6294_v2 }
 0x255   : > { %2285 = vmatprep.mubr.f32.mxu0 %v8019_v15 }
 0x257   : > { %4705 = vmatmul.mubr.msk.f32.gmra.mxu1 %vm1111_vm3, %v6337_v42 }
 0x258   : > { %2154 = vmatprep.mubr.f32.mxu1 %v8019_v15  ;;  %4717 = vmatmul.mubr.msk.f32.gmra.mxu0 %vm1111_vm3, %v6308_v11 }
 0x259   : > { %2291 = vmatprep.mubr.f32.mxu0 %v8019_v15 }
 0x25b   : > { %4706 = vmatmul.mubr.msk.f32.gmra.mxu1 %vm1111_vm3, %v6345_v47 }
 0x25c   : > { %2160 = vmatprep.mubr.f32.mxu1 %v8019_v15  ;;  %4718 = vmatmul.mubr.msk.f32.gmra.mxu0 %vm1111_vm3, %v6316_v26 }
 0x25d   : > { %2297 = vmatprep.mubr.f32.mxu0 %v8019_v15 }
 0x25f   : > { %4707 = vmatmul.mubr.msk.f32.gmra.mxu1 %vm1111_vm3, %v6353_v44 }
 0x260   : > { %2166 = vmatprep.mubr.f32.mxu1 %v8019_v15  ;;  %4719 = vmatmul.mubr.msk.f32.gmra.mxu0 %vm1111_vm3, %v6321_v16 }
 0x261   : > { %2303 = vmatprep.mubr.f32.mxu0 %v8019_v15 }
 0x263   : > { %4708 = vmatmul.mubr.msk.f32.gmra.mxu1 %vm1111_vm3, %v6361_v55 }
 0x264   : > { %2172 = vmatprep.mubr.f32.mxu1 %v8019_v15  ;;  %4720 = vmatmul.mubr.msk.f32.gmra.mxu0 %vm1111_vm3, %v6329_v20 }
 0x265   : > { %2309 = vmatprep.mubr.f32.mxu0 %v8019_v15 }
 0x267   : > { %4709 = vmatmul.mubr.msk.f32.gmra.mxu1 %vm1111_vm3, %v6368_v57 }
 0x268   : > { %2404 = vmatprep.mubr.f32.mxu1 %v8019_v15  ;;  %4721 = vmatmul.mubr.msk.f32.gmra.mxu0 %vm1111_vm3, %v6337_v42 }
 0x269   : > { %2315 = vmatprep.mubr.f32.mxu0 %v8019_v15 }
 0x26b   : > { %4726 = vmatmul.mubr.msk.f32.vlgmr.msra.gmra.mxu1 %vm1111_vm3, %v6203_v54 }
 0x26c   : > { %2410 = vmatprep.mubr.f32.mxu1 %v8019_v15  ;;  %4722 = vmatmul.mubr.msk.f32.gmra.mxu0 %vm1111_vm3, %v6345_v47 }
 0x26d   : > { %2321 = vmatprep.mubr.f32.mxu0 %v8019_v15  ;;  %2911 = vmatpush1.msra.mxu1 %v2531_v37 }
 0x26e   : > { %2912 = vmatprep.subr.mxu1 %v2528_v1 }
 0x26f   : > { %4727 = vmatmul.mubr.msk.f32.gmra.mxu1 %vm1111_vm3, %v6209_v34 }
 0x270   : > { %2416 = vmatprep.mubr.f32.mxu1 %v8019_v15  ;;  %4723 = vmatmul.mubr.msk.f32.gmra.mxu0 %vm1111_vm3, %v6353_v44 }
 0x271   : > { %2327 = vmatprep.mubr.f32.mxu0 %v8019_v15  ;;  %2913 = vmatpush1.msra.mxu1 %v2527_v21 }
 0x272   : > { %2914 = vmatprep.subr.mxu1 %v2524_v8 }
 0x273   : > { %4728 = vmatmul.mubr.msk.f32.gmra.mxu1 %vm1111_vm3, %v6233_v6 }
 0x274   : > { %2422 = vmatprep.mubr.f32.mxu1 %v8019_v15  ;;  %4724 = vmatmul.mubr.msk.f32.gmra.mxu0 %vm1111_vm3, %v6361_v55 }
 0x275   : > { %2333 = vmatprep.mubr.f32.mxu0 %v8019_v15  ;;  %2915 = vmatpush1.msra.mxu1 %v2523_v19 }
 0x276   : > { %2916 = vmatprep.subr.mxu1 %v2520_v7 }
 0x277   : > { %4729 = vmatmul.mubr.msk.f32.gmra.mxu1 %vm1111_vm3, %v6239_v18 }
 0x278   : > { %2428 = vmatprep.mubr.f32.mxu1 %v8019_v15  ;;  %4725 = vmatmul.mubr.msk.f32.gmra.mxu0 %vm1111_vm3, %v6368_v57 }
 0x279   : > { %2693 = vmatprep.mubr.f32.mxu0 %v8019_v15  ;;  %2917 = vmatpush1.msra.mxu1 %v2519_v17 }
 0x27b   : > { %4730 = vmatmul.mubr.msk.f32.gmra.mxu1 %vm1111_vm3, %v6265_v48 }
 0x27c   : > { %2434 = vmatprep.mubr.f32.mxu1 %v8019_v15 }
 0x27f   : > { %4731 = vmatmul.mubr.msk.f32.gmra.mxu1 %vm1111_vm3, %v6285_v36 }
 0x280   : > { %2440 = vmatprep.mubr.f32.mxu1 %v8019_v15 }
 0x283   : > { %4732 = vmatmul.mubr.msk.f32.gmra.mxu1 %vm1111_vm3, %v6294_v2 }
 0x284   : > { %2446 = vmatprep.mubr.f32.mxu1 %v8019_v15 }
 0x287   : > { %4733 = vmatmul.mubr.msk.f32.gmra.mxu1 %vm1111_vm3, %v6308_v11 }
 0x288   : > { %2452 = vmatprep.mubr.f32.mxu1 %v8019_v15 }
 0x28b   : > { %4734 = vmatmul.mubr.msk.f32.gmra.mxu1 %vm1111_vm3, %v6316_v26 }
 0x28c   : > { %2458 = vmatprep.mubr.f32.mxu1 %v8019_v15 }
 0x28f   : > { %4735 = vmatmul.mubr.msk.f32.gmra.mxu1 %vm1111_vm3, %v6321_v16 }
 0x290   : > { %2464 = vmatprep.mubr.f32.mxu1 %v8019_v15 }
 0x293   : > { %4736 = vmatmul.mubr.msk.f32.gmra.mxu1 %vm1111_vm3, %v6329_v20 }
 0x294   : > { %2470 = vmatprep.mubr.f32.mxu1 %v8019_v15 }
 0x297   : > { %4737 = vmatmul.mubr.msk.f32.gmra.mxu1 %vm1111_vm3, %v6337_v42 }
 0x298   : > { %2476 = vmatprep.mubr.f32.mxu1 %v8019_v15 }
 0x29b   : > { %4738 = vmatmul.mubr.msk.f32.gmra.mxu1 %vm1111_vm3, %v6345_v47 }
 0x29c   : > { %2482 = vmatprep.mubr.f32.mxu1 %v8019_v15 }
 0x29f   : > { %4739 = vmatmul.mubr.msk.f32.gmra.mxu1 %vm1111_vm3, %v6353_v44 }
 0x2a0   : > { %2488 = vmatprep.mubr.f32.mxu1 %v8019_v15 }
 0x2a3   : > { %4740 = vmatmul.mubr.msk.f32.gmra.mxu1 %vm1111_vm3, %v6361_v55 }
 0x2a4   : > { %2494 = vmatprep.mubr.f32.mxu1 %v8019_v15 }
 0x2a7   : > { %4741 = vmatmul.mubr.msk.f32.gmra.mxu1 %vm1111_vm3, %v6368_v57 }
 0x2a8   : > { %2950 = vmatprep.mubr.f32.mxu1 %v8019_v15 }
 0x2bc   : > { %v6607_v32 = vpop.f32.mrf.mxu0 }
 0x2bd   : > { %v5184_v45 = vpop.f32.mrf.mxu1 }
 0x2be   : > { %v6610_v38 = vadd.f32 %v5184_v45, %v6605_v28  ;;  %v6612_v3 = vpop.f32.mrf.mxu0 }
 0x2bf   : > { %v1602_v52 = vpop.f32.mrf.mxu1 }
 0x2c0   : > { %v1698_v24 = vand.u32 2147483647, %v6610_v38  ;;  %v6616_v56 = vadd.f32 %v6605_v28, %v1602_v52  ;;  %v6618_v12 = vpop.f32.mrf.mxu0 }
 0x2c1   : > { %v5187_v43 = vpop.f32.mrf.mxu1 }
 0x2c2   : > { %v1714_v59 = vsub.f32 0.0, %v1698_v24  ;;  %v1697_v10 = vand.u32 2147483647, %v6616_v56  ;;  %v6622_v46 = vadd.f32 %v5187_v43, %v6605_v28  ;;  %v6624_v35 = vpop.f32.mrf.mxu0 }
 0x2c3   : > { %v1612_v60 = vpop.f32.mrf.mxu1 }
 0x2c4   : > { %v1731_v41 = vmul.f32 1.442695, %v1714_v59  ;;  %v1713_v51 = vsub.f32 0.0, %v1697_v10  ;;  %v1700_v61 = vand.u32 2147483647, %v6622_v46  ;;  %v6627_v0 = vpop.f32.mrf.mxu0  ;;  %v6630_v4 = vadd.f32 %v6605_v28, %v1612_v60 }
 0x2c6   : > { %5422 = vpow2.f32 %v1731_v41  ;;  %v1729_v37 = vmul.f32 1.442695, %v1713_v51  ;;  %v1716_v1 = vsub.f32 0.0, %v1700_v61  ;;  %v6632_v21 = vpop.f32.mrf.mxu0  ;;  %v1699_v5 = vand.u32 2147483647, %v6630_v4 }
 0x2c7   : > { %v5190_v8 = vpop.f32.mrf.mxu1 }
 0x2c8   : > { %5424 = vpow2.f32 %v1729_v37  ;;  %v1735_v14 = vmul.f32 1.442695, %v1716_v1  ;;  %v6636_v19 = vadd.f32 %v5190_v8, %v6605_v28  ;;  %v6638_v22 = vpop.f32.mrf.mxu0  ;;  %v1715_v7 = vsub.f32 0.0, %v1699_v5 }
 0x2c9   : > { %v1622_v63 = vpop.f32.mrf.mxu1 }
 0x2ca   : > { %5426 = vpow2.f32 %v1735_v14  ;;  %v1702_v17 = vand.u32 2147483647, %v6636_v19  ;;  %v6642_v45 = vadd.f32 %v6605_v28, %v1622_v63  ;;  %v6644_v52 = vpop.f32.mrf.mxu0  ;;  %v1733_v24 = vmul.f32 1.442695, %v1715_v7 }
 0x2cc   : > { %v1718_v43 = vsub.f32 0.0, %v1702_v17  ;;  %v1701_v59 = vand.u32 2147483647, %v6642_v45  ;;  %v6647_v10 = vpop.f32.mrf.mxu0  ;;  %5428 = vpow2.f32 %v1733_v24 }
 0x2ce   : > { %v1717_v60 = vsub.f32 0.0, %v1701_v59  ;;  %v5193_v41 = vpop.f32.mrf.mxu1  ;;  %v6649_v51 = vpop.f32.mrf.mxu0  ;;  %v1739_v61 = vmul.f32 1.442695, %v1718_v43 }
 0x2cf   : > { %8105 = vst [vmem:[#allocation49_spill] sm:$0xff] %v6649_v51  ;;  %v6652_v37 = vadd.f32 %v5193_v41, %v6605_v28  ;;  %v1686_v51 = vmax.f32 %v6636_v19, 0.0 }
 0x2d0   : > { %v1737_v1 = vmul.f32 1.442695, %v1717_v60  ;;  %v1632_v5 = vpop.f32.mrf.mxu1  ;;  %v6654_v8 = vpop.f32.mrf.mxu0 }
 0x2d1   : > { %8106 = vst [vmem:[#allocation50_spill] sm:$0xff] %v6654_v8  ;;  %v1704_v14 = vand.u32 2147483647, %v6652_v37  ;;  %v6658_v7 = vadd.f32 %v6605_v28, %v1632_v5 }
 0x2d2   : > { %5430 = vpow2.f32 %v1737_v1  ;;  %v6660_v63 = vpop.f32.mrf.mxu0 }
 0x2d3   : > { %8107 = vst [vmem:[#allocation51_spill] sm:$0xff] %v6660_v63  ;;  %v5423_v17 = vpop.eup %5422  ;;  %5432 = vpow2.f32 %v1739_v61  ;;  %v1720_v24 = vsub.f32 0.0, %v1704_v14  ;;  %v1703_v43 = vand.u32 2147483647, %v6658_v7  ;;  %v5196_v59 = vpop.f32.mrf.mxu1 }
 0x2d4   : > { %v1762_v41 = vadd.f32 1.0, %v5423_v17  ;;  %v6664_v60 = vadd.f32 %v5196_v59, %v6605_v28  ;;  %v6666_v15 = vpop.f32.mrf.mxu0 }
 0x2d5   : > { %8108 = vst [vmem:[#allocation52_spill] sm:$0xff] %v6666_v15  ;;  %v5425_v27 = vpop.eup %5424  ;;  %v1719_v25 = vsub.f32 0.0, %v1703_v43  ;;  %v1642_v31 = vpop.f32.mrf.mxu1  ;;  %v1743_v29 = vmul.f32 1.442695, %v1720_v24 }
 0x2d6   : > { %v1761_v5 = vadd.f32 1.0, %v5425_v27  ;;  %v6668_v1 = vpop.f32.mrf.mxu0  ;;  %5434 = vlog2.f32 %v1762_v41  ;;  %v1706_v14 = vand.u32 2147483647, %v6664_v60  ;;  %v6672_v33 = vadd.f32 %v6605_v28, %v1642_v31 }
 0x2d7   : > { %8109 = vst [vmem:[#allocation53_spill] sm:$0xff] %v6668_v1  ;;  %v5427_v39 = vpop.eup %5426  ;;  %v1741_v61 = vmul.f32 1.442695, %v1719_v25  ;;  %v1682_v1 = vmax.f32 %v6610_v38, 0.0  ;;  %v8120_v38 = vmov 0.0  }
 0x2d8   : > { %5436 = vlog2.f32 %v1761_v5  ;;  %v6674_v17 = vpop.f32.mrf.mxu0  ;;  %v1705_v59 = vand.u32 2147483647, %v6672_v33  ;;  %v1764_v58 = vadd.f32 1.0, %v5427_v39  ;;  %v1722_v41 = vsub.f32 0.0, %v1706_v14 }
 0x2d9   : > { %8110 = vst [vmem:[#allocation54_spill] sm:$0xff] %v6674_v17  ;;  %5438 = vpow2.f32 %v1741_v61  ;;  %v5429_v43 = vpop.eup %5428 }
 0x2da   : > { %5440 = vpow2.f32 %v1743_v29  ;;  %v5199_v27 = vpop.f32.mrf.mxu1  ;;  %v6677_v24 = vpop.f32.mrf.mxu0  ;;  %v1763_v49 = vadd.f32 1.0, %v5429_v43  ;;  %v1721_v25 = vsub.f32 0.0, %v1705_v59  ;;  %v1747_v43 = vmul.f32 1.442695, %v1722_v41 }
 0x2db   : > { %8111 = vst [vmem:[#allocation55_spill] sm:$0xff] %v6677_v24  ;;  %v6680_v23 = vadd.f32 %v5199_v27, %v6605_v28 }
 0x2dc   : > { %v1652_v31 = vpop.f32.mrf.mxu1  ;;  %v6682_v9 = vpop.f32.mrf.mxu0  ;;  %5442 = vlog2.f32 %v1763_v49  ;;  %v1745_v5 = vmul.f32 1.442695, %v1721_v25 }
 0x2dd   : > { %8112 = vst [vmem:[#allocation56_spill] sm:$0xff] %v6682_v9  ;;  %v1708_v61 = vand.u32 2147483647, %v6680_v23  ;;  %v6686_v62 = vadd.f32 %v6605_v28, %v1652_v31  ;;  %5444 = vlog2.f32 %v1764_v58 }
 0x2de   : > { %v6688_v29 = vpop.f32.mrf.mxu0  ;;  %5446 = vpow2.f32 %v1745_v5 }
 0x2df   : > { %8113 = vst [vmem:[#allocation57_spill] sm:$0xff] %v6688_v29  ;;  %v5431_v39 = vpop.eup %5430  ;;  %v1707_v27 = vand.u32 2147483647, %v6686_v62  ;;  %v1724_v49 = vsub.f32 0.0, %v1708_v61  ;;  %5448 = vpow2.f32 %v1747_v43 }
 0x2e0   : > { %v5433_v14 = vpop.eup %5432  ;;  %v1765_v59 = vadd.f32 1.0, %v5431_v39  ;;  %v5202_v50 = vpop.f32.mrf.mxu1 }
 0x2e1   : > { %v6691_v30 = vpop.f32.mrf.mxu0  ;;  %v1723_v25 = vsub.f32 0.0, %v1707_v27  ;;  %v1766_v31 = vadd.f32 1.0, %v5433_v14  ;;  %v6696_v53 = vadd.f32 %v5202_v50, %v6605_v28  ;;  %v1751_v14 = vmul.f32 1.442695, %v1724_v49 }
 0x2e2   : > { %8114 = vst [vmem:[#allocation58_spill] sm:$0xff] %v6691_v30  ;;  %v1662_v13 = vpop.f32.mrf.mxu1  ;;  %5450 = vlog2.f32 %v1765_v59  ;;  %v1681_v30 = vmax.f32 %v6616_v56, 0.0 }
 0x2e3   : > { %v6693_v40 = vpop.f32.mrf.mxu0  ;;  %v6699_v58 = vadd.f32 %v6605_v28, %v1662_v13  ;;  %v5435_v41 = vpop.eup %5434  ;;  %v1749_v5 = vmul.f32 1.442695, %v1723_v25  ;;  %5452 = vlog2.f32 %v1766_v31  ;;  %v1710_v13 = vand.u32 2147483647, %v6696_v53 }
 0x2e4   : > { %8115 = vst [vmem:[#allocation59_spill] sm:$0xff] %v6693_v40  ;;  %v1780_v9 = vmul.f32 0.6931472, %v5435_v41 }
 0x2e5   : > { %v6701_v39 = vpop.f32.mrf.mxu0  ;;  %v5437_v29 = vpop.eup %5436  ;;  %v1709_v61 = vand.u32 2147483647, %v6699_v58  ;;  %5454 = vpow2.f32 %v1749_v5  ;;  %v1726_v31 = vsub.f32 0.0, %v1710_v13 }
 0x2e6   : > { %8116 = vst [vmem:[#allocation60_spill] sm:$0xff] %v6701_v39  ;;  %v5439_v27 = vpop.eup %5438  ;;  %v1778_v40 = vmul.f32 0.6931472, %v5437_v29  ;;  %5456 = vpow2.f32 %v1751_v14 }
 0x2e7   : > { %v6705_v43 = vpop.f32.mrf.mxu0  ;;  %v5441_v50 = vpop.eup %5440  ;;  %v1767_v25 = vadd.f32 1.0, %v5439_v27  ;;  %v1725_v39 = vsub.f32 0.0, %v1709_v61 }
 0x2e8   : > { %8117 = vst [vmem:[#allocation61_spill] sm:$0xff] %v6705_v43  ;;  %v5205_v24 = vpop.f32.mrf.mxu1  ;;  %v6708_v59 = vadd.f32 %v1778_v40, %v1681_v30  ;;  %v6719_v30 = vadd.f32 %v1780_v9, %v1682_v1  ;;  %v1768_v40 = vadd.f32 1.0, %v5441_v50 }
 0x2e9   : > { %v6710_v17 = vpop.f32.mrf.mxu0  ;;  %v5443_v29 = vpop.eup %5442  ;;  %v6722_v41 = vadd.f32 %v5205_v24, %v6605_v28  ;;  %5458 = vlog2.f32 %v1767_v25  ;;  %v1753_v14 = vmul.f32 1.442695, %v1725_v39  ;;  %v1683_v24 = vmax.f32 %v6630_v4, 0.0 }
 0x2ea   : > { %8118 = vst [vmem:[#allocation62_spill] sm:$0xff] %v6710_v17  ;;  %v1672_v56 = vpop.f32.mrf.mxu1  ;;  %4742 = vmatmul.mubr.msk.f32.vlgmr.msra.gmra.mxu0 %vm1111_vm3, %v6708_v59  ;;  %4774 = vmatmul.mubr.msk.f32.vlgmr.msra.gmra.mxu1 %vm1111_vm3, %v6708_v59  ;;  %v5445_v61 = vpop.eup %5444  ;;  %v1782_v27 = vmul.f32 0.6931472, %v5443_v29  ;;  %5460 = vlog2.f32 %v1768_v40  ;;  %v1684_v40 = vmax.f32 %v6622_v46, 0.0 }
 0x2eb   : > { %v6713_v49 = vpop.f32.mrf.mxu0  ;;  %2699 = vmatprep.mubr.f32.mxu0 %v8120_v38  ;;  %2956 = vmatprep.mubr.f32.mxu1 %v8120_v38  ;;  %v5447_v1 = vpop.eup %5446  ;;  %v1784_v39 = vmul.f32 0.6931472, %v5445_v61  ;;  %v1712_v25 = vand.u32 2147483647, %v6722_v41  ;;  %5462 = vpow2.f32 %v1753_v14 }
 0x2ec   : > { %8119 = vst [vmem:[#allocation63_spill] sm:$0xff] %v6713_v49  ;;  %v6724_v5 = vpop.f32.mrf.mxu1  ;;  %v6729_v49 = vadd.f32 %v6605_v28, %v1672_v56  ;;  %v1755_v28 = vmul.f32 1.442695, %v1726_v31  ;;  %v5449_v4 = vpop.eup %5448  ;;  %v6748_v29 = vadd.f32 %v1782_v27, %v1683_v24 }
 0x2ed   : > { %v6731_v9 = vpop.f32.mrf.mxu0  ;;  %v1770_v27 = vadd.f32 1.0, %v5449_v4 }
 0x2ee   : > { %8121 = vst [vmem:[#allocation64_spill] sm:$0xff] %v6731_v9  ;;  %v6733_v50 = vpop.f32.mrf.mxu1  ;;  %v1711_v13 = vand.u32 2147483647, %v6729_v49  ;;  %4743 = vmatmul.mubr.msk.f32.gmra.mxu0 %vm1111_vm3, %v6719_v30  ;;  %4775 = vmatmul.mubr.msk.f32.gmra.mxu1 %vm1111_vm3, %v6719_v30  ;;  %5464 = vpow2.f32 %v1755_v28  ;;  %v1685_v28 = vmax.f32 %v6642_v45, 0.0 }
 0x2ef   : > { %v6737_v17 = vpop.f32.mrf.mxu0  ;;  %2705 = vmatprep.mubr.f32.mxu0 %v8120_v38  ;;  %2962 = vmatprep.mubr.f32.mxu1 %v8120_v38  ;;  %v5451_v15 = vpop.eup %5450 }
 0x2f0   : > { %8122 = vst [vmem:[#allocation65_spill] sm:$0xff] %v6737_v17  ;;  %v6744_v56 = vpop.f32.mrf.mxu1  ;;  %v1769_v17 = vadd.f32 1.0, %v5447_v1  ;;  %v1727_v9 = vsub.f32 0.0, %v1711_v13  ;;  %v1728_v1 = vsub.f32 0.0, %v1712_v25  ;;  %v5453_v24 = vpop.eup %5452  ;;  %v6765_v13 = vadd.f32 %v1784_v39, %v1684_v40 }
 0x2f1   : > { %v6750_v43 = vpop.f32.mrf.mxu0  ;;  %v1786_v46 = vmul.f32 0.6931472, %v5451_v15 }
 0x2f2   : > { %8123 = vst [vmem:[#allocation66_spill] sm:$0xff] %v6750_v43  ;;  %v6752_v61 = vpop.f32.mrf.mxu1  ;;  %4744 = vmatmul.mubr.msk.f32.gmra.mxu0 %vm1111_vm3, %v6748_v29  ;;  %4776 = vmatmul.mubr.msk.f32.gmra.mxu1 %vm1111_vm3, %v6748_v29  ;;  %5466 = vlog2.f32 %v1769_v17  ;;  %v5455_v63 = vpop.eup %5454  ;;  %v1759_v15 = vmul.f32 1.442695, %v1728_v1 }
 0x2f3   : > { %v6755_v31 = vpop.f32.mrf.mxu0  ;;  %2711 = vmatprep.mubr.f32.mxu0 %v8120_v38  ;;  %2968 = vmatprep.mubr.f32.mxu1 %v8120_v38  ;;  %v5457_v39 = vpop.eup %5456  ;;  %5468 = vlog2.f32 %v1770_v27  ;;  %v6782_v4 = vadd.f32 %v1786_v46, %v1685_v28  ;;  %v1771_v45 = vadd.f32 1.0, %v5455_v63 }
 0x2f4   : > { %8124 = vst [vmem:[#allocation67_spill] sm:$0xff] %v6755_v31  ;;  %v6761_v14 = vpop.f32.mrf.mxu1  ;;  %v1757_v31 = vmul.f32 1.442695, %v1727_v9  ;;  %v1788_v9 = vmul.f32 0.6931472, %v5453_v24  ;;  %v1772_v19 = vadd.f32 1.0, %v5457_v39 }
 0x2f5   : > { %v6767_v43 = vpop.f32.mrf.mxu0 }
 0x2f6   : > { %8125 = vst [vmem:[#allocation68_spill] sm:$0xff] %v6767_v43  ;;  %v6769_v8 = vpop.f32.mrf.mxu1  ;;  %4745 = vmatmul.mubr.msk.f32.gmra.mxu0 %vm1111_vm3, %v6765_v13  ;;  %4777 = vmatmul.mubr.msk.f32.gmra.mxu1 %vm1111_vm3, %v6765_v13  ;;  %5470 = vpow2.f32 %v1757_v31  ;;  %v6799_v31 = vadd.f32 %v1788_v9, %v1686_v51 }
 0x2f7   : > { %v6772_v25 = vpop.f32.mrf.mxu0  ;;  %2717 = vmatprep.mubr.f32.mxu0 %v8120_v38  ;;  %2974 = vmatprep.mubr.f32.mxu1 %v8120_v38  ;;  %5472 = vpow2.f32 %v1759_v15 }
 0x2f8   : > { %8126 = vst [vmem:[#allocation69_spill] sm:$0xff] %v6772_v25  ;;  %v6778_v17 = vpop.f32.mrf.mxu1  ;;  %v5459_v25 = vpop.eup %5458  ;;  %5474 = vlog2.f32 %v1771_v45 }
 0x2f9   : > { %v6784_v40 = vpop.f32.mrf.mxu0  ;;  %v5461_v63 = vpop.eup %5460  ;;  %v1790_v24 = vmul.f32 0.6931472, %v5459_v25  ;;  %5476 = vlog2.f32 %v1772_v19 }
 0x2fa   : > { %8127 = vst [vmem:[#allocation70_spill] sm:$0xff] %v6784_v40  ;;  %v6786_v43 = vpop.f32.mrf.mxu1  ;;  %4746 = vmatmul.mubr.msk.f32.gmra.mxu0 %vm1111_vm3, %v6782_v4  ;;  %4778 = vmatmul.mubr.msk.f32.gmra.mxu1 %vm1111_vm3, %v6782_v4  ;;  %v5463_v28 = vpop.eup %5462  ;;  %v1687_v40 = vmax.f32 %v6658_v7, 0.0  ;;  %v1792_v39 = vmul.f32 0.6931472, %v5461_v63 }
 0x2fb   : > { %v6789_v27 = vpop.f32.mrf.mxu0  ;;  %2723 = vmatprep.mubr.f32.mxu0 %v8120_v38  ;;  %2980 = vmatprep.mubr.f32.mxu1 %v8120_v38  ;;  %v5465_v25 = vpop.eup %5464  ;;  %v1773_v7 = vadd.f32 1.0, %v5463_v28 }
 0x2fc   : > { %8128 = vst [vmem:[#allocation71_spill] sm:$0xff] %v6789_v27  ;;  %v6795_v1 = vpop.f32.mrf.mxu1  ;;  %v6816_v9 = vadd.f32 %v1790_v24, %v1687_v40  ;;  %v1774_v28 = vadd.f32 1.0, %v5465_v25 }
 0x2fd   : > { %8129 = vst [vmem:[#allocation72_spill] sm:$0xff] %v6795_v1  ;;  %v6801_v46 = vpop.f32.mrf.mxu0  ;;  %5478 = vlog2.f32 %v1773_v7 }
 0x2fe   : > { %8130 = vst [vmem:[#allocation73_spill] sm:$0xff] %v6801_v46  ;;  %v6803_v27 = vpop.f32.mrf.mxu1  ;;  %4747 = vmatmul.mubr.msk.f32.gmra.mxu0 %vm1111_vm3, %v6799_v31  ;;  %4779 = vmatmul.mubr.msk.f32.gmra.mxu1 %vm1111_vm3, %v6799_v31  ;;  %5480 = vlog2.f32 %v1774_v28 }
 0x2ff   : > { %8131 = vst [vmem:[#allocation74_spill] sm:$0xff] %v6803_v27  ;;  %v6806_v15 = vpop.f32.mrf.mxu0  ;;  %2729 = vmatprep.mubr.f32.mxu0 %v8120_v38  ;;  %2986 = vmatprep.mubr.f32.mxu1 %v8120_v38  ;;  %v5467_v46 = vpop.eup %5466  ;;  %v1688_v27 = vmax.f32 %v6652_v37, 0.0 }
 0x300   : > { %8132 = vst [vmem:[#allocation75_spill] sm:$0xff] %v6806_v15  ;;  %v6812_v51 = vpop.f32.mrf.mxu1  ;;  %v5469_v40 = vpop.eup %5468  ;;  %v1794_v19 = vmul.f32 0.6931472, %v5467_v46 }
 0x301   : > { %8133 = vst [vmem:[#allocation76_spill] sm:$0xff] %v6812_v51  ;;  %v6818_v45 = vpop.f32.mrf.mxu0  ;;  %v6833_v24 = vadd.f32 %v1792_v39, %v1688_v27  ;;  %v1796_v25 = vmul.f32 0.6931472, %v5469_v40 }
 0x302   : > { %8134 = vst [vmem:[#allocation77_spill] sm:$0xff] %v6818_v45  ;;  %v6820_v15 = vpop.f32.mrf.mxu1  ;;  %4748 = vmatmul.mubr.msk.f32.gmra.mxu0 %vm1111_vm3, %v6816_v9  ;;  %4780 = vmatmul.mubr.msk.f32.gmra.mxu1 %vm1111_vm3, %v6816_v9 }
 0x303   : > { %8135 = vst [vmem:[#allocation78_spill] sm:$0xff] %v6820_v15  ;;  %v6823_v1 = vpop.f32.mrf.mxu0  ;;  %2735 = vmatprep.mubr.f32.mxu0 %v8120_v38  ;;  %2992 = vmatprep.mubr.f32.mxu1 %v8120_v38  ;;  %v5471_v45 = vpop.eup %5470  ;;  %v1689_v15 = vmax.f32 %v6672_v33, 0.0 }
 0x304   : > { %8136 = vst [vmem:[#allocation79_spill] sm:$0xff] %v6823_v1  ;;  %v6829_v63 = vpop.f32.mrf.mxu1  ;;  %v5473_v46 = vpop.eup %5472  ;;  %v1775_v33 = vadd.f32 1.0, %v5471_v45 }
 0x305   : > { %8137 = vst [vmem:[#allocation80_spill] sm:$0xff] %v6829_v63  ;;  %v6835_v37 = vpop.f32.mrf.mxu0  ;;  %v6850_v39 = vadd.f32 %v1794_v19, %v1689_v15  ;;  %v1776_v19 = vadd.f32 1.0, %v5473_v46 }
 0x306   : > { %8138 = vst [vmem:[#allocation81_spill] sm:$0xff] %v6835_v37  ;;  %v6837_v1 = vpop.f32.mrf.mxu1  ;;  %4749 = vmatmul.mubr.msk.f32.gmra.mxu0 %vm1111_vm3, %v6833_v24  ;;  %4781 = vmatmul.mubr.msk.f32.gmra.mxu1 %vm1111_vm3, %v6833_v24  ;;  %v5475_v37 = vpop.eup %5474  ;;  %5482 = vlog2.f32 %v1775_v33 }
 0x307   : > { %8139 = vst [vmem:[#allocation82_spill] sm:$0xff] %v6837_v1  ;;  %v6840_v51 = vpop.f32.mrf.mxu0  ;;  %2741 = vmatprep.mubr.f32.mxu0 %v8120_v38  ;;  %2998 = vmatprep.mubr.f32.mxu1 %v8120_v38  ;;  %v1690_v1 = vmax.f32 %v6664_v60, 0.0  ;;  %v1798_v45 = vmul.f32 0.6931472, %v5475_v37  ;;  %v5477_v28 = vpop.eup %5476  ;;  %5484 = vlog2.f32 %v1776_v19 }
 0x308   : > { %8140 = vst [vmem:[#allocation83_spill] sm:$0xff] %v6840_v51  ;;  %v6846_v27 = vpop.f32.mrf.mxu1  ;;  %v1800_v37 = vmul.f32 0.6931472, %v5477_v28 }
 0x309   : > { %v6852_v7 = vpop.f32.mrf.mxu0  ;;  %v6867_v15 = vadd.f32 %v1796_v25, %v1690_v1 }
 0x30a   : > { %8141 = vst [vmem:[#allocation84_spill] sm:$0xff] %v6852_v7  ;;  %v6854_v51 = vpop.f32.mrf.mxu1  ;;  %4750 = vmatmul.mubr.msk.f32.gmra.mxu0 %vm1111_vm3, %v6850_v39  ;;  %4782 = vmatmul.mubr.msk.f32.gmra.mxu1 %vm1111_vm3, %v6850_v39 }
 0x30b   : > { %8142 = vst [vmem:[#allocation85_spill] sm:$0xff] %v6854_v51  ;;  %v6857_v63 = vpop.f32.mrf.mxu0  ;;  %2747 = vmatprep.mubr.f32.mxu0 %v8120_v38  ;;  %3004 = vmatprep.mubr.f32.mxu1 %v8120_v38 }
 0x30c   : > { %8143 = vst [vmem:[#allocation86_spill] sm:$0xff] %v6857_v63  ;;  %v6863_v40 = vpop.f32.mrf.mxu1  ;;  %v1691_v63 = vmax.f32 %v6686_v62, 0.0  ;;  %v5479_v62 = vpop.eup %5478 }
 0x30d   : > { %v6869_v60 = vpop.f32.mrf.mxu0 }
 0x30e   : > { %8144 = vst [vmem:[#allocation87_spill] sm:$0xff] %v6869_v60  ;;  %v6871_v7 = vpop.f32.mrf.mxu1  ;;  %4751 = vmatmul.mubr.msk.f32.gmra.mxu0 %vm1111_vm3, %v6867_v15  ;;  %4783 = vmatmul.mubr.msk.f32.gmra.mxu1 %vm1111_vm3, %v6867_v15  ;;  %v6884_v46 = vadd.f32 %v1798_v45, %v1691_v63  ;;  %v1692_v60 = vmax.f32 %v6680_v23, 0.0  ;;  %v1802_v45 = vmul.f32 0.6931472, %v5479_v62  ;;  %v5481_v23 = vpop.eup %5480 }
 0x30f   : > { %v6874_v51 = vpop.f32.mrf.mxu0  ;;  %2753 = vmatprep.mubr.f32.mxu0 %v8120_v38  ;;  %3010 = vmatprep.mubr.f32.mxu1 %v8120_v38 }
 0x310   : > { %8145 = vst [vmem:[#allocation88_spill] sm:$0xff] %v6874_v51  ;;  %v6880_v1 = vpop.f32.mrf.mxu1  ;;  %v6901_v63 = vadd.f32 %v1800_v37, %v1692_v60  ;;  %v1804_v60 = vmul.f32 0.6931472, %v5481_v23 }
 0x311   : > { %8146 = vst [vmem:[#allocation89_spill] sm:$0xff] %v6880_v1  ;;  %v6886_v25 = vpop.f32.mrf.mxu0 }
 0x312   : > { %8147 = vst [vmem:[#allocation90_spill] sm:$0xff] %v6886_v25  ;;  %v6888_v33 = vpop.f32.mrf.mxu1  ;;  %4752 = vmatmul.mubr.msk.f32.gmra.mxu0 %vm1111_vm3, %v6884_v46  ;;  %4784 = vmatmul.mubr.msk.f32.gmra.mxu1 %vm1111_vm3, %v6884_v46  ;;  %v1693_v25 = vmax.f32 %v6699_v58, 0.0 }
 0x313   : > { %v6891_v51 = vpop.f32.mrf.mxu0  ;;  %2759 = vmatprep.mubr.f32.mxu0 %v8120_v38  ;;  %3016 = vmatprep.mubr.f32.mxu1 %v8120_v38  ;;  %v5483_v58 = vpop.eup %5482 }
 0x314   : > { %8148 = vst [vmem:[#allocation91_spill] sm:$0xff] %v6891_v51  ;;  %v6897_v1 = vpop.f32.mrf.mxu1  ;;  %v6918_v37 = vadd.f32 %v1802_v45, %v1693_v25  ;;  %v1806_v45 = vmul.f32 0.6931472, %v5483_v58 }
 0x315   : > { %8149 = vst [vmem:[#allocation92_spill] sm:$0xff] %v6897_v1  ;;  %v6903_v19 = vpop.f32.mrf.mxu0 }
 0x316   : > { %8150 = vst [vmem:[#allocation93_spill] sm:$0xff] %v6903_v19  ;;  %v6905_v28 = vpop.f32.mrf.mxu1  ;;  %4753 = vmatmul.mubr.msk.f32.gmra.mxu0 %vm1111_vm3, %v6901_v63  ;;  %4785 = vmatmul.mubr.msk.f32.gmra.mxu1 %vm1111_vm3, %v6901_v63 }
 0x317   : > { %8151 = vst [vmem:[#allocation94_spill] sm:$0xff] %v6905_v28  ;;  %v6908_v51 = vpop.f32.mrf.mxu0  ;;  %2765 = vmatprep.mubr.f32.mxu0 %v8120_v38  ;;  %3022 = vmatprep.mubr.f32.mxu1 %v8120_v38 }
 0x318   : > { %8152 = vst [vmem:[#allocation95_spill] sm:$0xff] %v6908_v51  ;;  %v6914_v1 = vpop.f32.mrf.mxu1  ;;  %v1694_v51 = vmax.f32 %v6696_v53, 0.0  ;;  %v5485_v53 = vpop.eup %5484 }
 0x319   : > { %8153 = vst [vmem:[#allocation96_spill] sm:$0xff] %v6914_v1  ;;  %v6920_v62 = vpop.f32.mrf.mxu0 }
 0x31a   : > { %8154 = vst [vmem:[#allocation97_spill] sm:$0xff] %v6920_v62  ;;  %v6922_v19 = vpop.f32.mrf.mxu1  ;;  %4754 = vmatmul.mubr.msk.f32.gmra.mxu0 %vm1111_vm3, %v6918_v37  ;;  %4786 = vmatmul.mubr.msk.f32.gmra.mxu1 %vm1111_vm3, %v6918_v37  ;;  %v6935_v25 = vadd.f32 %v1804_v60, %v1694_v51  ;;  %v1808_v51 = vmul.f32 0.6931472, %v5485_v53 }
 0x31b   : > { %8155 = vst [vmem:[#allocation98_spill] sm:$0xff] %v6922_v19  ;;  %v6925_v28 = vpop.f32.mrf.mxu0  ;;  %2771 = vmatprep.mubr.f32.mxu0 %v8120_v38  ;;  %3028 = vmatprep.mubr.f32.mxu1 %v8120_v38 }
 0x31c   : > { %8156 = vst [vmem:[#allocation99_spill] sm:$0xff] %v6925_v28  ;;  %v6931_v1 = vpop.f32.mrf.mxu1  ;;  %v1695_v28 = vmax.f32 %v6729_v49, 0.0 }
 0x31d   : > { %8157 = vst [vmem:[#allocation100_spill] sm:$0xff] %v6931_v1  ;;  %v6937_v23 = vpop.f32.mrf.mxu0 }
 0x31e   : > { %8158 = vst [vmem:[#allocation101_spill] sm:$0xff] %v6937_v23  ;;  %v6939_v62 = vpop.f32.mrf.mxu1  ;;  %4755 = vmatmul.mubr.msk.f32.gmra.mxu0 %vm1111_vm3, %v6935_v25  ;;  %4787 = vmatmul.mubr.msk.f32.gmra.mxu1 %vm1111_vm3, %v6935_v25  ;;  %v6952_v60 = vadd.f32 %v1806_v45, %v1695_v28  ;;  %v1696_v23 = vmax.f32 %v6722_v41, 0.0 }
 0x31f   : > { %v6942_v19 = vpop.f32.mrf.mxu0  ;;  %2777 = vmatprep.mubr.f32.mxu0 %v8120_v38  ;;  %3034 = vmatprep.mubr.f32.mxu1 %v8120_v38 }
 0x320   : > { %8159 = vst [vmem:[#allocation102_spill] sm:$0xff] %v6942_v19  ;;  %v6948_v1 = vpop.f32.mrf.mxu1  ;;  %v6969_v28 = vadd.f32 %v1808_v51, %v1696_v23  ;;  %v2501_v23 = vmul.f32 %v6708_v59, %v6203_v54  ;;  %v2502_v59 = vmul.f32 %v6719_v30, %v6209_v34  ;;  %v2503_v34 = vmul.f32 %v6748_v29, %v6233_v6 }
 0x321   : > { %8160 = vst [vmem:[#allocation103_spill] sm:$0xff] %v6948_v1  ;;  %v6954_v58 = vpop.f32.mrf.mxu0 }
 0x322   : > { %8161 = vst [vmem:[#allocation104_spill] sm:$0xff] %v6954_v58  ;;  %v6956_v49 = vpop.f32.mrf.mxu1  ;;  %4756 = vmatmul.mubr.msk.f32.gmra.mxu0 %vm1111_vm3, %v6952_v60  ;;  %4788 = vmatmul.mubr.msk.f32.gmra.mxu1 %vm1111_vm3, %v6952_v60 }
 0x323   : > { %8162 = vst [vmem:[#allocation105_spill] sm:$0xff] %v6956_v49  ;;  %v6959_v19 = vpop.f32.mrf.mxu0  ;;  %2783 = vmatprep.mubr.f32.mxu0 %v8120_v38  ;;  %3040 = vmatprep.mubr.f32.mxu1 %v8120_v38 }
 0x324   : > { %8163 = vst [vmem:[#allocation106_spill] sm:$0xff] %v6959_v19  ;;  %v6965_v1 = vpop.f32.mrf.mxu1  ;;  %v8038_v19 = vlaneseq }
 0x325   : > { %8164 = vst [vmem:[#allocation107_spill] sm:$0xff] %v6965_v1  ;;  %v6971_v45 = vpop.f32.mrf.mxu0 }
 0x326   : > { %8165 = vst [vmem:[#allocation108_spill] sm:$0xff] %v6971_v45  ;;  %v6973_v53 = vpop.f32.mrf.mxu1  ;;  %4757 = vmatmul.mubr.msk.f32.gmra.mxu0 %vm1111_vm3, %v6969_v28  ;;  %4789 = vmatmul.mubr.msk.f32.gmra.mxu1 %vm1111_vm3, %v6969_v28 }
 0x327   : > { %8166 = vst [vmem:[#allocation109_spill] sm:$0xff] %v6973_v53  ;;  %v6975_v41 = vpop.f32.mrf.mxu0  ;;  %2789 = vmatprep.mubr.f32.mxu0 %v8120_v38  ;;  %3046 = vmatprep.mubr.f32.mxu1 %v8120_v38 }
 0x328   : > { %8167 = vst [vmem:[#allocation110_spill] sm:$0xff] %v6975_v41  ;;  %v6981_v58 = vpop.f32.mrf.mxu1 }
 0x329   : > { %8168 = vst [vmem:[#allocation111_spill] sm:$0xff] %v6981_v58  ;;  %v6987_v51 = vpop.f32.mrf.mxu0 }
 0x32a   : > { %8169 = vst [vmem:[#allocation112_spill] sm:$0xff] %v6987_v51  ;;  %v6989_v45 = vpop.f32.mrf.mxu1  ;;  %4758 = vmatmul.mubr.msk.f32.gmra.mxu0 %vm1111_vm3, %v2501_v23  ;;  %4790 = vmatmul.mubr.msk.f32.gmra.mxu1 %vm1111_vm3, %v2501_v23  ;;  %v7004_v51 = vshrl.u32 %v8038_v19, 7 }
 0x32b   : > { %8170 = vst [vmem:[#allocation113_spill] sm:$0xff] %v6989_v45  ;;  %v6991_v41 = vpop.f32.mrf.mxu0  ;;  %2795 = vmatprep.mubr.f32.mxu0 %v8120_v38  ;;  %3052 = vmatprep.mubr.f32.mxu1 %v8120_v38  ;;  %v3421_v45 = vld [vmem:[#allocation6] sm:$0xf] }
 0x32c   : > { %8171 = vst [vmem:[#allocation114_spill] sm:$0xff] %v6991_v41  ;;  %v6995_v53 = vpop.f32.mrf.mxu1  ;;  %v8040_v23 = vsub.s32 0, %v7004_v51  ;;  %v8041_v30 = vsub.s32 1, %v7004_v51  ;;  %v8044_v19 = vsub.s32 3, %v7004_v51 }
 0x32d   : > { %8172 = vst [vmem:[#allocation115_spill] sm:$0xff] %v6995_v53  ;;  %v7001_v54 = vpop.f32.mrf.mxu0  ;;  %v8042_v53 = vsub.s32 2, %v7004_v51 }
 0x32e   : > { %8173 = vst [vmem:[#allocation116_spill] sm:$0xff] %v7001_v54  ;;  %v7006_v41 = vpop.f32.mrf.mxu1  ;;  %4759 = vmatmul.mubr.msk.f32.gmra.mxu0 %vm1111_vm3, %v2502_v59  ;;  %4791 = vmatmul.mubr.msk.f32.gmra.mxu1 %vm1111_vm3, %v2502_v59  ;;  %v7026_v59 = vrot.slane %v3421_v45, %v8040_v23   ;;  %v7040_v49 = vrot.slane %v3421_v45, %v8044_v19  }
 0x32f   : > { %8174 = vst [vmem:[#allocation117_spill] sm:$0xff] %v7006_v41  ;;  %v7008_v58 = vpop.f32.mrf.mxu0  ;;  %2801 = vmatprep.mubr.f32.mxu0 %v8120_v38  ;;  %3058 = vmatprep.mubr.f32.mxu1 %v8120_v38  ;;  %v7036_v41 = vrot.slane %v3421_v45, %v8041_v30   ;;  %v2504_v30 = vmul.f32 %v6765_v13, %v6239_v18 }
 0x330   : > { %8175 = vst [vmem:[#allocation118_spill] sm:$0xff] %v7008_v58  ;;  %v7014_v1 = vpop.f32.mrf.mxu1  ;;  %v7030_v58 = vrot.slane %v3421_v45, %v8042_v53   ;;  %v2505_v19 = vmul.f32 %v6782_v4, %v6265_v48 }
 0x331   : > { %8176 = vst [vmem:[#allocation119_spill] sm:$0xff] %v7014_v1  ;;  %v7022_v54 = vpop.f32.mrf.mxu0 }
 0x332   : > { %8177 = vst [vmem:[#allocation120_spill] sm:$0xff] %v7022_v54  ;;  %v7032_v1 = vpop.f32.mrf.mxu1  ;;  %4760 = vmatmul.mubr.msk.f32.gmra.mxu0 %vm1111_vm3, %v2503_v34  ;;  %4792 = vmatmul.mubr.msk.f32.gmra.mxu1 %vm1111_vm3, %v2503_v34 }
 0x333   : > { %v7042_v29 = vpop.f32.mrf.mxu0  ;;  %2807 = vmatprep.mubr.f32.mxu0 %v8120_v38  ;;  %3064 = vmatprep.mubr.f32.mxu1 %v8120_v38 }
 0x334   : > { %8178 = vst [vmem:[#allocation121_spill] sm:$0xff] %v7042_v29  ;;  %v7046_v23 = vpop.f32.mrf.mxu1 }
 0x335   : > { %v7052_v53 = vpop.f32.mrf.mxu0 }
 0x336   : > { %8179 = vst [vmem:[#allocation122_spill] sm:$0xff] %v7052_v53  ;;  %v7054_v6 = vpop.f32.mrf.mxu1  ;;  %4761 = vmatmul.mubr.msk.f32.gmra.mxu0 %vm1111_vm3, %v2504_v30  ;;  %4793 = vmatmul.mubr.msk.f32.gmra.mxu1 %vm1111_vm3, %v2504_v30 }
 0x337   : > { %v7056_v45 = vpop.f32.mrf.mxu0  ;;  %2813 = vmatprep.mubr.f32.mxu0 %v8120_v38  ;;  %3070 = vmatprep.mubr.f32.mxu1 %v8120_v38 }
 0x338   : > { %8180 = vst [vmem:[#allocation123_spill] sm:$0xff] %v7056_v45  ;;  %v7060_v34 = vpop.f32.mrf.mxu1  ;;  %v2506_v45 = vmul.f32 %v6799_v31, %v6285_v36 }
 0x339   : > { %v7066_v13 = vpop.f32.mrf.mxu0 }
 0x33a   : > { %8181 = vst [vmem:[#allocation124_spill] sm:$0xff] %v7066_v13  ;;  %v7068_v18 = vpop.f32.mrf.mxu1  ;;  %4762 = vmatmul.mubr.msk.f32.gmra.mxu0 %vm1111_vm3, %v2505_v19  ;;  %4794 = vmatmul.mubr.msk.f32.gmra.mxu1 %vm1111_vm3, %v2505_v19  ;;  %v2507_v19 = vmul.f32 %v6816_v9, %v6294_v2 }
 0x33b   : > { %v7070_v53 = vpop.f32.mrf.mxu0  ;;  %2819 = vmatprep.mubr.f32.mxu0 %v8120_v38  ;;  %3076 = vmatprep.mubr.f32.mxu1 %v8120_v38 }
 0x33c   : > { %8182 = vst [vmem:[#allocation125_spill] sm:$0xff] %v7070_v53  ;;  %v7074_v30 = vpop.f32.mrf.mxu1  ;;  %v8192_v53 = vsub.s32 0, %v7004_v51 }
 0x33e   : > { %v7080_v4 = vpop.f32.mrf.mxu1  ;;  %4763 = vmatmul.mubr.msk.f32.gmra.mxu0 %vm1111_vm3, %v2506_v45  ;;  %4795 = vmatmul.mubr.msk.f32.gmra.mxu1 %vm1111_vm3, %v2506_v45  ;;  %v2508_v45 = vmul.f32 %v6833_v24, %v6308_v11 }
 0x33f   : > { %2825 = vmatprep.mubr.f32.mxu0 %v8120_v38  ;;  %3082 = vmatprep.mubr.f32.mxu1 %v8120_v38 }
 0x340   : > { %v7084_v48 = vpop.f32.mrf.mxu1 }
 0x342   : > { %v7090_v13 = vpop.f32.mrf.mxu1  ;;  %4764 = vmatmul.mubr.msk.f32.gmra.mxu0 %vm1111_vm3, %v2507_v19  ;;  %4796 = vmatmul.mubr.msk.f32.gmra.mxu1 %vm1111_vm3, %v2507_v19  ;;  %v2509_v19 = vmul.f32 %v6850_v39, %v6316_v26 }
 0x343   : > { %2831 = vmatprep.mubr.f32.mxu0 %v8120_v38  ;;  %3088 = vmatprep.mubr.f32.mxu1 %v8120_v38 }
 0x344   : > { %v7094_v31 = vpop.f32.mrf.mxu1 }
 0x346   : > { %v7100_v36 = vpop.f32.mrf.mxu1  ;;  %4765 = vmatmul.mubr.msk.f32.gmra.mxu0 %vm1111_vm3, %v2508_v45  ;;  %4797 = vmatmul.mubr.msk.f32.gmra.mxu1 %vm1111_vm3, %v2508_v45  ;;  %v2510_v45 = vmul.f32 %v6867_v15, %v6321_v16 }
 0x347   : > { %2837 = vmatprep.mubr.f32.mxu0 %v8120_v38  ;;  %3094 = vmatprep.mubr.f32.mxu1 %v8120_v38 }
 0x348   : > { %v7104_v9 = vpop.f32.mrf.mxu1 }
 0x34a   : > { %v7110_v2 = vpop.f32.mrf.mxu1  ;;  %4766 = vmatmul.mubr.msk.f32.gmra.mxu0 %vm1111_vm3, %v2509_v19  ;;  %4798 = vmatmul.mubr.msk.f32.gmra.mxu1 %vm1111_vm3, %v2509_v19  ;;  %v2511_v19 = vmul.f32 %v6884_v46, %v6329_v20 }
 0x34b   : > { %2843 = vmatprep.mubr.f32.mxu0 %v8120_v38  ;;  %3100 = vmatprep.mubr.f32.mxu1 %v8120_v38 }
 0x34c   : > { %v7114_v24 = vpop.f32.mrf.mxu1 }
 0x34e   : > { %v7120_v11 = vpop.f32.mrf.mxu1  ;;  %4767 = vmatmul.mubr.msk.f32.gmra.mxu0 %vm1111_vm3, %v2510_v45  ;;  %4799 = vmatmul.mubr.msk.f32.gmra.mxu1 %vm1111_vm3, %v2510_v45  ;;  %v2512_v45 = vmul.f32 %v6901_v63, %v6337_v42 }
 0x34f   : > { %2849 = vmatprep.mubr.f32.mxu0 %v8120_v38  ;;  %3106 = vmatprep.mubr.f32.mxu1 %v8120_v38 }
 0x350   : > { %v7124_v39 = vpop.f32.mrf.mxu1 }
 0x352   : > { %v7130_v26 = vpop.f32.mrf.mxu1  ;;  %4768 = vmatmul.mubr.msk.f32.gmra.mxu0 %vm1111_vm3, %v2511_v19  ;;  %4800 = vmatmul.mubr.msk.f32.gmra.mxu1 %vm1111_vm3, %v2511_v19  ;;  %v2513_v19 = vmul.f32 %v6918_v37, %v6345_v47 }
 0x353   : > { %2855 = vmatprep.mubr.f32.mxu0 %v8120_v38  ;;  %3112 = vmatprep.mubr.f32.mxu1 %v8120_v38 }
 0x354   : > { %v7134_v15 = vpop.f32.mrf.mxu1 }
 0x356   : > { %v7140_v16 = vpop.f32.mrf.mxu1  ;;  %4769 = vmatmul.mubr.msk.f32.gmra.mxu0 %vm1111_vm3, %v2512_v45  ;;  %4801 = vmatmul.mubr.msk.f32.gmra.mxu1 %vm1111_vm3, %v2512_v45  ;;  %v2514_v45 = vmul.f32 %v6935_v25, %v6353_v44 }
 0x357   : > { %2861 = vmatprep.mubr.f32.mxu0 %v8120_v38  ;;  %3118 = vmatprep.mubr.f32.mxu1 %v8120_v38 }
 0x358   : > { %v7144_v46 = vpop.f32.mrf.mxu1 }
 0x359   : > { %8183 = vst [vmem:[#allocation126_spill] sm:$0xff] %v7144_v46 }
 0x35a   : > { %v7150_v20 = vpop.f32.mrf.mxu1  ;;  %4770 = vmatmul.mubr.msk.f32.gmra.mxu0 %vm1111_vm3, %v2513_v19  ;;  %4802 = vmatmul.mubr.msk.f32.gmra.mxu1 %vm1111_vm3, %v2513_v19  ;;  %v2515_v19 = vmul.f32 %v6952_v60, %v6361_v55 }
 0x35b   : > { %2867 = vmatprep.mubr.f32.mxu0 %v8120_v38  ;;  %3124 = vmatprep.mubr.f32.mxu1 %v8120_v38 }
 0x35c   : > { %v7154_v63 = vpop.f32.mrf.mxu1 }
 0x35d   : > { %8184 = vst [vmem:[#allocation127_spill] sm:$0xff] %v7154_v63 }
 0x35e   : > { %v7160_v42 = vpop.f32.mrf.mxu1  ;;  %4771 = vmatmul.mubr.msk.f32.gmra.mxu0 %vm1111_vm3, %v2514_v45  ;;  %4803 = vmatmul.mubr.msk.f32.gmra.mxu1 %vm1111_vm3, %v2514_v45  ;;  %v2516_v45 = vmul.f32 %v6969_v28, %v6368_v57  ;;  %v8193_v28 = vsub.s32 2, %v7004_v51 }
 0x35f   : > { %8185 = vst [vmem:[#allocation128_spill] sm:$0xff] %v7160_v42  ;;  %2873 = vmatprep.mubr.f32.mxu0 %v8120_v38  ;;  %3130 = vmatprep.mubr.f32.mxu1 %v8120_v38 }
 0x360   : > { %v7164_v37 = vpop.f32.mrf.mxu1 }
 0x361   : > { %8186 = vst [vmem:[#allocation129_spill] sm:$0xff] %v7164_v37 }
 0x362   : > { %v7170_v47 = vpop.f32.mrf.mxu1  ;;  %4772 = vmatmul.mubr.msk.f32.gmra.mxu0 %vm1111_vm3, %v2515_v19  ;;  %4804 = vmatmul.mubr.msk.f32.gmra.mxu1 %vm1111_vm3, %v2515_v19  ;;  %v3143_v19 = vld [vmem:[%s8003_s9] sm:$0xf] }
 0x363   : > { %8187 = vst [vmem:[#allocation130_spill] sm:$0xff] %v7170_v47  ;;  %2879 = vmatprep.mubr.f32.mxu0 %v8120_v38  ;;  %3136 = vmatprep.mubr.f32.mxu1 %v8120_v38  ;;  %v7193_v38 = vrot.slane %v3143_v19, %v8192_v53  ;;  %v7197_v57 = vrot.slane %v3143_v19, %v8193_v28 }
 0x364   : > { %v7174_v25 = vpop.f32.mrf.mxu1 }
 0x365   : > { %8188 = vst [vmem:[#allocation131_spill] sm:$0xff] %v7174_v25  ;;  %v8194_v25 = vsub.s32 1, %v7004_v51 }
 0x366   : > { %v7180_v44 = vpop.f32.mrf.mxu1  ;;  %4773 = vmatmul.mubr.msk.f32.gmra.mxu0 %vm1111_vm3, %v2516_v45  ;;  %4805 = vmatmul.mubr.msk.f32.gmra.mxu1 %vm1111_vm3, %v2516_v45  ;;  %v8195_v45 = vsub.s32 3, %v7004_v51 }
 0x367   : > { %8189 = vst [vmem:[#allocation132_spill] sm:$0xff] %v7180_v44  ;;  %v7201_v44 = vrot.slane %v3143_v19, %v8194_v25 }
 0x368   : > { %v7184_v60 = vpop.f32.mrf.mxu1 }
 0x369   : > { %8190 = vst [vmem:[#allocation133_spill] sm:$0xff] %v7184_v60  ;;  %v7205_v60 = vrot.slane %v3143_v19, %v8195_v45 }
 0x36a   : > { %v7186_v55 = vpop.f32.mrf.mxu1 }
 0x36b   : > { %8191 = vst [vmem:[#allocation134_spill] sm:$0xff] %v7186_v55 }
 0x3aa   : > { %v2695_v55 = vpop.f32.mrf.mxu0  ;;  %v2952_v37 = vpop.f32.mrf.mxu1 }
 0x3ab   : > { %v3165_v54 = vmul.f32 %v7193_v38, %v2695_v55  ;;  %v3167_v47 = vmul.f32 %v7197_v57, %v2952_v37 }
 0x3ac   : > { %v2697_v53 = vpop.f32.mrf.mxu0  ;;  %v2954_v29 = vpop.f32.mrf.mxu1 }
 0x3ad   : > { %3229 = vst [vmem:[#allocation3] sm:$0xff] %v3165_v54  ;;  %3231 = vst [vmem:[#allocation3 + $0x10] sm:$0xff] %v3167_v47  ;;  %v3166_v28 = vmul.f32 %v7201_v44, %v2697_v53  ;;  %v3168_v63 = vmul.f32 %v7205_v60, %v2954_v29 }
 0x3ae   : > { %v2701_v25 = vpop.f32.mrf.mxu0  ;;  %v2958_v42 = vpop.f32.mrf.mxu1 }
 0x3af   : > { %3230 = vst [vmem:[#allocation3 + $0x8] sm:$0xff] %v3166_v28  ;;  %3232 = vst [vmem:[#allocation3 + $0x18] sm:$0xff] %v3168_v63  ;;  %v3169_v19 = vmul.f32 %v7193_v38, %v2701_v25  ;;  %v3171_v45 = vmul.f32 %v7197_v57, %v2958_v42 }
 0x3b0   : > { %v2703_v46 = vpop.f32.mrf.mxu0  ;;  %v2960_v55 = vpop.f32.mrf.mxu1 }
 0x3b1   : > { %3233 = vst [vmem:[#allocation3 + $0x20] sm:$0xff] %v3169_v19  ;;  %3235 = vst [vmem:[#allocation3 + $0x30] sm:$0xff] %v3171_v45  ;;  %v3170_v37 = vmul.f32 %v7201_v44, %v2703_v46  ;;  %v3172_v54 = vmul.f32 %v7205_v60, %v2960_v55 }
 0x3b2   : > { %v2707_v47 = vpop.f32.mrf.mxu0  ;;  %v2964_v53 = vpop.f32.mrf.mxu1 }
 0x3b3   : > { %3234 = vst [vmem:[#allocation3 + $0x28] sm:$0xff] %v3170_v37  ;;  %3236 = vst [vmem:[#allocation3 + $0x38] sm:$0xff] %v3172_v54  ;;  %v3173_v29 = vmul.f32 %v7193_v38, %v2707_v47  ;;  %v3175_v63 = vmul.f32 %v7197_v57, %v2964_v53 }
 0x3b4   : > { %v2709_v28 = vpop.f32.mrf.mxu0  ;;  %v2966_v25 = vpop.f32.mrf.mxu1 }
 0x3b5   : > { %3237 = vst [vmem:[#allocation3 + $0x40] sm:$0xff] %v3173_v29  ;;  %3239 = vst [vmem:[#allocation3 + $0x50] sm:$0xff] %v3175_v63  ;;  %v3174_v42 = vmul.f32 %v7201_v44, %v2709_v28  ;;  %v3176_v19 = vmul.f32 %v7205_v60, %v2966_v25 }
 0x3b6   : > { %v2713_v45 = vpop.f32.mrf.mxu0  ;;  %v2970_v46 = vpop.f32.mrf.mxu1 }
 0x3b7   : > { %3238 = vst [vmem:[#allocation3 + $0x48] sm:$0xff] %v3174_v42  ;;  %3240 = vst [vmem:[#allocation3 + $0x58] sm:$0xff] %v3176_v19  ;;  %v3177_v55 = vmul.f32 %v7193_v38, %v2713_v45  ;;  %v3179_v37 = vmul.f32 %v7197_v57, %v2970_v46 }
 0x3b8   : > { %v2715_v54 = vpop.f32.mrf.mxu0  ;;  %v2972_v47 = vpop.f32.mrf.mxu1 }
 0x3b9   : > { %3241 = vst [vmem:[#allocation3 + $0x60] sm:$0xff] %v3177_v55  ;;  %3243 = vst [vmem:[#allocation3 + $0x70] sm:$0xff] %v3179_v37  ;;  %v3178_v53 = vmul.f32 %v7201_v44, %v2715_v54  ;;  %v3180_v29 = vmul.f32 %v7205_v60, %v2972_v47 }
 0x3ba   : > { %v2719_v63 = vpop.f32.mrf.mxu0  ;;  %v2976_v28 = vpop.f32.mrf.mxu1 }
 0x3bb   : > { %3242 = vst [vmem:[#allocation3 + $0x68] sm:$0xff] %v3178_v53  ;;  %3244 = vst [vmem:[#allocation3 + $0x78] sm:$0xff] %v3180_v29  ;;  %v3181_v25 = vmul.f32 %v7193_v38, %v2719_v63  ;;  %v3183_v42 = vmul.f32 %v7197_v57, %v2976_v28 }
 0x3bc   : > { %v2721_v19 = vpop.f32.mrf.mxu0  ;;  %v2978_v45 = vpop.f32.mrf.mxu1 }
 0x3bd   : > { %3245 = vst [vmem:[#allocation3 + $0x80] sm:$0xff] %v3181_v25  ;;  %3247 = vst [vmem:[#allocation3 + $0x90] sm:$0xff] %v3183_v42  ;;  %v3182_v46 = vmul.f32 %v7201_v44, %v2721_v19  ;;  %v3184_v55 = vmul.f32 %v7205_v60, %v2978_v45 }
 0x3be   : > { %v2725_v37 = vpop.f32.mrf.mxu0  ;;  %v2982_v54 = vpop.f32.mrf.mxu1 }
 0x3bf   : > { %3246 = vst [vmem:[#allocation3 + $0x88] sm:$0xff] %v3182_v46  ;;  %3248 = vst [vmem:[#allocation3 + $0x98] sm:$0xff] %v3184_v55  ;;  %v3185_v47 = vmul.f32 %v7193_v38, %v2725_v37  ;;  %v3187_v53 = vmul.f32 %v7197_v57, %v2982_v54 }
 0x3c0   : > { %v2727_v29 = vpop.f32.mrf.mxu0  ;;  %v2984_v63 = vpop.f32.mrf.mxu1 }
 0x3c1   : > { %3249 = vst [vmem:[#allocation3 + $0xa0] sm:$0xff] %v3185_v47  ;;  %3251 = vst [vmem:[#allocation3 + $0xb0] sm:$0xff] %v3187_v53  ;;  %v3186_v28 = vmul.f32 %v7201_v44, %v2727_v29  ;;  %v3188_v25 = vmul.f32 %v7205_v60, %v2984_v63 }
 0x3c2   : > { %v2731_v42 = vpop.f32.mrf.mxu0  ;;  %v2988_v19 = vpop.f32.mrf.mxu1 }
 0x3c3   : > { %3250 = vst [vmem:[#allocation3 + $0xa8] sm:$0xff] %v3186_v28  ;;  %3252 = vst [vmem:[#allocation3 + $0xb8] sm:$0xff] %v3188_v25  ;;  %v3189_v45 = vmul.f32 %v7193_v38, %v2731_v42  ;;  %v3191_v46 = vmul.f32 %v7197_v57, %v2988_v19 }
 0x3c4   : > { %v2733_v55 = vpop.f32.mrf.mxu0  ;;  %v2990_v37 = vpop.f32.mrf.mxu1 }
 0x3c5   : > { %3253 = vst [vmem:[#allocation3 + $0xc0] sm:$0xff] %v3189_v45  ;;  %3255 = vst [vmem:[#allocation3 + $0xd0] sm:$0xff] %v3191_v46  ;;  %v3190_v54 = vmul.f32 %v7201_v44, %v2733_v55  ;;  %v3192_v47 = vmul.f32 %v7205_v60, %v2990_v37 }
 0x3c6   : > { %v2737_v53 = vpop.f32.mrf.mxu0  ;;  %v2994_v29 = vpop.f32.mrf.mxu1 }
 0x3c7   : > { %3254 = vst [vmem:[#allocation3 + $0xc8] sm:$0xff] %v3190_v54  ;;  %3256 = vst [vmem:[#allocation3 + $0xd8] sm:$0xff] %v3192_v47  ;;  %v3193_v63 = vmul.f32 %v7193_v38, %v2737_v53  ;;  %v3195_v28 = vmul.f32 %v7197_v57, %v2994_v29 }
 0x3c8   : > { %v2739_v25 = vpop.f32.mrf.mxu0  ;;  %v2996_v42 = vpop.f32.mrf.mxu1 }
 0x3c9   : > { %3257 = vst [vmem:[#allocation3 + $0xe0] sm:$0xff] %v3193_v63  ;;  %3259 = vst [vmem:[#allocation3 + $0xf0] sm:$0xff] %v3195_v28  ;;  %v3194_v19 = vmul.f32 %v7201_v44, %v2739_v25  ;;  %v3196_v45 = vmul.f32 %v7205_v60, %v2996_v42 }
 0x3ca   : > { %v2743_v46 = vpop.f32.mrf.mxu0  ;;  %v3000_v55 = vpop.f32.mrf.mxu1 }
 0x3cb   : > { %3258 = vst [vmem:[#allocation3 + $0xe8] sm:$0xff] %v3194_v19  ;;  %3260 = vst [vmem:[#allocation3 + $0xf8] sm:$0xff] %v3196_v45  ;;  %v3197_v37 = vmul.f32 %v7193_v38, %v2743_v46  ;;  %v3199_v54 = vmul.f32 %v7197_v57, %v3000_v55 }
 0x3cc   : > { %v2745_v47 = vpop.f32.mrf.mxu0  ;;  %v3002_v53 = vpop.f32.mrf.mxu1 }
 0x3cd   : > { %3261 = vst [vmem:[#allocation3 + $0x100] sm:$0xff] %v3197_v37  ;;  %3263 = vst [vmem:[#allocation3 + $0x110] sm:$0xff] %v3199_v54  ;;  %v3198_v29 = vmul.f32 %v7201_v44, %v2745_v47  ;;  %v3200_v63 = vmul.f32 %v7205_v60, %v3002_v53 }
 0x3ce   : > { %v2749_v28 = vpop.f32.mrf.mxu0  ;;  %v3006_v25 = vpop.f32.mrf.mxu1 }
 0x3cf   : > { %3262 = vst [vmem:[#allocation3 + $0x108] sm:$0xff] %v3198_v29  ;;  %3264 = vst [vmem:[#allocation3 + $0x118] sm:$0xff] %v3200_v63  ;;  %v3201_v42 = vmul.f32 %v7193_v38, %v2749_v28  ;;  %v3203_v19 = vmul.f32 %v7197_v57, %v3006_v25 }
 0x3d0   : > { %v2751_v45 = vpop.f32.mrf.mxu0  ;;  %v3008_v46 = vpop.f32.mrf.mxu1 }
 0x3d1   : > { %3265 = vst [vmem:[#allocation3 + $0x120] sm:$0xff] %v3201_v42  ;;  %3267 = vst [vmem:[#allocation3 + $0x130] sm:$0xff] %v3203_v19  ;;  %v3202_v55 = vmul.f32 %v7201_v44, %v2751_v45  ;;  %v3204_v37 = vmul.f32 %v7205_v60, %v3008_v46 }
 0x3d2   : > { %v2755_v54 = vpop.f32.mrf.mxu0  ;;  %v3012_v47 = vpop.f32.mrf.mxu1 }
 0x3d3   : > { %3266 = vst [vmem:[#allocation3 + $0x128] sm:$0xff] %v3202_v55  ;;  %3268 = vst [vmem:[#allocation3 + $0x138] sm:$0xff] %v3204_v37  ;;  %v3205_v53 = vmul.f32 %v7193_v38, %v2755_v54  ;;  %v3207_v29 = vmul.f32 %v7197_v57, %v3012_v47 }
 0x3d4   : > { %v2757_v63 = vpop.f32.mrf.mxu0  ;;  %v3014_v28 = vpop.f32.mrf.mxu1 }
 0x3d5   : > { %3269 = vst [vmem:[#allocation3 + $0x140] sm:$0xff] %v3205_v53  ;;  %3271 = vst [vmem:[#allocation3 + $0x150] sm:$0xff] %v3207_v29  ;;  %v3206_v25 = vmul.f32 %v7201_v44, %v2757_v63  ;;  %v3208_v42 = vmul.f32 %v7205_v60, %v3014_v28 }
 0x3d6   : > { %v2761_v19 = vpop.f32.mrf.mxu0  ;;  %v3018_v45 = vpop.f32.mrf.mxu1 }
 0x3d7   : > { %3270 = vst [vmem:[#allocation3 + $0x148] sm:$0xff] %v3206_v25  ;;  %3272 = vst [vmem:[#allocation3 + $0x158] sm:$0xff] %v3208_v42  ;;  %v3209_v46 = vmul.f32 %v7193_v38, %v2761_v19  ;;  %v3211_v55 = vmul.f32 %v7197_v57, %v3018_v45 }
 0x3d8   : > { %v2763_v37 = vpop.f32.mrf.mxu0  ;;  %v3020_v54 = vpop.f32.mrf.mxu1 }
 0x3d9   : > { %3273 = vst [vmem:[#allocation3 + $0x160] sm:$0xff] %v3209_v46  ;;  %3275 = vst [vmem:[#allocation3 + $0x170] sm:$0xff] %v3211_v55  ;;  %v3210_v47 = vmul.f32 %v7201_v44, %v2763_v37  ;;  %v3212_v53 = vmul.f32 %v7205_v60, %v3020_v54 }
 0x3da   : > { %v2767_v29 = vpop.f32.mrf.mxu0  ;;  %v3024_v63 = vpop.f32.mrf.mxu1 }
 0x3db   : > { %3274 = vst [vmem:[#allocation3 + $0x168] sm:$0xff] %v3210_v47  ;;  %3276 = vst [vmem:[#allocation3 + $0x178] sm:$0xff] %v3212_v53  ;;  %v3213_v28 = vmul.f32 %v7193_v38, %v2767_v29  ;;  %v3215_v25 = vmul.f32 %v7197_v57, %v3024_v63 }
 0x3dc   : > { %v2769_v42 = vpop.f32.mrf.mxu0  ;;  %v3026_v19 = vpop.f32.mrf.mxu1 }
 0x3dd   : > { %3277 = vst [vmem:[#allocation3 + $0x180] sm:$0xff] %v3213_v28  ;;  %3279 = vst [vmem:[#allocation3 + $0x190] sm:$0xff] %v3215_v25  ;;  %v3214_v45 = vmul.f32 %v7201_v44, %v2769_v42  ;;  %v3216_v46 = vmul.f32 %v7205_v60, %v3026_v19 }
 0x3de   : > { %v2773_v55 = vpop.f32.mrf.mxu0  ;;  %v3030_v37 = vpop.f32.mrf.mxu1 }
 0x3df   : > { %3278 = vst [vmem:[#allocation3 + $0x188] sm:$0xff] %v3214_v45  ;;  %3280 = vst [vmem:[#allocation3 + $0x198] sm:$0xff] %v3216_v46  ;;  %v3217_v54 = vmul.f32 %v7193_v38, %v2773_v55  ;;  %v3219_v47 = vmul.f32 %v7197_v57, %v3030_v37 }
 0x3e0   : > { %v2775_v53 = vpop.f32.mrf.mxu0  ;;  %v3032_v29 = vpop.f32.mrf.mxu1 }
 0x3e1   : > { %3281 = vst [vmem:[#allocation3 + $0x1a0] sm:$0xff] %v3217_v54  ;;  %3283 = vst [vmem:[#allocation3 + $0x1b0] sm:$0xff] %v3219_v47  ;;  %v3218_v63 = vmul.f32 %v7201_v44, %v2775_v53  ;;  %v3220_v28 = vmul.f32 %v7205_v60, %v3032_v29 }
 0x3e2   : > { %v2779_v25 = vpop.f32.mrf.mxu0  ;;  %v3036_v42 = vpop.f32.mrf.mxu1 }
 0x3e3   : > { %3282 = vst [vmem:[#allocation3 + $0x1a8] sm:$0xff] %v3218_v63  ;;  %3284 = vst [vmem:[#allocation3 + $0x1b8] sm:$0xff] %v3220_v28  ;;  %v3221_v19 = vmul.f32 %v7193_v38, %v2779_v25  ;;  %v3223_v45 = vmul.f32 %v7197_v57, %v3036_v42 }
 0x3e4   : > { %v2781_v46 = vpop.f32.mrf.mxu0  ;;  %v3038_v55 = vpop.f32.mrf.mxu1 }
 0x3e5   : > { %3285 = vst [vmem:[#allocation3 + $0x1c0] sm:$0xff] %v3221_v19  ;;  %3287 = vst [vmem:[#allocation3 + $0x1d0] sm:$0xff] %v3223_v45  ;;  %v3222_v37 = vmul.f32 %v7201_v44, %v2781_v46  ;;  %v3224_v54 = vmul.f32 %v7205_v60, %v3038_v55 }
 0x3e6   : > { %v2785_v47 = vpop.f32.mrf.mxu0  ;;  %v3042_v53 = vpop.f32.mrf.mxu1 }
 0x3e7   : > { %3286 = vst [vmem:[#allocation3 + $0x1c8] sm:$0xff] %v3222_v37  ;;  %3288 = vst [vmem:[#allocation3 + $0x1d8] sm:$0xff] %v3224_v54  ;;  %v3225_v29 = vmul.f32 %v7193_v38, %v2785_v47  ;;  %v3227_v63 = vmul.f32 %v7197_v57, %v3042_v53 }
 0x3e8   : > { %v2787_v28 = vpop.f32.mrf.mxu0  ;;  %v3044_v25 = vpop.f32.mrf.mxu1 }
 0x3e9   : > { %3289 = vst [vmem:[#allocation3 + $0x1e0] sm:$0xff] %v3225_v29  ;;  %3291 = vst [vmem:[#allocation3 + $0x1f0] sm:$0xff] %v3227_v63  ;;  %v3226_v42 = vmul.f32 %v7201_v44, %v2787_v28  ;;  %v3228_v19 = vmul.f32 %v7205_v60, %v3044_v25 }
 0x3ea   : > { %v2791_v45 = vpop.f32.mrf.mxu0  ;;  %v3048_v46 = vpop.f32.mrf.mxu1 }
 0x3eb   : > { %3290 = vst [vmem:[#allocation3 + $0x1e8] sm:$0xff] %v3226_v42  ;;  %3292 = vst [vmem:[#allocation3 + $0x1f8] sm:$0xff] %v3228_v19  ;;  %v3293_v55 = vmul.f32 %v2791_v45, %v6607_v32  ;;  %v3295_v37 = vmul.f32 %v3048_v46, %v6724_v5 }
 0x3ec   : > { %v2793_v54 = vpop.f32.mrf.mxu0  ;;  %v3050_v38 = vpop.f32.mrf.mxu1 }
 0x3ed   : > { %3357 = vst [vmem:[#allocation4] sm:$0xff] %v3293_v55  ;;  %3359 = vst [vmem:[#allocation4 + $0x10] sm:$0xff] %v3295_v37  ;;  %v3294_v57 = vmul.f32 %v2793_v54, %v6612_v3  ;;  %v3296_v47 = vmul.f32 %v3050_v38, %v6733_v50 }
 0x3ee   : > { %v2797_v53 = vpop.f32.mrf.mxu0  ;;  %v3054_v44 = vpop.f32.mrf.mxu1 }
 0x3ef   : > { %3358 = vst [vmem:[#allocation4 + $0x8] sm:$0xff] %v3294_v57  ;;  %3360 = vst [vmem:[#allocation4 + $0x18] sm:$0xff] %v3296_v47  ;;  %v3297_v60 = vmul.f32 %v2797_v53, %v6618_v12  ;;  %v3299_v29 = vmul.f32 %v3054_v44, %v6744_v56  ;;  %v8196_v57 = vld [vmem:[#allocation72_spill] sm:$0xff] }
 0x3f0   : > { %v2799_v63 = vpop.f32.mrf.mxu0  ;;  %v3056_v32 = vpop.f32.mrf.mxu1 }
 0x3f1   : > { %3361 = vst [vmem:[#allocation4 + $0x20] sm:$0xff] %v3297_v60  ;;  %3363 = vst [vmem:[#allocation4 + $0x30] sm:$0xff] %v3299_v29  ;;  %v3298_v5 = vmul.f32 %v2799_v63, %v6624_v35  ;;  %v3300_v28 = vmul.f32 %v3056_v32, %v6752_v61  ;;  %v8198_v60 = vld [vmem:[#allocation74_spill] sm:$0xff] }
 0x3f2   : > { %v2803_v25 = vpop.f32.mrf.mxu0  ;;  %v3060_v3 = vpop.f32.mrf.mxu1 }
 0x3f3   : > { %3362 = vst [vmem:[#allocation4 + $0x28] sm:$0xff] %v3298_v5  ;;  %3364 = vst [vmem:[#allocation4 + $0x38] sm:$0xff] %v3300_v28  ;;  %v3301_v50 = vmul.f32 %v2803_v25, %v6627_v0  ;;  %v3303_v42 = vmul.f32 %v3060_v3, %v6761_v14  ;;  %v8200_v5 = vld [vmem:[#allocation76_spill] sm:$0xff]  ;;  %v8201_v3 = vld [vmem:[#allocation51_spill] sm:$0xff] }
 0x3f4   : > { %v2805_v19 = vpop.f32.mrf.mxu0  ;;  %v3062_v12 = vpop.f32.mrf.mxu1 }
 0x3f5   : > { %3365 = vst [vmem:[#allocation4 + $0x40] sm:$0xff] %v3301_v50  ;;  %3367 = vst [vmem:[#allocation4 + $0x50] sm:$0xff] %v3303_v42  ;;  %v3302_v56 = vmul.f32 %v2805_v19, %v6632_v21  ;;  %v3304_v45 = vmul.f32 %v3062_v12, %v6769_v8  ;;  %v8202_v42 = vld [vmem:[#allocation78_spill] sm:$0xff] }
 0x3f6   : > { %v2809_v46 = vpop.f32.mrf.mxu0  ;;  %v3066_v35 = vpop.f32.mrf.mxu1 }
 0x3f7   : > { %3366 = vst [vmem:[#allocation4 + $0x48] sm:$0xff] %v3302_v56  ;;  %3368 = vst [vmem:[#allocation4 + $0x58] sm:$0xff] %v3304_v45  ;;  %v3305_v61 = vmul.f32 %v2809_v46, %v6638_v22  ;;  %v3307_v55 = vmul.f32 %v3066_v35, %v6778_v17  ;;  %v8197_v17 = vld [vmem:[#allocation49_spill] sm:$0xff]  ;;  %v8203_v45 = vld [vmem:[#allocation52_spill] sm:$0xff] }
 0x3f8   : > { %v2811_v37 = vpop.f32.mrf.mxu0  ;;  %v3068_v0 = vpop.f32.mrf.mxu1  ;;  %v8204_v35 = vld [vmem:[#allocation80_spill] sm:$0xff] }
 0x3f9   : > { %3369 = vst [vmem:[#allocation4 + $0x60] sm:$0xff] %v3305_v61  ;;  %3371 = vst [vmem:[#allocation4 + $0x70] sm:$0xff] %v3307_v55  ;;  %v3306_v14 = vmul.f32 %v2811_v37, %v6644_v52  ;;  %v3308_v54 = vmul.f32 %v3068_v0, %v6786_v43  ;;  %v8199_v43 = vld [vmem:[#allocation50_spill] sm:$0xff]  ;;  %v8205_v0 = vld [vmem:[#allocation53_spill] sm:$0xff] }
 0x3fa   : > { %v2815_v38 = vpop.f32.mrf.mxu0  ;;  %v3072_v21 = vpop.f32.mrf.mxu1 }
 0x3fb   : > { %3370 = vst [vmem:[#allocation4 + $0x68] sm:$0xff] %v3306_v14  ;;  %3372 = vst [vmem:[#allocation4 + $0x78] sm:$0xff] %v3308_v54  ;;  %v3309_v8 = vmul.f32 %v2815_v38, %v6647_v10  ;;  %v3311_v47 = vmul.f32 %v3072_v21, %v8196_v57  ;;  %v8206_v54 = vld [vmem:[#allocation82_spill] sm:$0xff] }
 0x3fc   : > { %v2817_v53 = vpop.f32.mrf.mxu0  ;;  %v3074_v22 = vpop.f32.mrf.mxu1  ;;  %v8207_v57 = vld [vmem:[#allocation54_spill] sm:$0xff] }
 0x3fd   : > { %3373 = vst [vmem:[#allocation4 + $0x80] sm:$0xff] %v3309_v8  ;;  %3375 = vst [vmem:[#allocation4 + $0x90] sm:$0xff] %v3311_v47  ;;  %v3310_v44 = vmul.f32 %v2817_v53, %v8197_v17  ;;  %v3312_v29 = vmul.f32 %v3074_v22, %v8198_v60 }
 0x3fe   : > { %v2821_v63 = vpop.f32.mrf.mxu0  ;;  %v3078_v52 = vpop.f32.mrf.mxu1 }
 0x3ff   : > { %3374 = vst [vmem:[#allocation4 + $0x88] sm:$0xff] %v3310_v44  ;;  %3376 = vst [vmem:[#allocation4 + $0x98] sm:$0xff] %v3312_v29  ;;  %v3313_v32 = vmul.f32 %v2821_v63, %v8199_v43  ;;  %v3315_v28 = vmul.f32 %v3078_v52, %v8200_v5  ;;  %v8208_v44 = vld [vmem:[#allocation55_spill] sm:$0xff]  ;;  %v8209_v29 = vld [vmem:[#allocation85_spill] sm:$0xff] }
 0x400   : > { %v2823_v25 = vpop.f32.mrf.mxu0  ;;  %v3080_v10 = vpop.f32.mrf.mxu1 }
 0x401   : > { %3377 = vst [vmem:[#allocation4 + $0xa0] sm:$0xff] %v3313_v32  ;;  %3379 = vst [vmem:[#allocation4 + $0xb0] sm:$0xff] %v3315_v28  ;;  %v3314_v50 = vmul.f32 %v2823_v25, %v8201_v3  ;;  %v3316_v19 = vmul.f32 %v3080_v10, %v8202_v42  ;;  %v8210_v32 = vld [vmem:[#allocation56_spill] sm:$0xff] }
 0x402   : > { %v2827_v12 = vpop.f32.mrf.mxu0  ;;  %v3084_v56 = vpop.f32.mrf.mxu1 }
 0x403   : > { %3378 = vst [vmem:[#allocation4 + $0xa8] sm:$0xff] %v3314_v50  ;;  %3380 = vst [vmem:[#allocation4 + $0xb8] sm:$0xff] %v3316_v19  ;;  %v3317_v46 = vmul.f32 %v2827_v12, %v8203_v45  ;;  %v3319_v61 = vmul.f32 %v3084_v56, %v8204_v35  ;;  %v8212_v12 = vld [vmem:[#allocation58_spill] sm:$0xff]  ;;  %v8213_v45 = vld [vmem:[#allocation89_spill] sm:$0xff] }
 0x404   : > { %v2829_v55 = vpop.f32.mrf.mxu0  ;;  %v3086_v37 = vpop.f32.mrf.mxu1 }
 0x405   : > { %3381 = vst [vmem:[#allocation4 + $0xc0] sm:$0xff] %v3317_v46  ;;  %3383 = vst [vmem:[#allocation4 + $0xd0] sm:$0xff] %v3319_v61  ;;  %v3318_v14 = vmul.f32 %v2829_v55, %v8205_v0  ;;  %v3320_v38 = vmul.f32 %v3086_v37, %v8206_v54 }
 0x406   : > { %v2833_v21 = vpop.f32.mrf.mxu0  ;;  %v3090_v8 = vpop.f32.mrf.mxu1 }
 0x407   : > { %3382 = vst [vmem:[#allocation4 + $0xc8] sm:$0xff] %v3318_v14  ;;  %3384 = vst [vmem:[#allocation4 + $0xd8] sm:$0xff] %v3320_v38  ;;  %v3321_v47 = vmul.f32 %v2833_v21, %v8207_v57  ;;  %v3323_v53 = vmul.f32 %v3090_v8, %v6846_v27  ;;  %v8211_v27 = vld [vmem:[#allocation57_spill] sm:$0xff]  ;;  %v8216_v38 = vld [vmem:[#allocation92_spill] sm:$0xff] }
 0x408   : > { %v2835_v22 = vpop.f32.mrf.mxu0  ;;  %v3092_v17 = vpop.f32.mrf.mxu1 }
 0x409   : > { %3385 = vst [vmem:[#allocation4 + $0xe0] sm:$0xff] %v3321_v47  ;;  %3387 = vst [vmem:[#allocation4 + $0xf0] sm:$0xff] %v3323_v53  ;;  %v3322_v60 = vmul.f32 %v2835_v22, %v8208_v44  ;;  %v3324_v63 = vmul.f32 %v3092_v17, %v8209_v29  ;;  %v8217_v47 = vld [vmem:[#allocation61_spill] sm:$0xff]  ;;  %v8218_v22 = vld [vmem:[#allocation94_spill] sm:$0xff] }
 0x40a   : > { %v2839_v52 = vpop.f32.mrf.mxu0  ;;  %v3096_v43 = vpop.f32.mrf.mxu1 }
 0x40b   : > { %3386 = vst [vmem:[#allocation4 + $0xe8] sm:$0xff] %v3322_v60  ;;  %3388 = vst [vmem:[#allocation4 + $0xf8] sm:$0xff] %v3324_v63  ;;  %v3325_v5 = vmul.f32 %v2839_v52, %v8210_v32  ;;  %v3327_v28 = vmul.f32 %v3096_v43, %v6863_v40  ;;  %v8214_v40 = vld [vmem:[#allocation59_spill] sm:$0xff]  ;;  %v8220_v63 = vld [vmem:[#allocation96_spill] sm:$0xff] }
 0x40c   : > { %v2841_v25 = vpop.f32.mrf.mxu0  ;;  %v3098_v10 = vpop.f32.mrf.mxu1 }
 0x40d   : > { %3389 = vst [vmem:[#allocation4 + $0x100] sm:$0xff] %v3325_v5  ;;  %3391 = vst [vmem:[#allocation4 + $0x110] sm:$0xff] %v3327_v28  ;;  %v3326_v3 = vmul.f32 %v2841_v25, %v8211_v27  ;;  %v3328_v50 = vmul.f32 %v3098_v10, %v6871_v7  ;;  %v8215_v7 = vld [vmem:[#allocation60_spill] sm:$0xff]  ;;  %v8221_v5 = vld [vmem:[#allocation63_spill] sm:$0xff] }
 0x40e   : > { %v2845_v42 = vpop.f32.mrf.mxu0  ;;  %v3102_v19 = vpop.f32.mrf.mxu1  ;;  %v8222_v25 = vld [vmem:[#allocation98_spill] sm:$0xff] }
 0x40f   : > { %3390 = vst [vmem:[#allocation4 + $0x108] sm:$0xff] %v3326_v3  ;;  %3392 = vst [vmem:[#allocation4 + $0x118] sm:$0xff] %v3328_v50  ;;  %v3329_v56 = vmul.f32 %v2845_v42, %v8212_v12  ;;  %v3331_v46 = vmul.f32 %v3102_v19, %v8213_v45  ;;  %v8223_v50 = vld [vmem:[#allocation64_spill] sm:$0xff] }
 0x410   : > { %v2847_v35 = vpop.f32.mrf.mxu0  ;;  %v3104_v61 = vpop.f32.mrf.mxu1  ;;  %v8224_v19 = vld [vmem:[#allocation100_spill] sm:$0xff] }
 0x411   : > { %3393 = vst [vmem:[#allocation4 + $0x120] sm:$0xff] %v3329_v56  ;;  %3395 = vst [vmem:[#allocation4 + $0x130] sm:$0xff] %v3331_v46  ;;  %v3330_v55 = vmul.f32 %v2847_v35, %v8214_v40  ;;  %v3332_v37 = vmul.f32 %v3104_v61, %v6888_v33  ;;  %v8219_v33 = vld [vmem:[#allocation62_spill] sm:$0xff]  ;;  %v8225_v46 = vld [vmem:[#allocation65_spill] sm:$0xff] }
 0x412   : > { %v2851_v0 = vpop.f32.mrf.mxu0  ;;  %v3108_v14 = vpop.f32.mrf.mxu1 }
 0x413   : > { %3394 = vst [vmem:[#allocation4 + $0x128] sm:$0xff] %v3330_v55  ;;  %3396 = vst [vmem:[#allocation4 + $0x138] sm:$0xff] %v3332_v37  ;;  %v3333_v54 = vmul.f32 %v2851_v0, %v8215_v7  ;;  %v3335_v21 = vmul.f32 %v3108_v14, %v8216_v38  ;;  %v8226_v37 = vld [vmem:[#allocation66_spill] sm:$0xff]  ;;  %v8227_v14 = vld [vmem:[#allocation103_spill] sm:$0xff] }
 0x414   : > { %v2853_v8 = vpop.f32.mrf.mxu0  ;;  %v3110_v57 = vpop.f32.mrf.mxu1 }
 0x415   : > { %3397 = vst [vmem:[#allocation4 + $0x140] sm:$0xff] %v3333_v54  ;;  %3399 = vst [vmem:[#allocation4 + $0x150] sm:$0xff] %v3335_v21  ;;  %v3334_v53 = vmul.f32 %v2853_v8, %v8217_v47  ;;  %v3336_v17 = vmul.f32 %v3110_v57, %v8218_v22  ;;  %v8228_v21 = vld [vmem:[#allocation67_spill] sm:$0xff]  ;;  %v8229_v57 = vld [vmem:[#allocation105_spill] sm:$0xff] }
 0x416   : > { %v2857_v44 = vpop.f32.mrf.mxu0  ;;  %v3114_v60 = vpop.f32.mrf.mxu1 }
 0x417   : > { %3398 = vst [vmem:[#allocation4 + $0x148] sm:$0xff] %v3334_v53  ;;  %3400 = vst [vmem:[#allocation4 + $0x158] sm:$0xff] %v3336_v17  ;;  %v3337_v29 = vmul.f32 %v2857_v44, %v8219_v33  ;;  %v3339_v52 = vmul.f32 %v3114_v60, %v8220_v63  ;;  %v8231_v44 = vld [vmem:[#allocation107_spill] sm:$0xff]  ;;  %v8232_v63 = vld [vmem:[#allocation69_spill] sm:$0xff] }
 0x418   : > { %v2859_v43 = vpop.f32.mrf.mxu0  ;;  %v3116_v32 = vpop.f32.mrf.mxu1 }
 0x419   : > { %3401 = vst [vmem:[#allocation4 + $0x160] sm:$0xff] %v3337_v29  ;;  %3403 = vst [vmem:[#allocation4 + $0x170] sm:$0xff] %v3339_v52  ;;  %v3338_v28 = vmul.f32 %v2859_v43, %v8221_v5  ;;  %v3340_v10 = vmul.f32 %v3116_v32, %v8222_v25  ;;  %v8233_v43 = vld [vmem:[#allocation109_spill] sm:$0xff]  ;;  %v8234_v25 = vld [vmem:[#allocation70_spill] sm:$0xff] }
 0x41a   : > { %v2863_v27 = vpop.f32.mrf.mxu0  ;;  %v3120_v3 = vpop.f32.mrf.mxu1 }
 0x41b   : > { %3402 = vst [vmem:[#allocation4 + $0x168] sm:$0xff] %v3338_v28  ;;  %3404 = vst [vmem:[#allocation4 + $0x178] sm:$0xff] %v3340_v10  ;;  %v3341_v42 = vmul.f32 %v2863_v27, %v8223_v50  ;;  %v3343_v12 = vmul.f32 %v3120_v3, %v8224_v19  ;;  %v8235_v27 = vld [vmem:[#allocation111_spill] sm:$0xff] }
 0x41c   : > { %v2865_v56 = vpop.f32.mrf.mxu0  ;;  %v3122_v45 = vpop.f32.mrf.mxu1  ;;  %v8236_v19 = vld [vmem:[#allocation71_spill] sm:$0xff] }
 0x41d   : > { %3405 = vst [vmem:[#allocation4 + $0x180] sm:$0xff] %v3341_v42  ;;  %3407 = vst [vmem:[#allocation4 + $0x190] sm:$0xff] %v3343_v12  ;;  %v3342_v35 = vmul.f32 %v2865_v56, %v8225_v46  ;;  %v3344_v61 = vmul.f32 %v3122_v45, %v6939_v62  ;;  %v8230_v62 = vld [vmem:[#allocation68_spill] sm:$0xff]  ;;  %v8237_v56 = vld [vmem:[#allocation113_spill] sm:$0xff] }
 0x41e   : > { %v2869_v40 = vpop.f32.mrf.mxu0  ;;  %v3126_v55 = vpop.f32.mrf.mxu1 }
 0x41f   : > { %3406 = vst [vmem:[#allocation4 + $0x188] sm:$0xff] %v3342_v35  ;;  %3408 = vst [vmem:[#allocation4 + $0x198] sm:$0xff] %v3344_v61  ;;  %v3345_v0 = vmul.f32 %v2869_v40, %v8226_v37  ;;  %v3347_v7 = vmul.f32 %v3126_v55, %v8227_v14 }
 0x420   : > { %v2871_v54 = vpop.f32.mrf.mxu0  ;;  %v3128_v38 = vpop.f32.mrf.mxu1 }
 0x421   : > { %3409 = vst [vmem:[#allocation4 + $0x1a0] sm:$0xff] %v3345_v0  ;;  %3411 = vst [vmem:[#allocation4 + $0x1b0] sm:$0xff] %v3347_v7  ;;  %v3346_v8 = vmul.f32 %v2871_v54, %v8228_v21  ;;  %v3348_v47 = vmul.f32 %v3128_v38, %v8229_v57 }
 0x422   : > { %v2875_v53 = vpop.f32.mrf.mxu0  ;;  %v3132_v22 = vpop.f32.mrf.mxu1 }
 0x423   : > { %3410 = vst [vmem:[#allocation4 + $0x1a8] sm:$0xff] %v3346_v8  ;;  %3412 = vst [vmem:[#allocation4 + $0x1b8] sm:$0xff] %v3348_v47  ;;  %v3349_v17 = vmul.f32 %v2875_v53, %v8230_v62  ;;  %v3351_v60 = vmul.f32 %v3132_v22, %v8231_v44 }
 0x424   : > { %v2877_v33 = vpop.f32.mrf.mxu0  ;;  %v3134_v29 = vpop.f32.mrf.mxu1 }
 0x425   : > { %3413 = vst [vmem:[#allocation4 + $0x1c0] sm:$0xff] %v3349_v17  ;;  %3415 = vst [vmem:[#allocation4 + $0x1d0] sm:$0xff] %v3351_v60  ;;  %v3350_v52 = vmul.f32 %v2877_v33, %v8232_v63  ;;  %v3352_v32 = vmul.f32 %v3134_v29, %v8233_v43 }
 0x426   : > { %v2881_v5 = vpop.f32.mrf.mxu0  ;;  %v3138_v28 = vpop.f32.mrf.mxu1 }
 0x427   : > { %3414 = vst [vmem:[#allocation4 + $0x1c8] sm:$0xff] %v3350_v52  ;;  %3416 = vst [vmem:[#allocation4 + $0x1d8] sm:$0xff] %v3352_v32  ;;  %v3353_v10 = vmul.f32 %v2881_v5, %v8234_v25  ;;  %v3355_v3 = vmul.f32 %v3138_v28, %v8235_v27 }
 0x428   : > { %v2883_v50 = vpop.f32.mrf.mxu0  ;;  %v3140_v42 = vpop.f32.mrf.mxu1 }
 0x429   : > { %3417 = vst [vmem:[#allocation4 + $0x1e0] sm:$0xff] %v3353_v10  ;;  %3419 = vst [vmem:[#allocation4 + $0x1f0] sm:$0xff] %v3355_v3  ;;  %v3354_v12 = vmul.f32 %v2883_v50, %v8236_v19  ;;  %v3356_v45 = vmul.f32 %v3140_v42, %v8237_v56 }
 0x42b   : > { %3418 = vst [vmem:[#allocation4 + $0x1e8] sm:$0xff] %v3354_v12  ;;  %3420 = vst [vmem:[#allocation4 + $0x1f8] sm:$0xff] %v3356_v45 }
 0x42c LB: >> { %s4806_s30 = sshll.u32 %s5690_s29, 3  ;;  %vm3625_vm5 = vcmask 1040384   ;;  %vm3630_vm6 = vcmask 1041408   ;;  %vm3635_vm7 = vcmask 1042432   ;;  %vm3640_vm8 = vcmask 1043456   ;;  %s3448_s29 = sadd.s32 1, %s5690_s29   ;;  %s5690_s29 = sphi %s7347_s29, %s3448_s29   ;;  %v5686_v59 = vphi %v7026_v59, %v8241_v59   ;;  %v5682_v41 = vphi %v7036_v41, %v8240_v41   ;;  %v5678_v58 = vphi %v7030_v58, %v8239_v58   ;;  %v5674_v49 = vphi %v7040_v49, %v8238_v49  }
 0x42d   : >> { %s3454_s26 = sshra.s32 %s4806_s30, 3  ;;  %vm3645_vm9 = vcmask 1044480   ;;  %vm3650_vm10 = vcmask 1045504   ;;  %vm3655_vm11 = vcmask 1046528   ;;  %p3445_p1 = scmp.ge.s32.totalorder %s3448_s29, 16  }
 0x42e   : >> { %s7357_s14 = sshll.u32 %s3454_s26, 5  ;;  %s8288_s24 = sld [smem:[#allocation137_spill]] (%p3445_p1) }
 0x42f   : >> { %s3458_s15 = scalar_lea.vmem [#allocation3], %s7357_s14  ;;  %s3472_s17 = scalar_lea.vmem [#allocation4], %s7357_s14 }
 0x430   : >> { %v3459_v46 = vld [vmem:[%s3458_s15] sm:$0xff]  ;;  %v3460_v35 = vld [vmem:[%s3458_s15 + $0x8] sm:$0xff]  ;;  %v3461_v61 = vld [vmem:[%s3458_s15 + $0x10] sm:$0xff]  ;;  %s3661_s23 = scalar_lea.vmem [#allocation5], %s7357_s14  ;;  %s8343_s26 = sand.u32 (%p3445_p1), 1, %s5646_s19  }
 0x431   : >> { %v3462_v40 = vld [vmem:[%s3458_s15 + $0x18] sm:$0xff]  ;;  %v3463_v55 = vmul.f32 1.442695, %v3459_v46  ;;  %v3465_v37 = vmul.f32 1.442695, %v3460_v35  ;;  %s4831_s15 = sshll.u32 (%p3445_p1), %s5658_s22, 2 }
 0x432   : >> { %v3467_v0 = vmul.f32 1.442695, %v3461_v61  ;;  %v3469_v14 = vmul.f32 1.442695, %v3462_v40  ;;  %v7363_v54 = vld [vmem:[%s3472_s17] sm:$0xff]  ;;  %v7367_v21 = vld [vmem:[%s3472_s17 + $0x8] sm:$0xff] }
 0x433   : >> { %5486 = vpow2.f32 %v3463_v55  ;;  %v7372_v47 = vld [vmem:[%s3472_s17 + $0x10] sm:$0xff]  ;;  %v7377_v62 = vld [vmem:[%s3472_s17 + $0x18] sm:$0xff]  ;;  %s4490_s17 = sadd.s32 (%p3445_p1), %s5654_s21, %s4831_s15  ;;  %s7943_s14 = scalar_lea.sflag (%p3445_p1), [#allocation8], %s8343_s26 }
 0x434   : >> { %5488 = vpow2.f32 %v3465_v37  ;;  %s8289_s30 = smov (%p3445_p1), %s8288_s24  ;;  %s4832_s29 = sshll.u32 (%p3445_p1), %s4490_s17, 7 }
 0x435   : >> { %5490 = vpow2.f32 %v3467_v0  ;;  %s5695_s22 = smov (%p3445_p1), [#allocation7]  }
 0x436   : >> { %5492 = vpow2.f32 %v3469_v14  ;;  %s5562_s15 = sshll.u32 (%p3445_p1), %s5695_s22, 4  ;;  %s5563_s15 = int_to_ptr.vmem [resolvable:$false] %s5562_s15 }
 0x437   : > { %s5564_s17 = scalar_lea.vmem (%p3445_p1), %s5563_s15, 512 }
 0x440   : >> { %v7360_v7 = vpop.eup %5486 }
 0x441   : >> { %v7365_v38 = vpop.eup %5488  ;;  %v3477_v8 = vmul.f32 %v5686_v59, %v7360_v7 }
 0x442   : >> { %v7370_v57 = vpop.eup %5490  ;;  %v3478_v53 = vmul.f32 %v5682_v41, %v7365_v38 }
 0x443   : >> { %v7375_v22 = vpop.eup %5492  ;;  %v3481_v17 = vadd.f32 %v3477_v8, %v7363_v54  ;;  %v3479_v44 = vmul.f32 %v5678_v58, %v7370_v57 }
 0x444   : >> { %v3482_v60 = vadd.f32 %v3478_v53, %v7367_v21  ;;  %v3480_v33 = vmul.f32 %v5674_v49, %v7375_v22 }
 0x445   : >> { %v3489_v29 = vrot.slane %v3481_v17, 7  ;;  %v3483_v59 = vadd.f32 %v3479_v44, %v7372_v47 }
 0x446   : >> { %v3490_v63 = vrot.slane %v3482_v60, 7  ;;  %v3484_v52 = vadd.f32 %v3480_v33, %v7377_v62 }
 0x447   : >> { %v3497_v41 = vmul.f32 %v7360_v7, %v3489_v29  ;;  %v3491_v43 = vrot.slane %v3483_v59, 7 }
 0x448   : >> { %v3498_v32 = vmul.f32 %v7365_v38, %v3490_v63  ;;  %v3492_v5 = vrot.slane %v3484_v52, 7 }
 0x449   : >> { %v3501_v28 = vadd.f32 %v3497_v41, %v7363_v54  ;;  %v3499_v58 = vmul.f32 %v7370_v57, %v3491_v43 }
 0x44a   : >> { %v3502_v25 = vadd.f32 %v3498_v32, %v7367_v21  ;;  %v3500_v49 = vmul.f32 %v7375_v22, %v3492_v5 }
 0x44b   : >> { %v3509_v10 = vrot.slane %v3501_v28, 7  ;;  %v3503_v27 = vadd.f32 %v3499_v58, %v7372_v47 }
 0x44c   : >> { %v3510_v3 = vrot.slane %v3502_v25, 7  ;;  %v3504_v50 = vadd.f32 %v3500_v49, %v7377_v62 }
 0x44d   : >> { %v3517_v42 = vmul.f32 %v7360_v7, %v3509_v10  ;;  %v3511_v19 = vrot.slane %v3503_v27, 7 }
 0x44e   : >> { %v3518_v12 = vmul.f32 %v7365_v38, %v3510_v3  ;;  %v3512_v56 = vrot.slane %v3504_v50, 7 }
 0x44f   : >> { %v3521_v45 = vadd.f32 %v3517_v42, %v7363_v54  ;;  %v3519_v46 = vmul.f32 %v7370_v57, %v3511_v19 }
 0x450   : >> { %v3522_v35 = vadd.f32 %v3518_v12, %v7367_v21  ;;  %v3520_v61 = vmul.f32 %v7375_v22, %v3512_v56 }
 0x451   : >> { %v3529_v40 = vrot.slane %v3521_v45, 7  ;;  %v3523_v55 = vadd.f32 %v3519_v46, %v7372_v47 }
 0x452   : >> { %v3530_v37 = vrot.slane %v3522_v35, 7  ;;  %v3524_v0 = vadd.f32 %v3520_v61, %v7377_v62 }
 0x453   : >> { %v3537_v14 = vmul.f32 %v7360_v7, %v3529_v40  ;;  %v3531_v8 = vrot.slane %v3523_v55, 7  ;;  %v3626_v40 = vsel %vm3625_vm5, %v3481_v17, %v3501_v28  ;;  %v3629_v17 = vsel %vm3625_vm5, %v3484_v52, %v3504_v50 }
 0x454   : >> { %v3538_v53 = vmul.f32 %v7365_v38, %v3530_v37  ;;  %v3532_v44 = vrot.slane %v3524_v0, 7  ;;  %v3634_v52 = vsel %vm3630_vm6, %v3629_v17, %v3524_v0 }
 0x455   : >> { %v3541_v33 = vadd.f32 %v3537_v14, %v7363_v54  ;;  %v3539_v29 = vmul.f32 %v7370_v57, %v3531_v8  ;;  %v3627_v8 = vsel %vm3625_vm5, %v3482_v60, %v3502_v25 }
 0x456   : >> { %v3542_v63 = vadd.f32 %v3538_v53, %v7367_v21  ;;  %v3540_v41 = vmul.f32 %v7375_v22, %v3532_v44 }
 0x457   : >> { %v3549_v43 = vrot.slane %v3541_v33, 7  ;;  %v3543_v32 = vadd.f32 %v3539_v29, %v7372_v47 }
 0x458   : >> { %v3550_v5 = vrot.slane %v3542_v63, 7  ;;  %v3544_v58 = vadd.f32 %v3540_v41, %v7377_v62  ;;  %v3628_v41 = vsel %vm3625_vm5, %v3483_v59, %v3503_v27 }
 0x459   : >> { %v3557_v49 = vmul.f32 %v7360_v7, %v3549_v43  ;;  %v3551_v10 = vrot.slane %v3543_v32, 7  ;;  %v3631_v43 = vsel %vm3630_vm6, %v3626_v40, %v3521_v45 }
 0x45a   : >> { %v3558_v3 = vmul.f32 %v7365_v38, %v3550_v5  ;;  %v3552_v42 = vrot.slane %v3544_v58, 7  ;;  %v3636_v45 = vsel %vm3635_vm7, %v3631_v43, %v3541_v33 }
 0x45b   : >> { %v3561_v19 = vadd.f32 %v3557_v49, %v7363_v54  ;;  %v3559_v12 = vmul.f32 %v7370_v57, %v3551_v10  ;;  %v3632_v10 = vsel %vm3630_vm6, %v3627_v8, %v3522_v35  ;;  %v3639_v8 = vsel %vm3635_vm7, %v3634_v52, %v3544_v58 }
 0x45c   : >> { %v3562_v56 = vadd.f32 %v3558_v3, %v7367_v21  ;;  %v3560_v46 = vmul.f32 %v7375_v22, %v3552_v42  ;;  %v3633_v3 = vsel %vm3630_vm6, %v3628_v41, %v3523_v55 }
 0x45d   : >> { %v3569_v61 = vrot.slane %v3561_v19, 7  ;;  %v3563_v37 = vadd.f32 %v3559_v12, %v7372_v47  ;;  %v3637_v12 = vsel %vm3635_vm7, %v3632_v10, %v3542_v63  ;;  %v3638_v55 = vsel %vm3635_vm7, %v3633_v3, %v3543_v32 }
 0x45e   : >> { %v3570_v14 = vrot.slane %v3562_v56, 7  ;;  %v3564_v53 = vadd.f32 %v3560_v46, %v7377_v62  ;;  %v3641_v40 = vsel %vm3640_vm8, %v3636_v45, %v3561_v19 }
 0x45f   : >> { %v3577_v44 = vmul.f32 %v7360_v7, %v3569_v61  ;;  %v3571_v29 = vrot.slane %v3563_v37, 7  ;;  %v3643_v41 = vsel %vm3640_vm8, %v3638_v55, %v3563_v37 }
 0x460   : >> { %v3578_v5 = vmul.f32 %v7365_v38, %v3570_v14  ;;  %v3572_v49 = vrot.slane %v3564_v53, 7  ;;  %v3644_v58 = vsel %vm3640_vm8, %v3639_v8, %v3564_v53  ;;  %v3887_v8 = vld [vmem:[%s8005_s11 + $0x178] sm:$0xff] (%p3445_p1) }
 0x461   : >> { %v3581_v28 = vadd.f32 %v3577_v44, %v7363_v54  ;;  %v3579_v60 = vmul.f32 %v7370_v57, %v3571_v29  ;;  %v3642_v44 = vsel %vm3640_vm8, %v3637_v12, %v3562_v56 }
 0x462   : >> { %v3582_v25 = vadd.f32 %v3578_v5, %v7367_v21  ;;  %v3580_v59 = vmul.f32 %v7375_v22, %v3572_v49 }
 0x463   : >> { %v3589_v27 = vrot.slane %v3581_v28, 7  ;;  %v3583_v42 = vadd.f32 %v3579_v60, %v7372_v47  ;;  %v3646_v19 = vsel %vm3645_vm9, %v3641_v40, %v3581_v28  ;;  %v3855_v40 = vld [vmem:[%s8005_s11 + $0x78] sm:$0xff] (%p3445_p1) }
 0x464   : >> { %v3590_v50 = vrot.slane %v3582_v25, 7  ;;  %v3584_v35 = vadd.f32 %v3580_v59, %v7377_v62  ;;  %v3647_v17 = vsel %vm3645_vm9, %v3642_v44, %v3582_v25  ;;  %v3902_v44 = vld [vmem:[%s8005_s11 + $0x1f0] sm:$0xff] (%p3445_p1) }
 0x465   : >> { %v3597_v46 = vmul.f32 %v7360_v7, %v3589_v27  ;;  %v3591_v61 = vrot.slane %v3583_v42, 7  ;;  %v3648_v37 = vsel %vm3645_vm9, %v3643_v41, %v3583_v42 }
 0x466   : >> { %v3598_v14 = vmul.f32 %v7365_v38, %v3590_v50  ;;  %v3592_v33 = vrot.slane %v3584_v35, 7  ;;  %v3649_v27 = vsel %vm3645_vm9, %v3644_v58, %v3584_v35 }
 0x467   : >> { %v3601_v0 = vadd.f32 %v3597_v46, %v7363_v54  ;;  %v3599_v63 = vmul.f32 %v7370_v57, %v3591_v61 }
 0x468   : >> { %v3602_v29 = vadd.f32 %v3598_v14, %v7367_v21  ;;  %v3600_v32 = vmul.f32 %v7375_v22, %v3592_v33  ;;  %v5694_v14 = vmov (%p3445_p1), 1966171168  }
 0x469   : >> { %v3609_v43 = vrot.slane %v3601_v0, 7  ;;  %v3603_v5 = vadd.f32 %v3599_v63, %v7372_v47  ;;  %v3651_v3 = vsel %vm3650_vm10, %v3646_v19, %v3601_v0  ;;  %v3685_v33 = vunpack.c.l.s4 (%p3445_p1), %v5694_v14  ;;  %v3870_v0 = vld [vmem:[%s8005_s11 + $0xf0] sm:$0xff] (%p3445_p1) }
 0x46a   : >> { %v3610_v49 = vrot.slane %v3602_v29, 7  ;;  %v3604_v56 = vadd.f32 %v3600_v32, %v7377_v62  ;;  %v3652_v25 = vsel %vm3650_vm10, %v3647_v17, %v3602_v29  ;;  %v3854_v63 = vld [vmem:[%s8005_s11 + $0x70] sm:$0xff] (%p3445_p1)  ;;  %v3868_v17 = vld [vmem:[%s8005_s11 + $0xe0] sm:$0xff] (%p3445_p1) }
 0x46b   : >> { %v3617_v10 = vmul.f32 %v7360_v7, %v3609_v43  ;;  %v3611_v60 = vrot.slane %v3603_v5, 7  ;;  %v3653_v52 = vsel %vm3650_vm10, %v3648_v37, %v3603_v5  ;;  %v3886_v29 = vld [vmem:[%s8005_s11 + $0x170] sm:$0xff] (%p3445_p1)  ;;  %v3686_v19 = vunpack.c.0.s8 (%p3445_p1), %v3685_v33  ;;  %v3901_v5 = vld [vmem:[%s8005_s11 + $0x1e8] sm:$0xff] (%p3445_p1)  ;;  %v3884_v37 = vld [vmem:[%s8005_s11 + $0x160] sm:$0xff] (%p3445_p1) }
 0x46c   : >> { %v3618_v28 = vmul.f32 %v7365_v38, %v3610_v49  ;;  %v3612_v59 = vrot.slane %v3604_v56, 7  ;;  %v3654_v46 = vsel %vm3650_vm10, %v3649_v27, %v3604_v56  ;;  %v3900_v56 = vld [vmem:[%s8005_s11 + $0x1e0] sm:$0xff] (%p3445_p1)  ;;  %v3851_v27 = vld [vmem:[%s8005_s11 + $0x58] sm:$0xff] (%p3445_p1)  ;;  %v3862_v14 = vld [vmem:[%s8005_s11 + $0xb0] sm:$0xff] (%p3445_p1) }
 0x46d   : >> { %v3621_v53 = vadd.f32 %v3617_v10, %v7363_v54  ;;  %v3619_v45 = vmul.f32 %v7370_v57, %v3611_v60  ;;  %v3689_v10 = vsub.s32 (%p3445_p1), %v3686_v19, %v7004_v51  ;;  %v3852_v60 = vld [vmem:[%s8005_s11 + $0x60] sm:$0xff] (%p3445_p1)  ;;  %v3899_v51 = vld [vmem:[%s8005_s11 + $0x1d8] sm:$0xff] (%p3445_p1)  ;;  %v3894_v33 = vld [vmem:[%s8005_s11 + $0x1b0] sm:$0xff] (%p3445_p1) }
 0x46e   : >> { %v3622_v7 = vadd.f32 %v3618_v28, %v7367_v21  ;;  %v3620_v50 = vmul.f32 %v7375_v22, %v3612_v59  ;;  %v3844_v19 = vld [vmem:[%s8005_s11 + $0x20] sm:$0xff] (%p3445_p1) }
 0x46f   : >> { %v3656_v42 = vsel %vm3655_vm11, %v3651_v3, %v3621_v53  ;;  %v3670_v12 = vrot.slane %v3621_v53, 7   ;;  %v3623_v38 = vadd.f32 %v3619_v45, %v7372_v47  ;;  %v3871_v47 = vld [vmem:[%s8005_s11 + $0xf8] sm:$0xff] (%p3445_p1)  ;;  %v3898_v45 = vld [vmem:[%s8005_s11 + $0x1d0] sm:$0xff] (%p3445_p1) }
 0x470   : >> { %3662 = vst [vmem:[%s3661_s23] sm:$0xff] %v3656_v42  ;;  %v3657_v54 = vsel %vm3655_vm11, %v3652_v25, %v3622_v7  ;;  %v3671_v35 = vrot.slane %v3622_v7, 7   ;;  %v3624_v57 = vadd.f32 %v3620_v50, %v7377_v62  ;;  %3447 = sbr.rel (!%p3445_p1) target bundleno = 1068 (0x42c), region = 129  ;;  %v3903_v62 = vld [vmem:[%s8005_s11 + $0x1f8] sm:$0xff] (%p3445_p1)  ;;  %4912 = vmatprep.subr.mxu0 (%p3445_p1), %v3871_v47  ;;  %v3866_v25 = vld [vmem:[%s8005_s11 + $0xd0] sm:$0xff] (%p3445_p1)  ;;  %v8242_v42 = vlaneseq (%p3445_p1) }
 0x471   : >> { %3663 = vst [vmem:[%s3661_s23 + $0x8] sm:$0xff] %v3657_v54  ;;  %v3658_v21 = vsel %vm3655_vm11, %v3653_v52, %v3623_v38  ;;  %v3672_v61 = vrot.slane %v3623_v38, 7   ;;  %v8241_v59 = vmov %v3670_v12  ;;  %4992 = vmatprep.subr.mxu1 (%p3445_p1), %v3903_v62  ;;  %4913 = vmatpush3.msra.mxu0 (%p3445_p1), %v3855_v40  ;;  %v3867_v3 = vld [vmem:[%s8005_s11 + $0xd8] sm:$0xff] (%p3445_p1)  ;;  %v3850_v52 = vld [vmem:[%s8005_s11 + $0x50] sm:$0xff] (%p3445_p1)  ;;  %v3897_v38 = vld [vmem:[%s8005_s11 + $0x1c8] sm:$0xff] (%p3445_p1) }
 0x472   : >> { %3664 = vst [vmem:[%s3661_s23 + $0x10] sm:$0xff] %v3658_v21  ;;  %v3659_v22 = vsel %vm3655_vm11, %v3654_v46, %v3624_v57  ;;  %v3673_v55 = vrot.slane %v3624_v57, 7   ;;  %v8240_v41 = vmov %v3671_v35  ;;  %4993 = vmatpush3.msra.mxu1 (%p3445_p1), %v3887_v8  ;;  %v3682_v32 = vcombine.low (%p3445_p1), %v3670_v12, %v3671_v35  ;;  %4914 = vmatprep.subr.mxu0 (%p3445_p1), %v3870_v0  ;;  %v3883_v53 = vld [vmem:[%s8005_s11 + $0x158] sm:$0xff] (%p3445_p1)  ;;  %v3882_v50 = vld [vmem:[%s8005_s11 + $0x150] sm:$0xff] (%p3445_p1)  ;;  %v3865_v12 = vld [vmem:[%s8005_s11 + $0xc8] sm:$0xff] (%p3445_p1) }
 0x473   : >> { %3665 = vst [vmem:[%s3661_s23 + $0x18] sm:$0xff] %v3659_v22  ;;  %v8239_v58 = vmov %v3672_v61  ;;  %v3869_v41 = vld [vmem:[%s8005_s11 + $0xe8] sm:$0xff] (%p3445_p1)  ;;  %4994 = vmatprep.subr.mxu1 (%p3445_p1), %v3902_v44  ;;  %4915 = vmatpush3.msra.mxu0 (%p3445_p1), %v3854_v63  ;;  %vm3709_vm12 = vcmp.lt.s32.totalorder (%p3445_p1), %v8242_v42, 512  ;;  %v3864_v57 = vld [vmem:[%s8005_s11 + $0xc0] sm:$0xff] (%p3445_p1)  ;;  %v3895_v47 = vld [vmem:[%s8005_s11 + $0x1b8] sm:$0xff] (%p3445_p1)  ;;  %s4493_s23 = sshll.u32 (%p3445_p1), %s5861_s28, 4  ;;  %s7937_s23 = int_to_ptr.vmem [resolvable:$true] %s4493_s23 }
 0x474   : >> { %v8238_v49 = vmov %v3673_v55  ;;  %v3683_v43 = vcombine.low (%p3445_p1), %v3672_v61, %v3673_v55  ;;  %v3853_v58 = vld [vmem:[%s8005_s11 + $0x68] sm:$0xff] (%p3445_p1)  ;;  %4995 = vmatpush3.msra.mxu1 (%p3445_p1), %v3886_v29  ;;  %4916 = vmatprep.subr.mxu0 (%p3445_p1), %v3869_v41  ;;  %v3690_v28 = vrot.slane (%p3445_p1), %v3682_v32, %v3689_v10  ;;  %v3896_v21 = vld [vmem:[%s8005_s11 + $0x1c0] sm:$0xff] (%p3445_p1)  ;;  %v3863_v55 = vld [vmem:[%s8005_s11 + $0xb8] sm:$0xff] (%p3445_p1)  ;;  %s5558_s21 = scalar_lea.vmem (%p3445_p1), %s7937_s23, 256  ;;  %p5565_p6 = scmp.lt.s32.totalorder (%p3445_p1), %s7937_s23, %s5563_s15 }
 0x475   : > { %v3885_v49 = vld [vmem:[%s8005_s11 + $0x168] sm:$0xff]  ;;  %4996 = vmatprep.subr.mxu1 %v3901_v5  ;;  %4917 = vmatpush3.msra.mxu0 %v3853_v58  ;;  %v3848_v61 = vld [vmem:[%s8005_s11 + $0x40] sm:$0xff]  ;;  %v3847_v62 = vld [vmem:[%s8005_s11 + $0x38] sm:$0xff]  ;;  %p5559_p2 = scmp.ne.s32.totalorder %s7937_s23, %s5558_s21  ;;  %p5566_p7 = scmp.lt.s32.totalorder %s5564_s17, %s5558_s21 }
 0x476   : > { %4997 = vmatpush3.msra.mxu1 %v3885_v49  ;;  %v3697_v59 = vrot.slane %v3683_v43, %v3689_v10  ;;  %4918 = vmatprep.subr.mxu0 %v3868_v17  ;;  %v3849_v54 = vld [vmem:[%s8005_s11 + $0x48] sm:$0xff]  ;;  %v3880_v22 = vld [vmem:[%s8005_s11 + $0x140] sm:$0xff]  ;;  %v3879_v40 = vld [vmem:[%s8005_s11 + $0x138] sm:$0xff] }
 0x477   : > { %4998 = vmatprep.subr.mxu1 %v3900_v56  ;;  %4919 = vmatpush3.msra.mxu0 %v3852_v60  ;;  %v3881_v35 = vld [vmem:[%s8005_s11 + $0x148] sm:$0xff]  ;;  %v3846_v8 = vld [vmem:[%s8005_s11 + $0x30] sm:$0xff]  ;;  %v3860_v32 = vld [vmem:[%s8005_s11 + $0xa0] sm:$0xff]  ;;  %p5560_p4 = pnand %p5559_p2, %p5830_p3  ;;  %p5567_p9 = por %p5566_p7, %p5565_p6 }
 0x478   : > { %4999 = vmatpush3.msra.mxu1 %v3884_v37  ;;  %v3698_v7 = vcombine.low %v3690_v28, %v3697_v59  ;;  %4920 = vmatprep.subr.mxu0 %v3867_v3  ;;  %v3878_v0 = vld [vmem:[%s8005_s11 + $0x130] sm:$0xff]  ;;  %v3861_v44 = vld [vmem:[%s8005_s11 + $0xa8] sm:$0xff]  ;;  %v3892_v43 = vld [vmem:[%s8005_s11 + $0x1a0] sm:$0xff] }
 0x479   : > { %5000 = vmatprep.subr.mxu1 %v3899_v51  ;;  %4921 = vmatpush3.msra.mxu0 %v3851_v27  ;;  %v3893_v63 = vld [vmem:[%s8005_s11 + $0x1a8] sm:$0xff]  ;;  %v3876_v5 = vld [vmem:[%s8005_s11 + $0x120] sm:$0xff]  ;;  %v3859_v58 = vld [vmem:[%s8005_s11 + $0x98] sm:$0xff]  ;;  %p5561_p5 = pneg %p5560_p4 }
 0x47a   : > { %5001 = vmatpush3.msra.mxu1 %v3883_v53  ;;  %v3705_v46 = vrot.slane %v3698_v7, %v3689_v10  ;;  %4922 = vmatprep.subr.mxu0 %v3866_v25  ;;  %v3845_v29 = vld [vmem:[%s8005_s11 + $0x28] sm:$0xff]  ;;  %v3891_v49 = vld [vmem:[%s8005_s11 + $0x198] sm:$0xff]  ;;  %v3858_v10 = vld [vmem:[%s8005_s11 + $0x90] sm:$0xff] }
 0x47b   : > { %5002 = vmatprep.subr.mxu1 %v3898_v45  ;;  %4923 = vmatpush3.msra.mxu0 %v3850_v52  ;;  %v3877_v41 = vld [vmem:[%s8005_s11 + $0x128] sm:$0xff]  ;;  %v3843_v17 = vld [vmem:[%s8005_s11 + $0x18] sm:$0xff]  ;;  %v3890_v60 = vld [vmem:[%s8005_s11 + $0x190] sm:$0xff]  ;;  %p5568_p10 = pnand %p5567_p9, %p5561_p5 }
 0x47c   : > { %5003 = vmatpush3.msra.mxu1 %v3882_v50  ;;  %3711 = vst.msk [vmem:[#allocation6] sm:$0xf] %vm3709_vm12, %v3705_v46  ;;  %4924 = vmatprep.subr.mxu0 %v3865_v12  ;;  %v3875_v56 = vld [vmem:[%s8005_s11 + $0x118] sm:$0xff]  ;;  %v3842_v37 = vld [vmem:[%s8005_s11 + $0x10] sm:$0xff]  ;;  %v3857_v51 = vld [vmem:[%s8005_s11 + $0x88] sm:$0xff] }
 0x47d   : > { %5004 = vmatprep.subr.mxu1 %v3897_v38  ;;  %4925 = vmatpush3.msra.mxu0 %v3849_v54  ;;  %v3874_v3 = vld [vmem:[%s8005_s11 + $0x110] sm:$0xff]  ;;  %v3889_v28 = vld [vmem:[%s8005_s11 + $0x188] sm:$0xff]  ;;  %v3715_v25 = vld [vmem:[#allocation5 + $0x18] sm:$0xff] }
 0x47e   : > { %5005 = vmatpush3.msra.mxu1 %v3881_v35  ;;  %4926 = vmatprep.subr.mxu0 %v3864_v57  ;;  %v3713_v59 = vld [vmem:[#allocation5 + $0x8] sm:$0xff]  ;;  %v3841_v27 = vld [vmem:[%s8005_s11 + $0x8] sm:$0xff]  ;;  %v3856_v45 = vld [vmem:[%s8005_s11 + $0x80] sm:$0xff] }
 0x47f   : > { %5006 = vmatprep.subr.mxu1 %v3896_v21  ;;  %4927 = vmatpush3.msra.mxu0 %v3848_v61  ;;  %v3873_v53 = vld [vmem:[%s8005_s11 + $0x108] sm:$0xff]  ;;  %v3714_v52 = vld [vmem:[#allocation5 + $0x10] sm:$0xff]  ;;  %v3888_v50 = vld [vmem:[%s8005_s11 + $0x180] sm:$0xff] }
 0x480   : > { %5007 = vmatpush3.msra.mxu1 %v3880_v22  ;;  %4928 = vmatprep.subr.mxu0 %v3863_v55  ;;  %v3712_v7 = vld [vmem:[#allocation5] sm:$0xff]  ;;  %v8243_v42 = vld [vmem:[#allocation75_spill] sm:$0xff]  ;;  %v3717_v38 = vld [vmem:[#allocation5 + $0x28] sm:$0xff] }
 0x481   : > { %5008 = vmatprep.subr.mxu1 %v3895_v47  ;;  %4929 = vmatpush3.msra.mxu0 %v3847_v62  ;;  %v3777_v12 = vmul.f32 %v3713_v59, %v8243_v42  ;;  %v3719_v46 = vld [vmem:[#allocation5 + $0x38] sm:$0xff]  ;;  %v8244_v35 = vld [vmem:[#allocation117_spill] sm:$0xff]  ;;  %v3726_v59 = vld [vmem:[#allocation5 + $0x70] sm:$0xff] }
 0x482   : > { %5009 = vmatpush3.msra.mxu1 %v3879_v40  ;;  %4930 = vmatprep.subr.mxu0 %v3862_v14  ;;  %v3840_v54 = vld [vmem:[%s8005_s11] sm:$0xff]  ;;  %v3779_v57 = vmul.f32 %v3715_v25, %v8244_v35  ;;  %v8245_v61 = vld [vmem:[#allocation73_spill] sm:$0xff]  ;;  %v3783_v14 = vmul.f32 %v3719_v46, %v7032_v1  ;;  %v3730_v42 = vld [vmem:[#allocation5 + $0x90] sm:$0xff] }
 0x483   : > { %5010 = vmatprep.subr.mxu1 %v3894_v33  ;;  %4931 = vmatpush3.msra.mxu0 %v3846_v8  ;;  %v3872_v21 = vld [vmem:[%s8005_s11 + $0x100] sm:$0xff]  ;;  %v3776_v22 = vmul.f32 %v3712_v7, %v8245_v61  ;;  %v3716_v33 = vld [vmem:[#allocation5 + $0x20] sm:$0xff]  ;;  %v3718_v8 = vld [vmem:[#allocation5 + $0x30] sm:$0xff] }
 0x484   : > { %5011 = vmatpush3.msra.mxu1 %v3878_v0  ;;  %4932 = vmatprep.subr.mxu0 %v3861_v44  ;;  %v8246_v55 = vld [vmem:[#allocation115_spill] sm:$0xff]  ;;  %v3721_v0 = vld [vmem:[#allocation5 + $0x48] sm:$0xff]  ;;  %v8254_v7 = vld [vmem:[#allocation88_spill] sm:$0xff] }
 0x485   : > { %5012 = vmatprep.subr.mxu1 %v3893_v63  ;;  %4933 = vmatpush3.msra.mxu0 %v3845_v29  ;;  %v3778_v47 = vmul.f32 %v3714_v52, %v8246_v55  ;;  %v8247_v62 = vld [vmem:[#allocation79_spill] sm:$0xff]  ;;  %v8248_v63 = vld [vmem:[#allocation77_spill] sm:$0xff]  ;;  %v8257_v55 = vld [vmem:[#allocation90_spill] sm:$0xff] }
 0x486   : > { %5013 = vmatpush3.msra.mxu1 %v3877_v41  ;;  %4934 = vmatprep.subr.mxu0 %v3860_v32  ;;  %v3781_v40 = vmul.f32 %v3717_v38, %v8247_v62  ;;  %v3723_v44 = vld [vmem:[#allocation5 + $0x58] sm:$0xff]  ;;  %v3780_v29 = vmul.f32 %v3716_v33, %v8248_v63  ;;  %v3734_v61 = vld [vmem:[#allocation5 + $0xb0] sm:$0xff]  ;;  %v3736_v33 = vld [vmem:[#allocation5 + $0xc0] sm:$0xff] }
 0x487   : > { %5014 = vmatprep.subr.mxu1 %v3892_v43  ;;  %4935 = vmatpush3.msra.mxu0 %v3844_v19  ;;  %v8249_v41 = vld [vmem:[#allocation119_spill] sm:$0xff]  ;;  %v3787_v1 = vmul.f32 %v3723_v44, %v7054_v6  ;;  %v3798_v62 = vmul.f32 %v3734_v61, %v7084_v48  ;;  %v8259_v44 = vld [vmem:[#allocation93_spill] sm:$0xff] }
 0x488   : > { %5015 = vmatpush3.msra.mxu1 %v3876_v5  ;;  %4936 = vmatprep.subr.mxu0 %v3859_v58  ;;  %v3782_v32 = vmul.f32 %v3718_v8, %v8249_v41  ;;  %v8250_v43 = vld [vmem:[#allocation83_spill] sm:$0xff]  ;;  %v3720_v5 = vld [vmem:[#allocation5 + $0x40] sm:$0xff]  ;;  %v3800_v63 = vmul.f32 %v3736_v33, %v8259_v44  ;;  %v3761_v61 = vld [vmem:[#allocation5 + $0x188] sm:$0xff] }
 0x489   : > { %5016 = vmatprep.subr.mxu1 %v3891_v49  ;;  %4937 = vmatpush3.msra.mxu0 %v3843_v17  ;;  %v3785_v19 = vmul.f32 %v3721_v0, %v8250_v43  ;;  %v3722_v58 = vld [vmem:[#allocation5 + $0x50] sm:$0xff]  ;;  %v3725_v49 = vld [vmem:[#allocation5 + $0x68] sm:$0xff]  ;;  %v3727_v17 = vld [vmem:[#allocation5 + $0x78] sm:$0xff] }
 0x48a   : > { %5017 = vmatpush3.msra.mxu1 %v3875_v56  ;;  %4938 = vmatprep.subr.mxu0 %v3858_v10  ;;  %v8251_v56 = vld [vmem:[#allocation81_spill] sm:$0xff]  ;;  %v3731_v6 = vld [vmem:[#allocation5 + $0x98] sm:$0xff]  ;;  %v3738_v8 = vld [vmem:[#allocation5 + $0xd0] sm:$0xff] }
 0x48b   : > { %5018 = vmatprep.subr.mxu1 %v3890_v60  ;;  %4939 = vmatpush3.msra.mxu0 %v3842_v37  ;;  %v3784_v10 = vmul.f32 %v3720_v5, %v8251_v56  ;;  %v3786_v60 = vmul.f32 %v3722_v58, %v7046_v23  ;;  %v8252_v37 = vld [vmem:[#allocation86_spill] sm:$0xff]  ;;  %v3795_v52 = vmul.f32 %v3731_v6, %v7080_v4  ;;  %v8255_v38 = vld [vmem:[#allocation87_spill] sm:$0xff]  ;;  %v3740_v43 = vld [vmem:[#allocation5 + $0xe0] sm:$0xff] }
 0x48c   : > { %5019 = vmatpush3.msra.mxu1 %v3874_v3  ;;  %4940 = vmatprep.subr.mxu0 %v3857_v51  ;;  %v3789_v3 = vmul.f32 %v3725_v49, %v8252_v37  ;;  %v3791_v51 = vmul.f32 %v3727_v17, %v7068_v18  ;;  %v3735_v18 = vld [vmem:[#allocation5 + $0xb8] sm:$0xff]  ;;  %v3741_v0 = vld [vmem:[#allocation5 + $0xe8] sm:$0xff]  ;;  %v3748_v6 = vld [vmem:[#allocation5 + $0x120] sm:$0xff] }
 0x48d   : > { %5020 = vmatprep.subr.mxu1 %v3889_v28  ;;  %4941 = vmatpush3.msra.mxu0 %v3841_v27  ;;  %v3724_v28 = vld [vmem:[#allocation5 + $0x60] sm:$0xff]  ;;  %v3729_v27 = vld [vmem:[#allocation5 + $0x88] sm:$0xff]  ;;  %v8256_v35 = vld [vmem:[#allocation91_spill] sm:$0xff] }
 0x48e   : > { %5021 = vmatpush3.msra.mxu1 %v3873_v53  ;;  %4942 = vmatprep.subr.mxu0 %v3856_v45  ;;  %v8253_v53 = vld [vmem:[#allocation84_spill] sm:$0xff]  ;;  %v3790_v45 = vmul.f32 %v3726_v59, %v7060_v34  ;;  %v3793_v23 = vmul.f32 %v3729_v27, %v8254_v7  ;;  %v8260_v41 = vld [vmem:[#allocation99_spill] sm:$0xff]  ;;  %v8261_v5 = vld [vmem:[#allocation97_spill] sm:$0xff] }
 0x48f   : > { %5022 = vmatprep.subr.mxu1 %v3888_v50  ;;  %4943 = vmatpush3.msra.mxu0 %v3840_v54  ;;  %v3788_v25 = vmul.f32 %v3724_v28, %v8253_v53  ;;  %v3728_v50 = vld [vmem:[#allocation5 + $0x80] sm:$0xff]  ;;  %v3794_v54 = vmul.f32 %v3730_v42, %v7074_v30  ;;  %v3739_v4 = vld [vmem:[#allocation5 + $0xd8] sm:$0xff]  ;;  %v3805_v48 = vmul.f32 %v3741_v0, %v8260_v41  ;;  %v8262_v17 = vld [vmem:[#allocation102_spill] sm:$0xff] }
 0x490   : > { %3991 = vmatprep.mubr.f32.mxu0 %v3777_v12  ;;  %5023 = vmatpush3.msra.mxu1 %v3872_v21  ;;  %v3733_v12 = vld [vmem:[#allocation5 + $0xa8] sm:$0xff]  ;;  %v3792_v46 = vmul.f32 %v3728_v50, %v8255_v38  ;;  %v3732_v21 = vld [vmem:[#allocation5 + $0xa0] sm:$0xff]  ;;  %v3804_v58 = vmul.f32 %v3740_v43, %v8261_v5  ;;  %v3750_v53 = vld [vmem:[#allocation5 + $0x130] sm:$0xff] }
 0x491   : > { %4136 = vmatprep.mubr.f32.mxu1 %v3779_v57  ;;  %3992 = vmatmul.mubr.f32.vlgmr.msra.gmra.mxu0 %v3776_v22  ;;  %v3797_v34 = vmul.f32 %v3733_v12, %v8256_v35  ;;  %v3799_v57 = vmul.f32 %v3735_v18, %v7090_v13  ;;  %v3737_v22 = vld [vmem:[#allocation5 + $0xc8] sm:$0xff]  ;;  %v3743_v13 = vld [vmem:[#allocation5 + $0xf8] sm:$0xff]  ;;  %v3752_v42 = vld [vmem:[#allocation5 + $0x140] sm:$0xff] }
 0x492   : > { %4137 = vmatmul.mubr.f32.vlgmr.msra.gmra.mxu1 %v3778_v47  ;;  %3996 = vmatprep.mubr.f32.mxu0 %v3781_v40  ;;  %v3796_v47 = vmul.f32 %v3732_v21, %v8257_v55  ;;  %v8258_v40 = vld [vmem:[#allocation95_spill] sm:$0xff]  ;;  %v3749_v37 = vld [vmem:[#allocation5 + $0x128] sm:$0xff]  ;;  %v8267_v38 = vld [vmem:[#allocation108_spill] sm:$0xff] }
 0x493   : > { %4141 = vmatprep.mubr.f32.mxu1 %v3783_v14  ;;  %v3801_v30 = vmul.f32 %v3737_v22, %v8258_v40  ;;  %v3803_v14 = vmul.f32 %v3739_v4, %v7100_v36  ;;  %v3747_v36 = vld [vmem:[#allocation5 + $0x118] sm:$0xff]  ;;  %v8264_v59 = vld [vmem:[#allocation106_spill] sm:$0xff]  ;;  %v3764_v43 = vld [vmem:[#allocation5 + $0x1a0] sm:$0xff] }
 0x494   : > { %v3811_v56 = vmul.f32 %v3747_v36, %v7120_v11  ;;  %v3755_v11 = vld [vmem:[#allocation5 + $0x158] sm:$0xff]  ;;  %v3754_v12 = vld [vmem:[#allocation5 + $0x150] sm:$0xff]  ;;  %v3757_v18 = vld [vmem:[#allocation5 + $0x168] sm:$0xff] }
 0x495   : > { %3997 = vmatmul.mubr.f32.gmra.mxu0 %v3780_v29  ;;  %v3802_v29 = vmul.f32 %v3738_v8, %v7094_v31  ;;  %v3819_v50 = vmul.f32 %v3755_v11, %v7140_v16  ;;  %v8268_v35 = vld [vmem:[#allocation114_spill] sm:$0xff]  ;;  %v3763_v16 = vld [vmem:[#allocation5 + $0x198] sm:$0xff] }
 0x496   : > { %4142 = vmatmul.mubr.f32.gmra.mxu1 %v3782_v32  ;;  %4001 = vmatprep.mubr.f32.mxu0 %v3785_v19  ;;  %v3807_v32 = vmul.f32 %v3743_v13, %v7110_v2  ;;  %v3742_v19 = vld [vmem:[#allocation5 + $0xf0] sm:$0xff]  ;;  %v3751_v2 = vld [vmem:[#allocation5 + $0x138] sm:$0xff]  ;;  %v3765_v8 = vld [vmem:[#allocation5 + $0x1a8] sm:$0xff] }
 0x497   : > { %4146 = vmatprep.mubr.f32.mxu1 %v3787_v1  ;;  %v3745_v1 = vld [vmem:[#allocation5 + $0x108] sm:$0xff]  ;;  %v3806_v49 = vmul.f32 %v3742_v19, %v7104_v9  ;;  %v3813_v9 = vmul.f32 %v3749_v37, %v8264_v59  ;;  %v3815_v27 = vmul.f32 %v3751_v2, %v7130_v26  ;;  %v3759_v26 = vld [vmem:[#allocation5 + $0x178] sm:$0xff]  ;;  %v3758_v21 = vld [vmem:[#allocation5 + $0x170] sm:$0xff] }
 0x498   : > { %v3809_v31 = vmul.f32 %v3745_v1, %v8262_v17  ;;  %v8269_v22 = vld [vmem:[#allocation112_spill] sm:$0xff]  ;;  %v8270_v55 = vld [vmem:[#allocation126_spill] sm:$0xff]  ;;  %v8274_v44 = vld [vmem:[#allocation127_spill] sm:$0xff] }
 0x499   : > { %4002 = vmatmul.mubr.f32.gmra.mxu0 %v3784_v10  ;;  %v3744_v10 = vld [vmem:[#allocation5 + $0x100] sm:$0xff]  ;;  %v3762_v33 = vld [vmem:[#allocation5 + $0x190] sm:$0xff]  ;;  %v3769_v1 = vld [vmem:[#allocation5 + $0x1c8] sm:$0xff] }
 0x49a   : > { %4147 = vmatmul.mubr.f32.gmra.mxu1 %v3786_v60  ;;  %4006 = vmatprep.mubr.f32.mxu0 %v3789_v3  ;;  %v3746_v60 = vld [vmem:[#allocation5 + $0x110] sm:$0xff]  ;;  %v8263_v3 = vld [vmem:[#allocation101_spill] sm:$0xff]  ;;  %v8272_v40 = vld [vmem:[#allocation128_spill] sm:$0xff] }
 0x49b   : > { %4151 = vmatprep.mubr.f32.mxu1 %v3791_v51  ;;  %v3808_v51 = vmul.f32 %v3744_v10, %v8263_v3  ;;  %v3810_v28 = vmul.f32 %v3746_v60, %v7114_v24  ;;  %v8273_v0 = vld [vmem:[#allocation116_spill] sm:$0xff]  ;;  %v3766_v19 = vld [vmem:[#allocation5 + $0x1b0] sm:$0xff]  ;;  %v3773_v3 = vld [vmem:[#allocation5 + $0x1e8] sm:$0xff] }
 0x49c   : > { %v3771_v36 = vld [vmem:[#allocation5 + $0x1d8] sm:$0xff]  ;;  %v3768_v37 = vld [vmem:[#allocation5 + $0x1c0] sm:$0xff]  ;;  %v3770_v2 = vld [vmem:[#allocation5 + $0x1d0] sm:$0xff] }
 0x49d   : > { %4007 = vmatmul.mubr.f32.gmra.mxu0 %v3788_v25  ;;  %v3753_v25 = vld [vmem:[#allocation5 + $0x148] sm:$0xff]  ;;  %v8277_v5 = vld [vmem:[#allocation120_spill] sm:$0xff] }
 0x49e   : > { %4152 = vmatmul.mubr.f32.gmra.mxu1 %v3790_v45  ;;  %4011 = vmatprep.mubr.f32.mxu0 %v3793_v23  ;;  %v8265_v45 = vld [vmem:[#allocation104_spill] sm:$0xff]  ;;  %v3814_v23 = vmul.f32 %v3750_v53, %v7124_v39  ;;  %v3821_v39 = vmul.f32 %v3757_v18, %v8268_v35 }
 0x49f   : > { %4156 = vmatprep.mubr.f32.mxu1 %v3795_v52  ;;  %v3812_v7 = vmul.f32 %v3748_v6, %v8265_v45  ;;  %v8266_v52 = vld [vmem:[#allocation110_spill] sm:$0xff]  ;;  %v8280_v10 = vld [vmem:[#allocation132_spill] sm:$0xff]  ;;  %v8283_v6 = vld [vmem:[#allocation125_spill] sm:$0xff] }
 0x4a0   : > { %v3817_v24 = vmul.f32 %v3753_v25, %v8266_v52  ;;  %v3835_v60 = vmul.f32 %v3771_v36, %v8280_v10  ;;  %v3837_v53 = vmul.f32 %v3773_v3, %v8283_v6  ;;  %v8284_v25 = vld [vmem:[#allocation134_spill] sm:$0xff]  ;;  %v3772_v45 = vld [vmem:[#allocation5 + $0x1e0] sm:$0xff] }
 0x4a1   : > { %4012 = vmatmul.mubr.f32.gmra.mxu0 %v3792_v46  ;;  %v3816_v46 = vmul.f32 %v3752_v42, %v8267_v38  ;;  %v7742_v42 = vld [vmem:[%s8007_s13] ss:$0 sm:$0xff] }
 0x4a2   : > { %4157 = vmatmul.mubr.f32.gmra.mxu1 %v3794_v54  ;;  %4016 = vmatprep.mubr.f32.mxu0 %v3797_v34  ;;  %v3818_v54 = vmul.f32 %v3754_v12, %v7134_v15  ;;  %v3823_v34 = vmul.f32 %v3759_v26, %v7150_v20  ;;  %v3767_v20 = vld [vmem:[#allocation5 + $0x1b8] sm:$0xff]  ;;  %v8287_v26 = vld [vmem:[#allocation33_spill] sm:$0xff] }
 0x4a3   : > { %4161 = vmatprep.mubr.f32.mxu1 %v3799_v57  ;;  %v3756_v57 = vld [vmem:[#allocation5 + $0x160] sm:$0xff]  ;;  %v3911_v38 = vmul.f32 %v7742_v42, %v8287_v26 }
 0x4a4   : > { %v3820_v4 = vmul.f32 %v3756_v57, %v8269_v22 }
 0x4a5   : > { %4017 = vmatmul.mubr.f32.gmra.mxu0 %v3796_v47  ;;  %v3822_v47 = vmul.f32 %v3758_v21, %v8270_v55  ;;  %v4345_v21 = vld [vmem:[%s8288_s24] sm:$0xff]  ;;  %s8341_s24 = sld [smem:[#allocation138_spill]] }
 0x4a6   : > { %4162 = vmatmul.mubr.f32.gmra.mxu1 %v3798_v62  ;;  %4021 = vmatprep.mubr.f32.mxu0 %v3801_v30  ;;  %v8271_v62 = vld [vmem:[#allocation118_spill] sm:$0xff]  ;;  %v3827_v30 = vmul.f32 %v3763_v16, %v8272_v40 }
 0x4a7   : > { %4166 = vmatprep.mubr.f32.mxu1 %v3803_v14  ;;  %v3825_v15 = vmul.f32 %v3761_v61, %v8271_v62  ;;  %v3760_v14 = vld [vmem:[#allocation5 + $0x180] sm:$0xff]  ;;  %v8290_v16 = vld [vmem:[#allocation34_spill] sm:$0xff] }
 0x4a8   : > { %v3824_v13 = vmul.f32 %v3760_v14, %v8273_v0  ;;  %v3912_v22 = vmul.f32 %v7742_v42, %v8290_v16 }
 0x4a9   : > { %4022 = vmatmul.mubr.f32.gmra.mxu0 %v3800_v63  ;;  %v3826_v63 = vmul.f32 %v3762_v33, %v8274_v44  ;;  %v8292_v33 = vld [vmem:[#allocation35_spill] sm:$0xff] }
 0x4aa   : > { %4167 = vmatmul.mubr.f32.gmra.mxu1 %v3802_v29  ;;  %4026 = vmatprep.mubr.f32.mxu0 %v3805_v48  ;;  %v8275_v29 = vld [vmem:[#allocation121_spill] sm:$0xff]  ;;  %v8276_v48 = vld [vmem:[#allocation130_spill] sm:$0xff] }
 0x4ab   : > { %4171 = vmatprep.mubr.f32.mxu1 %v3807_v32  ;;  %v3829_v41 = vmul.f32 %v3765_v8, %v8275_v29  ;;  %v3831_v32 = vmul.f32 %v3767_v20, %v8276_v48  ;;  %v3913_v8 = vmul.f32 %v7742_v42, %v8292_v33  ;;  %s8342_s0 = smov %s8341_s24  ;;  %s7935_s1 = scalar_lea.hbm %s8341_s24, %s4832_s29 }
 0x4ad   : > { %4027 = vmatmul.mubr.f32.gmra.mxu0 %v3804_v58  ;;  %v3828_v58 = vmul.f32 %v3764_v43, %v8277_v5 }
 0x4ae   : > { %4172 = vmatmul.mubr.f32.gmra.mxu1 %v3806_v49  ;;  %4031 = vmatprep.mubr.f32.mxu0 %v3809_v31  ;;  %v8278_v49 = vld [vmem:[#allocation129_spill] sm:$0xff]  ;;  %v8279_v31 = vld [vmem:[#allocation123_spill] sm:$0xff] }
 0x4af   : > { %4176 = vmatprep.mubr.f32.mxu1 %v3811_v56  ;;  %v3830_v17 = vmul.f32 %v3766_v19, %v8278_v49  ;;  %v3833_v56 = vmul.f32 %v3769_v1, %v8279_v31 }
 0x4b1   : > { %4032 = vmatmul.mubr.f32.gmra.mxu0 %v3808_v51  ;;  %v3775_v51 = vld [vmem:[#allocation5 + $0x1f8] sm:$0xff] }
 0x4b2   : > { %4177 = vmatmul.mubr.f32.gmra.mxu1 %v3810_v28  ;;  %4036 = vmatprep.mubr.f32.mxu0 %v3813_v9  ;;  %v8281_v28 = vld [vmem:[#allocation122_spill] sm:$0xff]  ;;  %v8282_v9 = vld [vmem:[#allocation131_spill] sm:$0xff]  ;;  %v3839_v11 = vmul.f32 %v3775_v51, %v8284_v25 }
 0x4b3   : > { %4181 = vmatprep.mubr.f32.mxu1 %v3815_v27  ;;  %v3832_v59 = vmul.f32 %v3768_v37, %v8281_v28  ;;  %v3834_v27 = vmul.f32 %v3770_v2, %v8282_v9 }
 0x4b5   : > { %4037 = vmatmul.mubr.f32.gmra.mxu0 %v3812_v7  ;;  %v3774_v7 = vld [vmem:[#allocation5 + $0x1f0] sm:$0xff] }
 0x4b6   : > { %4182 = vmatmul.mubr.f32.gmra.mxu1 %v3814_v23  ;;  %4041 = vmatprep.mubr.f32.mxu0 %v3817_v24  ;;  %v8285_v23 = vld [vmem:[#allocation124_spill] sm:$0xff]  ;;  %v8286_v24 = vld [vmem:[#allocation133_spill] sm:$0xff] }
 0x4b7   : > { %4186 = vmatprep.mubr.f32.mxu1 %v3819_v50  ;;  %v3836_v52 = vmul.f32 %v3772_v45, %v8285_v23  ;;  %v3838_v50 = vmul.f32 %v3774_v7, %v8286_v24  ;;  %v8300_v7 = vld [vmem:[#allocation32_spill] sm:$0xff] }
 0x4b8   : > { %v4231_v23 = vsub.f32 0.0, %v8300_v7 }
 0x4b9   : > { %4042 = vmatmul.mubr.f32.gmra.mxu0 %v3816_v46 }
 0x4ba   : > { %4187 = vmatmul.mubr.f32.gmra.mxu1 %v3818_v54  ;;  %4046 = vmatprep.mubr.f32.mxu0 %v3821_v39 }
 0x4bb   : > { %4191 = vmatprep.mubr.f32.mxu1 %v3823_v34 }
 0x4bd   : > { %4047 = vmatmul.mubr.f32.gmra.mxu0 %v3820_v4 }
 0x4be   : > { %4192 = vmatmul.mubr.f32.gmra.mxu1 %v3822_v47  ;;  %4051 = vmatprep.mubr.f32.mxu0 %v3825_v15 }
 0x4bf   : > { %4196 = vmatprep.mubr.f32.mxu1 %v3827_v30 }
 0x4c1   : > { %4052 = vmatmul.mubr.f32.gmra.mxu0 %v3824_v13 }
 0x4c2   : > { %4197 = vmatmul.mubr.f32.gmra.mxu1 %v3826_v63  ;;  %4056 = vmatprep.mubr.f32.mxu0 %v3829_v41 }
 0x4c3   : > { %4201 = vmatprep.mubr.f32.mxu1 %v3831_v32  ;;  %v8294_v32 = vld [vmem:[#allocation36_spill] sm:$0xff] }
 0x4c4   : > { %v3914_v43 = vmul.f32 %v7742_v42, %v8294_v32 }
 0x4c5   : > { %4057 = vmatmul.mubr.f32.gmra.mxu0 %v3828_v58 }
 0x4c6   : > { %4202 = vmatmul.mubr.f32.gmra.mxu1 %v3830_v17  ;;  %4061 = vmatprep.mubr.f32.mxu0 %v3833_v56  ;;  %v8296_v56 = vld [vmem:[#allocation37_spill] sm:$0xff] }
 0x4c7   : > { %4206 = vmatprep.mubr.f32.mxu1 %v3835_v60  ;;  %v3915_v10 = vmul.f32 %v7742_v42, %v8296_v56 }
 0x4c9   : > { %4062 = vmatmul.mubr.f32.gmra.mxu0 %v3832_v59 }
 0x4ca   : > { %4207 = vmatmul.mubr.f32.gmra.mxu1 %v3834_v27  ;;  %4066 = vmatprep.mubr.f32.mxu0 %v3837_v53  ;;  %v8298_v27 = vld [vmem:[#allocation38_spill] sm:$0xff]  ;;  %v8299_v53 = vld [vmem:[#allocation31_spill] sm:$0xff] }
 0x4cb   : > { %4211 = vmatprep.mubr.f32.mxu1 %v3839_v11  ;;  %v3916_v6 = vmul.f32 %v7742_v42, %v8298_v27  ;;  %v4232_v25 = vsub.f32 0.0, %v8299_v53 }
 0x4cd   : > { %4067 = vmatmul.mubr.f32.gmra.mxu0 %v3836_v52 }
 0x4ce   : > { %4212 = vmatmul.mubr.f32.gmra.mxu1 %v3838_v50  ;;  %5238 = vmatprep.mubr.msk.f32.mxu0 %vm1111_vm3, %v4345_v21 }
 0x551   : > { %v4944_v12 = vpop.f32.mrf.mxu0 }
 0x552   : > { %v5024_v18 = vpop.f32.mrf.mxu1 }
 0x553   : > { %v4945_v46 = vpop.f32.mrf.mxu0 }
 0x554   : > { %v5025_v54 = vpop.f32.mrf.mxu1  ;;  %v4946_v35 = vadd.f32 %v4945_v46, %v4944_v12 }
 0x555   : > { %v5026_v39 = vadd.f32 %v5025_v54, %v5024_v18  ;;  %v4947_v34 = vpop.f32.mrf.mxu0  ;;  %v4263_v54 = vmul.f32 1.442695, %v4232_v25 }
 0x556   : > { %v5027_v57 = vpop.f32.mrf.mxu1  ;;  %v3994_v61 = vadd.f32 %v4946_v35, %v3911_v38  ;;  %v8302_v38 = vld [vmem:[#allocation39_spill] sm:$0xff] }
 0x557   : > { %v4948_v4 = vpop.f32.mrf.mxu0  ;;  %v3917_v46 = vmul.f32 %v7742_v42, %v8302_v38  ;;  %5494 = vpow2.f32 %v4263_v54 }
 0x558   : > { %v5028_v55 = vpop.f32.mrf.mxu1  ;;  %v7752_v47 = vadd.f32 %v5026_v39, %v3994_v61  ;;  %v4949_v62 = vadd.f32 %v4948_v4, %v4947_v34  ;;  %v4261_v34 = vmul.f32 1.442695, %v4231_v23 }
 0x559   : > { %v5029_v15 = vadd.f32 %v5028_v55, %v5027_v57  ;;  %v4950_v40 = vpop.f32.mrf.mxu0  ;;  %v8303_v57 = vld [vmem:[#allocation29_spill] sm:$0xff] }
 0x55a   : > { %8291 = vst [vmem:[#allocation72_spill] sm:$0xff] %v7752_v47  ;;  %v5030_v30 = vpop.f32.mrf.mxu1  ;;  %v3999_v14 = vadd.f32 %v4949_v62, %v3912_v22  ;;  %v4230_v21 = vsub.f32 0.0, %v8303_v57  ;;  %5496 = vpow2.f32 %v4261_v34 }
 0x55b   : > { %v4951_v20 = vpop.f32.mrf.mxu0 }
 0x55c   : > { %v5031_v0 = vpop.f32.mrf.mxu1  ;;  %v7756_v13 = vadd.f32 %v5029_v15, %v3999_v14  ;;  %v4952_v44 = vadd.f32 %v4951_v20, %v4950_v40  ;;  %v8305_v15 = vld [vmem:[#allocation40_spill] sm:$0xff]  ;;  %v4259_v33 = vmul.f32 1.442695, %v4230_v21  ;;  %v8313_v21 = vld [vmem:[#allocation23_spill] sm:$0xff] }
 0x55d   : > { %v5032_v63 = vadd.f32 %v5031_v0, %v5030_v30  ;;  %v4953_v29 = vpop.f32.mrf.mxu0  ;;  %v3918_v40 = vmul.f32 %v7742_v42, %v8305_v15 }
 0x55e   : > { %8293 = vst [vmem:[#allocation49_spill] sm:$0xff] %v7756_v13  ;;  %v5033_v41 = vpop.f32.mrf.mxu1  ;;  %v4004_v48 = vadd.f32 %v4952_v44, %v3913_v8  ;;  %v8306_v8 = vld [vmem:[#allocation30_spill] sm:$0xff]  ;;  %5498 = vpow2.f32 %v4259_v33  ;;  %v8318_v13 = vld [vmem:[#allocation48_spill] sm:$0xff] }
 0x55f   : > { %v4954_v19 = vpop.f32.mrf.mxu0  ;;  %v4229_v20 = vsub.f32 0.0, %v8306_v8 }
 0x560   : > { %v5034_v1 = vpop.f32.mrf.mxu1  ;;  %v7760_v36 = vadd.f32 %v5032_v63, %v4004_v48  ;;  %v4955_v5 = vadd.f32 %v4954_v19, %v4953_v29 }
 0x561   : > { %v5035_v58 = vadd.f32 %v5034_v1, %v5033_v41  ;;  %v4956_v49 = vpop.f32.mrf.mxu0  ;;  %v4257_v19 = vmul.f32 1.442695, %v4229_v20  ;;  %v8308_v1 = vld [vmem:[#allocation27_spill] sm:$0xff] }
 0x562   : > { %8295 = vst [vmem:[#allocation74_spill] sm:$0xff] %v7760_v36  ;;  %v5036_v17 = vpop.f32.mrf.mxu1  ;;  %v4009_v31 = vadd.f32 %v4955_v5, %v3914_v43  ;;  %v4228_v5 = vsub.f32 0.0, %v8308_v1  ;;  %v3926_v36 = vmul.f32 %v7742_v42, %v8318_v13 }
 0x563   : > { %v4957_v60 = vpop.f32.mrf.mxu0  ;;  %5500 = vpow2.f32 %v4257_v19 }
 0x564   : > { %v5037_v37 = vpop.f32.mrf.mxu1  ;;  %v7764_v2 = vadd.f32 %v5035_v58, %v4009_v31  ;;  %v4958_v3 = vadd.f32 %v4957_v60, %v4956_v49  ;;  %v8310_v60 = vld [vmem:[#allocation28_spill] sm:$0xff] }
 0x565   : > { %v5038_v51 = vadd.f32 %v5037_v37, %v5036_v17  ;;  %v4959_v28 = vpop.f32.mrf.mxu0  ;;  %v4227_v37 = vsub.f32 0.0, %v8310_v60 }
 0x566   : > { %8297 = vst [vmem:[#allocation50_spill] sm:$0xff] %v7764_v2  ;;  %v5039_v59 = vpop.f32.mrf.mxu1  ;;  %v4014_v9 = vadd.f32 %v4958_v3, %v3915_v10  ;;  %v4255_v10 = vmul.f32 1.442695, %v4228_v5 }
 0x567   : > { %v4960_v11 = vpop.f32.mrf.mxu0  ;;  %v4253_v25 = vmul.f32 1.442695, %v4227_v37 }
 0x568   : > { %v5040_v45 = vpop.f32.mrf.mxu1  ;;  %v7770_v52 = vadd.f32 %v5038_v51, %v4014_v9  ;;  %v4961_v24 = vadd.f32 %v4960_v11, %v4959_v28  ;;  %v8311_v28 = vld [vmem:[#allocation25_spill] sm:$0xff]  ;;  %v5495_v9 = vpop.eup %5494  ;;  %5502 = vpow2.f32 %v4255_v10 }
 0x569   : > { %v5041_v50 = vadd.f32 %v5040_v45, %v5039_v59  ;;  %v4962_v12 = vpop.f32.mrf.mxu0  ;;  %v4226_v59 = vsub.f32 0.0, %v8311_v28  ;;  %v5497_v11 = vpop.eup %5496  ;;  %5504 = vpow2.f32 %v4253_v25  ;;  %v8315_v10 = vld [vmem:[#allocation21_spill] sm:$0xff] }
 0x56a   : > { %8301 = vst [vmem:[#allocation76_spill] sm:$0xff] %v7770_v52  ;;  %v5042_v18 = vpop.f32.mrf.mxu1  ;;  %v4019_v26 = vadd.f32 %v4961_v24, %v3916_v6  ;;  %v4222_v37 = vsub.f32 0.0, %v8315_v10  ;;  %v8319_v52 = vld [vmem:[#allocation46_spill] sm:$0xff] }
 0x56b   : > { %v4963_v35 = vpop.f32.mrf.mxu0  ;;  %v4251_v24 = vmul.f32 1.442695, %v4226_v59  ;;  %v5499_v54 = vpop.eup %5498 }
 0x56c   : > { %v5043_v39 = vpop.f32.mrf.mxu1  ;;  %v7775_v61 = vadd.f32 %v5041_v50, %v4019_v26  ;;  %v4964_v16 = vadd.f32 %v4963_v35, %v4962_v12  ;;  %v4280_v50 = vadd.f32 1.0, %v5495_v9  ;;  %v8312_v12 = vld [vmem:[#allocation26_spill] sm:$0xff] }
 0x56d   : > { %v5044_v22 = vadd.f32 %v5043_v39, %v5042_v18  ;;  %v4965_v4 = vpop.f32.mrf.mxu0  ;;  %v4225_v18 = vsub.f32 0.0, %v8312_v12  ;;  %5506 = vpow2.f32 %v4251_v24 }
 0x56e   : > { %8304 = vst [vmem:[#allocation51_spill] sm:$0xff] %v7775_v61  ;;  %v5045_v55 = vpop.f32.mrf.mxu1  ;;  %v4024_v62 = vadd.f32 %v4964_v16, %v3917_v46  ;;  %v4279_v46 = vadd.f32 1.0, %v5497_v11  ;;  %5508 = vrcp.f32 %v4280_v50  ;;  %v4224_v16 = vsub.f32 0.0, %v8313_v21  ;;  %v8316_v50 = vld [vmem:[#allocation47_spill] sm:$0xff]  ;;  %v8321_v21 = vld [vmem:[#allocation45_spill] sm:$0xff] }
 0x56f   : > { %v4966_v30 = vpop.f32.mrf.mxu0  ;;  %v4249_v34 = vmul.f32 1.442695, %v4225_v18  ;;  %v3925_v18 = vmul.f32 %v7742_v42, %v8316_v50  ;;  %v3924_v50 = vmul.f32 %v7742_v42, %v8319_v52 }
 0x570   : > { %v5046_v14 = vpop.f32.mrf.mxu1  ;;  %v7780_v0 = vadd.f32 %v5044_v22, %v4024_v62  ;;  %v4967_v44 = vadd.f32 %v4966_v30, %v4965_v4  ;;  %5510 = vrcp.f32 %v4279_v46  ;;  %v5501_v62 = vpop.eup %5500  ;;  %v4247_v30 = vmul.f32 1.442695, %v4224_v16 }
 0x571   : > { %v7782_v63 = vpop.f32.mrf.mxu0  ;;  %v5047_v48 = vadd.f32 %v5046_v14, %v5045_v55  ;;  %v4278_v55 = vadd.f32 1.0, %v5499_v54  ;;  %5512 = vpow2.f32 %v4249_v34  ;;  %v8314_v14 = vld [vmem:[#allocation24_spill] sm:$0xff]  ;;  %v4243_v16 = vmul.f32 1.442695, %v4222_v37 }
 0x572   : > { %8307 = vst [vmem:[#allocation78_spill] sm:$0xff] %v7780_v0  ;;  %v7784_v29 = vpop.f32.mrf.mxu1  ;;  %v4029_v41 = vadd.f32 %v4967_v44, %v3918_v40  ;;  %v4223_v33 = vsub.f32 0.0, %v8314_v14 }
 0x573   : > { %v7786_v32 = vpop.f32.mrf.mxu0  ;;  %5514 = vrcp.f32 %v4278_v55  ;;  %v8317_v55 = vld [vmem:[#allocation22_spill] sm:$0xff] }
 0x574   : > { %v7788_v43 = vpop.f32.mrf.mxu1  ;;  %v7791_v58 = vadd.f32 %v5047_v48, %v4029_v41  ;;  %v4277_v41 = vadd.f32 1.0, %v5501_v62  ;;  %5516 = vpow2.f32 %v4247_v30  ;;  %v4245_v59 = vmul.f32 1.442695, %v4223_v33 }
 0x575   : > { %v7793_v49 = vpop.f32.mrf.mxu0  ;;  %v5503_v48 = vpop.eup %5502  ;;  %v4221_v62 = vsub.f32 0.0, %v8317_v55  ;;  %v8320_v55 = vld [vmem:[#allocation19_spill] sm:$0xff] }
 0x576   : > { %8309 = vst [vmem:[#allocation52_spill] sm:$0xff] %v7791_v58  ;;  %v7795_v17 = vpop.f32.mrf.mxu1  ;;  %5518 = vrcp.f32 %v4277_v41  ;;  %v4276_v11 = vadd.f32 1.0, %v5503_v48  ;;  %v5505_v24 = vpop.eup %5504  ;;  %v4220_v10 = vsub.f32 0.0, %v8320_v55 }
 0x577   : > { %v7797_v31 = vpop.f32.mrf.mxu0  ;;  %5520 = vpow2.f32 %v4245_v59  ;;  %v4275_v41 = vadd.f32 1.0, %v5505_v24  ;;  %v4241_v37 = vmul.f32 1.442695, %v4221_v62  ;;  %v8325_v62 = vld [vmem:[#allocation43_spill] sm:$0xff] }
 0x578   : > { %v7799_v56 = vpop.f32.mrf.mxu1  ;;  %5522 = vrcp.f32 %v4276_v11  ;;  %v3923_v11 = vmul.f32 %v7742_v42, %v8321_v21 }
 0x579   : > { %v7802_v3 = vpop.f32.mrf.mxu0  ;;  %5524 = vpow2.f32 %v4243_v16  ;;  %v8322_v16 = vld [vmem:[#allocation20_spill] sm:$0xff] }
 0x57a   : > { %v7804_v51 = vpop.f32.mrf.mxu1  ;;  %v5507_v47 = vpop.eup %5506  ;;  %5526 = vrcp.f32 %v4275_v41 }
 0x57b   : > { %v7807_v27 = vpop.f32.mrf.mxu0  ;;  %v5509_v30 = vpop.eup %5508  ;;  %v4274_v52 = vadd.f32 1.0, %v5507_v47  ;;  %5528 = vpow2.f32 %v4241_v37 }
 0x57c   : > { %v7809_v6 = vpop.f32.mrf.mxu1  ;;  %v4328_v59 = vmul.f32 %v5509_v30, %v8299_v53  ;;  %v4239_v53 = vmul.f32 1.442695, %v4220_v10  ;;  %v4976_v41 = vadd.f32 %v7807_v27, %v7802_v3 }
 0x57d   : > { %v7811_v45 = vpop.f32.mrf.mxu0  ;;  %v5511_v48 = vpop.eup %5510  ;;  %5530 = vrcp.f32 %v4274_v52 }
 0x57e   : > { %v7813_v23 = vpop.f32.mrf.mxu1  ;;  %v5513_v58 = vpop.eup %5512  ;;  %v4327_v24 = vmul.f32 %v5511_v48, %v8300_v7  ;;  %5532 = vpow2.f32 %v4239_v53 }
 0x57f   : > { %v7816_v26 = vpop.f32.mrf.mxu0  ;;  %v4273_v47 = vadd.f32 1.0, %v5513_v58 }
 0x580   : > { %v7818_v38 = vpop.f32.mrf.mxu1 }
 0x581   : > { %v7820_v35 = vpop.f32.mrf.mxu0  ;;  %5534 = vrcp.f32 %v4273_v47 }
 0x582   : > { %v7822_v39 = vpop.f32.mrf.mxu1 }
 0x583   : > { %v4981_v22 = vpop.f32.mrf.mxu0 }
 0x584   : > { %v7825_v4 = vpop.f32.mrf.mxu1 }
 0x585   : > { %v4983_v15 = vpop.f32.mrf.mxu0 }
 0x586   : > { %v5063_v40 = vpop.f32.mrf.mxu1 }
 0x587   : > { %v4984_v20 = vpop.f32.mrf.mxu0 }
 0x588   : > { %v5064_v44 = vpop.f32.mrf.mxu1 }
 0x589   : > { %v4986_v19 = vpop.f32.mrf.mxu0 }
 0x58a   : > { %v5066_v5 = vpop.f32.mrf.mxu1 }
 0x58b   : > { %v4987_v9 = vpop.f32.mrf.mxu0 }
 0x58c   : > { %v5067_v25 = vpop.f32.mrf.mxu1  ;;  %v4988_v46 = vadd.f32 %v4987_v9, %v4986_v19  ;;  %v4985_v19 = vadd.f32 %v4984_v20, %v4983_v15  ;;  %v5515_v15 = vpop.eup %5514  ;;  %v4982_v20 = vadd.f32 %v4981_v22, %v7820_v35  ;;  %v4979_v35 = vadd.f32 %v7816_v26, %v7811_v45 }
 0x58d   : > { %v4989_v54 = vpop.f32.mrf.mxu0  ;;  %v5068_v0 = vadd.f32 %v5067_v25, %v5066_v5  ;;  %v4219_v5 = vsub.f32 0.0, %v8322_v16  ;;  %v8323_v25 = vld [vmem:[#allocation44_spill] sm:$0xff]  ;;  %v4326_v7 = vmul.f32 %v5515_v15, %v8303_v57  ;;  %v3921_v45 = vmul.f32 %v7742_v42, %v8325_v62 }
 0x58e   : > { %v5069_v34 = vpop.f32.mrf.mxu1  ;;  %v4064_v9 = vadd.f32 %v4988_v46, %v3925_v18  ;;  %v4059_v18 = vadd.f32 %v4985_v19, %v3924_v50  ;;  %v3922_v21 = vmul.f32 %v7742_v42, %v8323_v25  ;;  %v5059_v19 = vadd.f32 %v7818_v38, %v7813_v23 }
 0x58f   : > { %v4990_v33 = vpop.f32.mrf.mxu0  ;;  %v4237_v57 = vmul.f32 1.442695, %v4219_v5  ;;  %v4044_v52 = vadd.f32 %v4976_v41, %v3921_v45  ;;  %v5056_v38 = vadd.f32 %v7809_v6, %v7804_v51  ;;  %v4970_v5 = vadd.f32 %v7786_v32, %v7782_v63 }
 0x590   : > { %v5070_v2 = vpop.f32.mrf.mxu1  ;;  %v4991_v61 = vadd.f32 %v4990_v33, %v4989_v54  ;;  %v4209_v46 = vadd.f32 %v5068_v0, %v4064_v9  ;;  %v4054_v0 = vadd.f32 %v4982_v20, %v3923_v11  ;;  %v4049_v48 = vadd.f32 %v4979_v35, %v3922_v21 }
 0x591   : > { %v5071_v13 = vadd.f32 %v5070_v2, %v5069_v34  ;;  %5536 = vpow2.f32 %v4237_v57  ;;  %v5053_v51 = vadd.f32 %v7799_v56, %v7795_v17  ;;  %v5050_v32 = vadd.f32 %v7788_v43, %v7784_v29 }
 0x592   : > { %v4069_v14 = vadd.f32 %v4991_v61, %v3926_v36  ;;  %v5065_v36 = vadd.f32 %v5064_v44, %v5063_v40  ;;  %v5517_v61 = vpop.eup %5516  ;;  %v4343_v40 = vmul.f32 %v4327_v24, %v4209_v46  ;;  %v8324_v44 = vld [vmem:[#allocation17_spill] sm:$0xff]  ;;  %v4973_v24 = vadd.f32 %v7797_v31, %v7793_v49 }
 0x593   : > { %v5519_v34 = vpop.eup %5518  ;;  %v4218_v58 = vsub.f32 0.0, %v8324_v44  ;;  %v4272_v30 = vadd.f32 1.0, %v5517_v61  ;;  %v4194_v15 = vadd.f32 %v5059_v19, %v4049_v48  ;;  %v8335_v19 = vld [vmem:[#allocation22_spill] sm:$0xff] }
 0x594   : > { %v4214_v54 = vadd.f32 %v5071_v13, %v4069_v14  ;;  %v4204_v22 = vadd.f32 %v5065_v36, %v4059_v18  ;;  %v5062_v14 = vadd.f32 %v7825_v4, %v7822_v39  ;;  %v5521_v10 = vpop.eup %5520  ;;  %v4325_v26 = vmul.f32 %v5519_v34, %v8306_v8  ;;  %v8326_v8 = vld [vmem:[#allocation18_spill] sm:$0xff] }
 0x595   : > { %v5523_v33 = vpop.eup %5522  ;;  %v4235_v9 = vmul.f32 1.442695, %v4218_v58  ;;  %v4217_v37 = vsub.f32 0.0, %v8326_v8  ;;  %v8327_v13 = vld [vmem:[#allocation42_spill] sm:$0xff]  ;;  %5538 = vrcp.f32 %v4272_v30  ;;  %v4271_v27 = vadd.f32 1.0, %v5521_v10  ;;  %v8330_v58 = vld [vmem:[#allocation52_spill] sm:$0xff] }
 0x596   : > { %v4344_v2 = vmul.f32 %v4328_v59, %v4214_v54  ;;  %v4199_v39 = vadd.f32 %v5062_v14, %v4054_v0  ;;  %v4342_v4 = vmul.f32 %v4326_v7, %v4204_v22  ;;  %v5525_v50 = vpop.eup %5524  ;;  %v3920_v59 = vmul.f32 %v7742_v42, %v8327_v13  ;;  %v8331_v10 = vld [vmem:[#allocation24_spill] sm:$0xff] }
 0x597   : > { %v4324_v3 = vmul.f32 %v5523_v33, %v8308_v1  ;;  %v5527_v11 = vpop.eup %5526  ;;  %5540 = vpow2.f32 %v4235_v9  ;;  %v4233_v20 = vmul.f32 1.442695, %v4217_v37  ;;  %v8328_v1 = vld [vmem:[#allocation41_spill] sm:$0xff]  ;;  %v4270_v49 = vadd.f32 1.0, %v5525_v50  ;;  %v8336_v13 = vld [vmem:[#allocation76_spill] sm:$0xff] }
 0x598   : > { %5206 = vmatprep.subr.msk.mxu0 %vm1111_vm3, %v4344_v2  ;;  %v4341_v23 = vmul.f32 %v4325_v26, %v4199_v39  ;;  %v5529_v18 = vpop.eup %5528  ;;  %v3919_v46 = vmul.f32 %v7742_v42, %v8328_v1  ;;  %v4323_v54 = vmul.f32 %v5527_v11, %v8310_v60  ;;  %5542 = vrcp.f32 %v4271_v27  ;;  %v8332_v26 = vld [vmem:[#allocation78_spill] sm:$0xff]  ;;  %v8333_v33 = vld [vmem:[#allocation21_spill] sm:$0xff] }
 0x599   : > { %5207 = vmatpush3.xpose.msk.msra.mxu0 %vm1111_vm3, %v4344_v2  ;;  %v5531_v31 = vpop.eup %5530  ;;  %v4039_v36 = vadd.f32 %v4973_v24, %v3920_v59  ;;  %v4189_v2 = vadd.f32 %v5056_v38, %v4044_v52  ;;  %v4340_v53 = vmul.f32 %v4324_v3, %v4194_v15  ;;  %5544 = vpow2.f32 %v4233_v20  ;;  %v8337_v11 = vld [vmem:[#allocation50_spill] sm:$0xff] }
 0x59a   : > { %5208 = vmatprep.subr.msk.mxu0 %vm1111_vm3, %v4343_v40  ;;  %v5533_v42 = vpop.eup %5532  ;;  %5546 = vrcp.f32 %v4270_v49  ;;  %v4269_v60 = vadd.f32 1.0, %v5529_v18  ;;  %v4034_v61 = vadd.f32 %v4970_v5, %v3919_v46  ;;  %v4322_v63 = vmul.f32 %v5531_v31, %v8311_v28  ;;  %v8339_v18 = vld [vmem:[#allocation49_spill] sm:$0xff]  ;;  %v8340_v46 = vld [vmem:[#allocation72_spill] sm:$0xff] }
 0x59b   : > { %v5535_v6 = vpop.eup %5534  ;;  %v4184_v25 = vadd.f32 %v5053_v51, %v4039_v36  ;;  %v4339_v21 = vmul.f32 %v4323_v54, %v4189_v2  ;;  %v4268_v56 = vadd.f32 1.0, %v5533_v42 }
 0x59c   : > { %v4179_v47 = vadd.f32 %v5050_v32, %v4034_v61  ;;  %v4321_v35 = vmul.f32 %v5535_v6, %v8312_v12  ;;  %5548 = vrcp.f32 %v4269_v60 }
 0x59d   : > { %5209 = vmatpush3.xpose.msk.msra.mxu0 %vm1111_vm3, %v4343_v40  ;;  %v4338_v34 = vmul.f32 %v4322_v63, %v4184_v25  ;;  %v8329_v40 = vld [vmem:[#allocation23_spill] sm:$0xff]  ;;  %5550 = vrcp.f32 %v4268_v56 }
 0x59e   : > { %5210 = vmatprep.subr.msk.mxu0 %vm1111_vm3, %v4342_v4  ;;  %v5537_v17 = vpop.eup %5536  ;;  %v4337_v22 = vmul.f32 %v4321_v35, %v4179_v47 }
 0x59f   : > { %v4267_v29 = vadd.f32 1.0, %v5537_v17 }
 0x5a1   : > { %5211 = vmatpush3.xpose.msk.msra.mxu0 %vm1111_vm3, %v4342_v4  ;;  %5552 = vrcp.f32 %v4267_v29  ;;  %v8334_v4 = vld [vmem:[#allocation51_spill] sm:$0xff] }
 0x5a2   : > { %5212 = vmatprep.subr.msk.mxu0 %vm1111_vm3, %v4341_v23  ;;  %v5539_v7 = vpop.eup %5538 }
 0x5a3   : > { %v4320_v14 = vmul.f32 %v5539_v7, %v8329_v40 }
 0x5a4   : > { %v5541_v28 = vpop.eup %5540 }
 0x5a5   : > { %5213 = vmatpush3.xpose.msk.msra.mxu0 %vm1111_vm3, %v4341_v23  ;;  %v5543_v0 = vpop.eup %5542  ;;  %v4336_v12 = vmul.f32 %v4320_v14, %v8330_v58  ;;  %v4266_v45 = vadd.f32 1.0, %v5541_v28  ;;  %v8338_v23 = vld [vmem:[#allocation74_spill] sm:$0xff] }
 0x5a6   : > { %5214 = vmatprep.subr.msk.mxu0 %vm1111_vm3, %v4340_v53  ;;  %v5545_v43 = vpop.eup %5544  ;;  %v4319_v62 = vmul.f32 %v5543_v0, %v8331_v10 }
 0x5a7   : > { %v5547_v57 = vpop.eup %5546  ;;  %5554 = vrcp.f32 %v4266_v45  ;;  %v4265_v48 = vadd.f32 1.0, %v5545_v43 }
 0x5a8   : > { %v4335_v30 = vmul.f32 %v4319_v62, %v8332_v26  ;;  %v4318_v41 = vmul.f32 %v5547_v57, %v8333_v33 }
 0x5a9   : > { %5215 = vmatpush3.xpose.msk.msra.mxu0 %vm1111_vm3, %v4340_v53  ;;  %v5549_v39 = vpop.eup %5548  ;;  %5556 = vrcp.f32 %v4265_v48 }
 0x5aa   : > { %5216 = vmatprep.subr.msk.mxu0 %vm1111_vm3, %v4339_v21  ;;  %v4334_v50 = vmul.f32 %v4318_v41, %v8334_v4  ;;  %v4317_v9 = vmul.f32 %v5549_v39, %v8335_v19  ;;  %v5551_v37 = vpop.eup %5550 }
 0x5ab   : > { %v4316_v3 = vmul.f32 %v5551_v37, %v8320_v55 }
 0x5ac   : > { %v4333_v59 = vmul.f32 %v4317_v9, %v8336_v13 }
 0x5ad   : > { %5217 = vmatpush3.xpose.msk.msra.mxu0 %vm1111_vm3, %v4339_v21  ;;  %v4332_v24 = vmul.f32 %v4316_v3, %v8337_v11 }
 0x5ae   : > { %5218 = vmatprep.subr.msk.mxu0 %vm1111_vm3, %v4338_v34  ;;  %v5553_v27 = vpop.eup %5552 }
 0x5af   : > { %v4315_v52 = vmul.f32 %v5553_v27, %v8322_v16 }
 0x5b1   : > { %5219 = vmatpush3.xpose.msk.msra.mxu0 %vm1111_vm3, %v4338_v34  ;;  %v4331_v38 = vmul.f32 %v4315_v52, %v8338_v23 }
 0x5b2   : > { %5220 = vmatprep.subr.msk.mxu0 %vm1111_vm3, %v4337_v22 }
 0x5b4   : > { %v5555_v15 = vpop.eup %5554 }
 0x5b5   : > { %5221 = vmatpush3.xpose.msk.msra.mxu0 %vm1111_vm3, %v4337_v22  ;;  %v4314_v55 = vmul.f32 %v5555_v15, %v8324_v44  ;;  %v4346_v44 = vld [vmem:[%s8289_s30 + $0x8] sm:$0xff] }
 0x5b6   : > { %5222 = vmatprep.subr.msk.mxu0 %vm1111_vm3, %v4336_v12  ;;  %v5557_v20 = vpop.eup %5556 }
 0x5b7   : > { %v4330_v1 = vmul.f32 %v4314_v55, %v8339_v18  ;;  %v4313_v16 = vmul.f32 %v5557_v20, %v8326_v8 }
 0x5b9   : > { %5223 = vmatpush3.xpose.msk.msra.mxu0 %vm1111_vm3, %v4336_v12  ;;  %v4329_v54 = vmul.f32 %v4313_v16, %v8340_v46 }
 0x5ba   : > { %5224 = vmatprep.subr.msk.mxu0 %vm1111_vm3, %v4335_v30 }
 0x5bd   : > { %5225 = vmatpush3.xpose.msk.msra.mxu0 %vm1111_vm3, %v4335_v30 }
 0x5be   : > { %5226 = vmatprep.subr.msk.mxu0 %vm1111_vm3, %v4334_v50 }
 0x5c1   : > { %5227 = vmatpush3.xpose.msk.msra.mxu0 %vm1111_vm3, %v4334_v50 }
 0x5c2   : > { %5228 = vmatprep.subr.msk.mxu0 %vm1111_vm3, %v4333_v59 }
 0x5c5   : > { %5229 = vmatpush3.xpose.msk.msra.mxu0 %vm1111_vm3, %v4333_v59 }
 0x5c6   : > { %5230 = vmatprep.subr.msk.mxu0 %vm1111_vm3, %v4332_v24 }
 0x5c9   : > { %5231 = vmatpush3.xpose.msk.msra.mxu0 %vm1111_vm3, %v4332_v24 }
 0x5ca   : > { %5232 = vmatprep.subr.msk.mxu0 %vm1111_vm3, %v4331_v38 }
 0x5cd   : > { %5233 = vmatpush3.xpose.msk.msra.mxu0 %vm1111_vm3, %v4331_v38 }
 0x5ce   : > { %5234 = vmatprep.subr.msk.mxu0 %vm1111_vm3, %v4330_v1 }
 0x5d1   : > { %5235 = vmatpush3.xpose.msk.msra.mxu0 %vm1111_vm3, %v4330_v1 }
 0x5d2   : > { %5236 = vmatprep.subr.msk.mxu0 %vm1111_vm3, %v4329_v54 }
 0x5d5   : > { %5237 = vmatpush3.xpose.msk.msra.mxu0 %vm1111_vm3, %v4329_v54 }
 0x5d8   : > { %5239 = vmatmul.mubr.msk.f32.vlgmr.msra.gmra.mxu0 %vm1111_vm3, %v4346_v44 }
 0x698   : > { %v5240_v8 = vpop.f32.mrf.mxu0 }
 0x699   : > { %4477 = vst [vmem:[%s5861_s28 + $0x8] sm:$0xff] %v5240_v8 }
 0x69a   : > { %v4467_v49 = vpop.f32.mrf.mxu0 }
 0x69b   : > { %4476 = vst [vmem:[%s5861_s28] sm:$0xff] %v4467_v49 }
 0x69c   : > { %5571 = shalt.err (!%p5568_p10)
}
 0x69d   : > { %s5572_s28 = scalar_lea.hbm %s7935_s1, 256  ;;  %s5576_s27 = scalar_lea.hbm %s8342_s0, 1024 }
 0x69e   : > { %p5573_p11 = scmp.ne.s32.totalorder %s7935_s1, %s5572_s28  ;;  %p5577_p0 = scmp.lt.s32.totalorder %s7935_s1, %s8342_s0 }
 0x69f   : > { %p5578_p1 = scmp.lt.s32.totalorder %s5576_s27, %s5572_s28 }
 0x6a0   : > { %p5574_p12 = pnand %p5573_p11, %p5830_p3 }
 0x6a1   : > { %p5579_p2 = por %p5578_p1, %p5577_p0 }
 0x6a2   : > { %p5575_p13 = pneg %p5574_p12 }
 0x6a4   : > { %p5580_p4 = pnand %p5579_p2, %p5575_p13 }
 0x6a6   : > { %5583 = shalt.err (!%p5580_p4)
}
 0x6a7   : > { %s5696_s21 = smov 128   ;;  %s5697_s22 = smov 256  }
 0x6a8   : > { %s5698_s15 = smov 8  }
 0x6a9   : > { %5241 = dma.vmem_to_hbm [thread:$0]  (%p5830_p3), %s7937_s23, 256, %s7935_s1, %s7943_s14, %s5696_s21, %s5697_s22, %s5698_s15  }
 0x6aa PF: > { %s8344_s17 = sld [smem:[#allocation10_spill]]  ;;  %p5247_p5 = scmp.ge.s32.totalorder %s5670_s25, 2 }
 0x6ac   : > { %p5244_p6 = pnand %p5247_p5, %p5839_p8 }
 0x6ae   : > { %p5245_p7 = pneg %p5244_p6 }
 0x6b0   : > { %s4508_s18 = sand.u32 1, %s8344_s17  }
 0x6b1   : > { %s4509_s28 = scalar_lea.sflag [#allocation8], %s4508_s18 }
 0x6b2   : > { %5637 = dma.done.wait (%p5245_p7), %s4509_s28, 256  }
 0x6b3   : > { %5639 = vsyncadd (%p5245_p7), %s4509_s28, 4294967040  ;;  %s28_s25 = sadd.s32 1, %s5670_s25   ;;  %s8346_s27 = sld [smem:[#allocation16_spill]] }
 0x6b4   : > { %p25_p9 = scmp.ge.s32.totalorder %s28_s25, 6   ;;  %s8347_s21 = sld [smem:[#allocation11_spill]] }
 0x6b5   : > { %s8348_s22 = sld [smem:[#allocation12_spill]]  ;;  %s8351_s18 = smov %s5646_s19 }
 0x6b6   : > { %s8349_s23 = sld [smem:[#allocation13_spill]]  ;;  %s8352_s19 = smov %s5650_s20 }
 0x6b7   : > { %s8350_s24 = sld [smem:[#allocation14_spill]]  ;;  %27 = sbr.rel (!%p25_p9) target bundleno = 10 (0xa), region = 140 }
 0x6b9   : > { %s8353_s20 = smov %s8346_s27 }
 0x6bc   :  { %4514 = vsyncpa [#allocation8], 1 }
 0x6bd   :  { %4516 = vsyncpa [#allocation8 + $0x1], 1 }

</bundles_post_ra>
